<compile_context>
chip_gen: v7x
topology: tpu7x:2x2x1
jax: 0.10.0
libtpu: 0.0.40
codegen_flags: <defaults>
</compile_context>

<pallas_src>
import functools

import jax
import jax.numpy as jnp
from jax.experimental import pallas as pl
from jax.experimental.pallas import tpu as pltpu

CP = 128                               # output-channel padding (lane width)
VMEM_LIMIT = 32 * 1024 * 1024


# ----------------------------------------------------------------------------
# Fused conv(KxK, valid) + bias + ReLU + 2x2 maxpool.  One MXU matmul per
# even/odd column plane; accumulation lives entirely inside the MXU.
#   e_ref/o_ref : (nb, 2*hp*wh, kin)  bf16 lane-packed receptive fields
#   w_ref       : (kin, CP)           bf16 packed conv weights
#   b_ref       : (1, CP)             f32 bias
#   out_ref     : (nb, hp*wh, CP)     bf16 pooled output (row = h*wh + w)
# ----------------------------------------------------------------------------
def _conv_pool_kernel(e_ref, o_ref, w_ref, b_ref, out_ref, *, hp, wh):
    nb, rows, kin = e_ref.shape                      # rows == 2*hp*wh
    w = w_ref[...]
    b = b_ref[...]
    e = e_ref[...].reshape(nb * rows, kin)
    o = o_ref[...].reshape(nb * rows, kin)
    ye = jnp.maximum(jnp.dot(e, w, preferred_element_type=jnp.float32) + b, 0.0)
    yo = jnp.maximum(jnp.dot(o, w, preferred_element_type=jnp.float32) + b, 0.0)
    cp = jnp.maximum(ye, yo)                         # column pool (elementwise)
    cp = cp.reshape(nb * hp, 2 * wh, CP)             # 2*wh % 8 == 0 -> aligned
    pooled = jnp.maximum(cp[:, :wh, :], cp[:, wh:, :])   # row pool (aligned slices)
    out_ref[...] = pooled.reshape(nb, hp * wh, CP).astype(out_ref.dtype)


def conv_relu_pool(e, o, w, b, *, hp, wh, nb_blk):
    n, rows, kin = e.shape
    out_rows = hp * wh
    kern = functools.partial(_conv_pool_kernel, hp=hp, wh=wh)
    return pl.pallas_call(
        kern,
        out_shape=jax.ShapeDtypeStruct((n, out_rows, CP), jnp.bfloat16),
        grid_spec=pltpu.PrefetchScalarGridSpec(
            num_scalar_prefetch=0,
            grid=(n // nb_blk,),
            in_specs=[
                pl.BlockSpec((nb_blk, rows, kin), lambda i: (i, 0, 0)),
                pl.BlockSpec((nb_blk, rows, kin), lambda i: (i, 0, 0)),
                pl.BlockSpec((kin, CP), lambda i: (0, 0)),
                pl.BlockSpec((1, CP), lambda i: (0, 0)),
            ],
            out_specs=pl.BlockSpec((nb_blk, out_rows, CP), lambda i: (i, 0, 0)),
        ),
        compiler_params=pltpu.CompilerParams(
            dimension_semantics=("parallel",),
            vmem_limit_bytes=VMEM_LIMIT,
        ),
    )(e, o, w, b)


# ----------------------------------------------------------------------------
# Fused fc1 -> ReLU -> fc2 -> ReLU head (weights resident in VMEM).
# ----------------------------------------------------------------------------
def _fc_head_kernel(x_ref, w1_ref, b1_ref, w2_ref, b2_ref, o_ref):
    h = jnp.dot(x_ref[...], w1_ref[...], preferred_element_type=jnp.float32)
    h = jnp.maximum(h + b1_ref[...], 0.0).astype(jnp.bfloat16)
    y = jnp.dot(h, w2_ref[...], preferred_element_type=jnp.float32)
    o_ref[...] = jnp.maximum(y + b2_ref[...], 0.0)


def fc_head(xflat, w1, b1, w2, b2):
    nb, kin = xflat.shape
    nb8 = ((nb + 7) // 8) * 8                       # full sublane stores
    tm = nb8 if nb8 <= 512 else 256
    nbp = ((nb8 + tm - 1) // tm) * tm
    if nbp != nb:
        xflat = jnp.pad(xflat, ((0, nbp - nb), (0, 0)))
    return pl.pallas_call(
        _fc_head_kernel,
        out_shape=jax.ShapeDtypeStruct((nbp, CP), jnp.float32),
        grid_spec=pltpu.PrefetchScalarGridSpec(
            num_scalar_prefetch=0,
            grid=(nbp // tm,),
            in_specs=[
                pl.BlockSpec((tm, kin), lambda i: (i, 0)),
                pl.BlockSpec((kin, CP), lambda i: (0, 0)),
                pl.BlockSpec((1, CP), lambda i: (0, 0)),
                pl.BlockSpec((CP, CP), lambda i: (0, 0)),
                pl.BlockSpec((1, CP), lambda i: (0, 0)),
            ],
            out_specs=pl.BlockSpec((tm, CP), lambda i: (i, 0)),
        ),
        compiler_params=pltpu.CompilerParams(
            dimension_semantics=("parallel",),
            vmem_limit_bytes=VMEM_LIMIT,
        ),
    )(xflat, w1, b1, w2, b2)


# ----------------------------------------------------------------------------
# Lane-packed im2col, split into even / odd output-column planes (XLA glue).
# Row h*wh_pad + m of E (resp. O) holds the full KxKxC receptive field of output
# pixel (h, 2m) (resp. (h, 2m+1)); lane order is (ki*K + kj)*C + c.  Rows with
# m >= Wo//2 and lanes >= K*K*C are zero padding.
# ----------------------------------------------------------------------------
def _im2col_even_odd(x, *, K, wh_pad, c_pad):
    n, h, w, c = x.shape
    ho, wo = h - K + 1, w - K + 1
    m = wo // 2
    taps_e, taps_o = [], []
    for ki in range(K):
        for kj in range(K):
            taps_e.append(x[:, ki:ki + ho, kj:kj + 2 * m - 1:2, :])
            taps_o.append(x[:, ki:ki + ho, kj + 1:kj + 2 * m:2, :])

    def pack(taps):
        p = jnp.concatenate(taps, axis=-1)                        # (N, Ho, m, K*K*C)
        p = jnp.pad(p, ((0, 0), (0, 0), (0, wh_pad - m), (0, c_pad - K * K * c)))
        return p.reshape(n, ho * wh_pad, c_pad).astype(jnp.bfloat16)

    return pack(taps_e), pack(taps_o)


# ----------------------------------------------------------------------------
# One-time weight packing (all layout permutations folded in here).
# ----------------------------------------------------------------------------
def _pack_conv(w, b, k, kin_pad):
    co, ci = w.shape[0], w.shape[1]
    wk = jnp.transpose(w, (2, 3, 1, 0)).reshape(k * k * ci, co)   # [(ki*k+kj)*ci+c, co]
    wk = jnp.pad(wk, ((0, kin_pad - k * k * ci), (0, CP - co)))
    bk = jnp.pad(b, (0, CP - co)).reshape(1, CP)
    return wk.astype(jnp.bfloat16), bk.astype(jnp.float32)


def _pack_fc1(w, b):
    # PyTorch fc1: (120, 400), input feature index = c*25 + h*5 + w (c<16,h<5,w<5).
    # Our flattened conv2 output feature index = (h*8 + w)*128 + c (w>=5, c>=16 padded 0).
    wt = w.T.reshape(16, 5, 5, 120)                   # [c, h, w, out]
    wt = jnp.transpose(wt, (1, 2, 0, 3))              # [h, w, c, out]
    wt = jnp.pad(wt, ((0, 0), (0, 3), (0, CP - 16), (0, CP - 120)))
    wt = wt.reshape(5 * 8 * CP, CP)
    bk = jnp.pad(b, (0, CP - 120)).reshape(1, CP)
    return wt.astype(jnp.bfloat16), bk.astype(jnp.float32)


def _pack_fc2(w, b):
    wt = jnp.pad(w.T, ((0, CP - 120), (0, CP - 10)))
    bk = jnp.pad(b, (0, CP - 10)).reshape(1, CP)
    return wt.astype(jnp.bfloat16), bk.astype(jnp.float32)


def pack_params(p):
    w1, b1 = _pack_conv(p["conv1_w"], p["conv1_b"], 5, 128)       # 75 real lanes
    w2, b2 = _pack_conv(p["conv2_w"], p["conv2_b"], 5, 256)       # 150 real lanes
    f1w, f1b = _pack_fc1(p["fc1_w"], p["fc1_b"])
    f2w, f2b = _pack_fc2(p["fc2_w"], p["fc2_b"])
    return {"w1": w1, "b1": b1, "w2": w2, "b2": b2,
            "fc1_w": f1w, "fc1_b": f1b, "fc2_w": f2w, "fc2_b": f2b}


# ----------------------------------------------------------------------------
# Forward pass.
# ----------------------------------------------------------------------------
def _batch_blocking(n):
    nb_blk = 4 if n >= 8 else 1
    step = 2 * nb_blk                      # grid length always even (v7x dual-TC)
    n_pad = ((n + step - 1) // step) * step
    return nb_blk, n_pad


@jax.jit
def convnet_forward(packed, x_nchw):
    n = x_nchw.shape[0]
    nb_blk, n_pad = _batch_blocking(n)
    x = jnp.transpose(x_nchw, (0, 2, 3, 1))                       # (N,32,32,3)
    if n_pad != n:
        x = jnp.pad(x, ((0, n_pad - n), (0, 0), (0, 0), (0, 0)))

    # conv1: 32x32x3 -> 28x28x6 -> pool -> 14x14x6  (single K=128 matmul per plane)
    e1, o1 = _im2col_even_odd(x, K=5, wh_pad=16, c_pad=128)       # (N,448,128) bf16
    y1 = conv_relu_pool(e1, o1, packed["w1"], packed["b1"],
                        hp=14, wh=16, nb_blk=nb_blk)              # (N,224,128) bf16

    # Only the valid 14x14x6 region feeds conv2 (garbage cols m>=14 dropped here).
    y1v = y1.reshape(n_pad, 14, 16, CP)[:, :, :14, :6]

    # conv2: 14x14x6 -> 10x10x16 -> pool -> 5x5x16  (single K=256 matmul per plane)
    e2, o2 = _im2col_even_odd(y1v, K=5, wh_pad=8, c_pad=256)      # (N,80,256) bf16
    y2 = conv_relu_pool(e2, o2, packed["w2"], packed["b2"],
                        hp=5, wh=8, nb_blk=nb_blk)                # (N,40,128) bf16

    # fc head: flatten (row=(h*8+w), lane=c); fc1 packed weights are zero on the
    # garbage columns (w>=5) / channels (c>=16), so no masking is needed.
    flat = y2.reshape(n_pad, 40 * CP)                             # (N,5120) bf16
    out = fc_head(flat, packed["fc1_w"], packed["fc1_b"],
                  packed["fc2_w"], packed["fc2_b"])               # (>=N,128) f32
    return out[:n, :10]


# ----------------------------------------------------------------------------
# Init (PyTorch-like uniform(-1/sqrt(fan_in), +1/sqrt(fan_in))) and f32 reference.
# ----------------------------------------------------------------------------
def init_params(key):
    def uniform(k, shape, fan_in):
        bound = float(fan_in) ** -0.5
        return jax.random.uniform(k, shape, jnp.float32, -bound, bound)

    ks = jax.random.split(key, 8)
    return {
        "conv1_w": uniform(ks[0], (6, 3, 5, 5), 75),
        "conv1_b": uniform(ks[1], (6,), 75),
        "conv2_w": uniform(ks[2], (16, 6, 5, 5), 150),
        "conv2_b": uniform(ks[3], (16,), 150),
        "fc1_w": uniform(ks[4], (120, 400), 400),
        "fc1_b": uniform(ks[5], (120,), 400),
        "fc2_w": uniform(ks[6], (10, 120), 120),
        "fc2_b": uniform(ks[7], (10,), 120),
    }


@jax.jit
def reference_forward(p, x_nchw):
    dn = ("NCHW", "OIHW", "NCHW")
    y = jax.lax.conv_general_dilated(x_nchw, p["conv1_w"], (1, 1), "VALID",
                                     dimension_numbers=dn)
    y = jax.nn.relu(y + p["conv1_b"][None, :, None, None])
    y = jax.lax.reduce_window(y, -jnp.inf, jax.lax.max, (1, 1, 2, 2), (1, 1, 2, 2), "VALID")
    y = jax.lax.conv_general_dilated(y, p["conv2_w"], (1, 1), "VALID",
                                     dimension_numbers=dn)
    y = jax.nn.relu(y + p["conv2_b"][None, :, None, None])
    y = jax.lax.reduce_window(y, -jnp.inf, jax.lax.max, (1, 1, 2, 2), (1, 1, 2, 2), "VALID")
    flat = y.reshape(y.shape[0], -1)                              # (N,400), (C,H,W) order
    h1 = jax.nn.relu(flat @ p["fc1_w"].T + p["fc1_b"])
    return jax.nn.relu(h1 @ p["fc2_w"].T + p["fc2_b"])


if __name__ == "__main__":
    key = jax.random.PRNGKey(0)
    k_param, k_x = jax.random.split(key)
    params = init_params(k_param)
    packed = pack_params(params)
    # fc1 expects 16*5*5 features -> spatial size 32 is what the module implies.
    x = jax.random.normal(k_x, (2, 3, 32, 32), dtype=jnp.float32)

    out = jax.block_until_ready(convnet_forward(packed, x))
    assert out.shape == (2, 10), out.shape

    ref = jax.block_until_ready(reference_forward(params, x))
    err = float(jnp.max(jnp.abs(out - ref)))
    assert err < 5e-2, f"max abs err vs f32 reference: {err}"

    print("KERNEL_OK")
</pallas_src>

<mosaic_0001>
module attributes {stable_mosaic.version = 11 : i64} {
  func.func @_conv_pool_kernel(%arg0: i32, %arg1: memref<1x448x128xbf16, #tpu.memory_space<vmem>>, %arg2: memref<1x448x128xbf16, #tpu.memory_space<vmem>>, %arg3: memref<128x128xbf16, #tpu.memory_space<vmem>>, %arg4: memref<1x128xf32, #tpu.memory_space<vmem>>, %arg5: memref<1x224x128xbf16, #tpu.memory_space<vmem>>) attributes {dimension_semantics = [#tpu.dimension_semantics<parallel>], iteration_bounds = array<i64: 2>, scalar_prefetch = 0 : i64, scratch_operands = 0 : i64, tpu.core_type = #tpu.core_type<tc>, window_params = [{transform_indices = @transform_0, window_bounds = array<i64: 1, 448, 128>}, {transform_indices = @transform_1, window_bounds = array<i64: 1, 448, 128>}, {pipeline_mode = #tpu.pipeline_mode<synchronous>, transform_indices = @transform_2, window_bounds = array<i64: 128, 128>}, {pipeline_mode = #tpu.pipeline_mode<synchronous>, transform_indices = @transform_3, window_bounds = array<i64: 1, 128>}, {transform_indices = @transform_4, window_bounds = array<i64: 1, 224, 128>}]} {
    %c0 = arith.constant 0 : index
    %c0_0 = arith.constant 0 : index
    %0 = vector.load %arg3[%c0, %c0_0] : memref<128x128xbf16, #tpu.memory_space<vmem>>, vector<128x128xbf16>
    %c0_1 = arith.constant 0 : index
    %c0_2 = arith.constant 0 : index
    %1 = vector.load %arg4[%c0_1, %c0_2] : memref<1x128xf32, #tpu.memory_space<vmem>>, vector<1x128xf32>
    %c0_3 = arith.constant 0 : index
    %c0_4 = arith.constant 0 : index
    %c0_5 = arith.constant 0 : index
    %2 = vector.load %arg1[%c0_3, %c0_4, %c0_5] : memref<1x448x128xbf16, #tpu.memory_space<vmem>>, vector<1x448x128xbf16>
    %3 = vector.shape_cast %2 : vector<1x448x128xbf16> to vector<448x128xbf16>
    %c0_6 = arith.constant 0 : index
    %c0_7 = arith.constant 0 : index
    %c0_8 = arith.constant 0 : index
    %4 = vector.load %arg2[%c0_6, %c0_7, %c0_8] : memref<1x448x128xbf16, #tpu.memory_space<vmem>>, vector<1x448x128xbf16>
    %5 = vector.shape_cast %4 : vector<1x448x128xbf16> to vector<448x128xbf16>
    %cst = arith.constant dense<0.000000e+00> : vector<448x128xf32>
    %6 = tpu.matmul %3, %0, %cst {dimension_numbers = #tpu.dot_dimension_numbers<[1], [0], [0], [1], [0, 0, 1, 1], [], []>} : vector<448x128xbf16>, vector<128x128xbf16>, vector<448x128xf32> -> vector<448x128xf32>
    %7 = vector.broadcast %1 : vector<1x128xf32> to vector<448x128xf32>
    %8 = arith.addf %6, %7 : vector<448x128xf32>
    %cst_9 = arith.constant 0.000000e+00 : f32
    %9 = vector.broadcast %cst_9 : f32 to vector<448x128xf32>
    %10 = arith.maximumf %8, %9 : vector<448x128xf32>
    %cst_10 = arith.constant dense<0.000000e+00> : vector<448x128xf32>
    %11 = tpu.matmul %5, %0, %cst_10 {dimension_numbers = #tpu.dot_dimension_numbers<[1], [0], [0], [1], [0, 0, 1, 1], [], []>} : vector<448x128xbf16>, vector<128x128xbf16>, vector<448x128xf32> -> vector<448x128xf32>
    %12 = vector.broadcast %1 : vector<1x128xf32> to vector<448x128xf32>
    %13 = arith.addf %11, %12 : vector<448x128xf32>
    %cst_11 = arith.constant 0.000000e+00 : f32
    %14 = vector.broadcast %cst_11 : f32 to vector<448x128xf32>
    %15 = arith.maximumf %13, %14 : vector<448x128xf32>
    %16 = arith.maximumf %10, %15 : vector<448x128xf32>
    %17 = vector.shape_cast %16 : vector<448x128xf32> to vector<14x32x128xf32>
    %18 = vector.extract_strided_slice %17 {offsets = [0, 0, 0], sizes = [14, 16, 128], strides = [1, 1, 1]} : vector<14x32x128xf32> to vector<14x16x128xf32>
    %19 = vector.extract_strided_slice %17 {offsets = [0, 16, 0], sizes = [14, 16, 128], strides = [1, 1, 1]} : vector<14x32x128xf32> to vector<14x16x128xf32>
    %20 = arith.maximumf %18, %19 : vector<14x16x128xf32>
    %21 = vector.shape_cast %20 : vector<14x16x128xf32> to vector<1x224x128xf32>
    %22 = arith.truncf %21 : vector<1x224x128xf32> to vector<1x224x128xbf16>
    %c0_12 = arith.constant 0 : index
    %c0_13 = arith.constant 0 : index
    %c0_14 = arith.constant 0 : index
    %23 = vector.load %arg5[%c0_12, %c0_13, %c0_14] : memref<1x224x128xbf16, #tpu.memory_space<vmem>>, vector<1x224x128xbf16>
    tpu.vector_store %arg5[%c0_12, %c0_13, %c0_14], %22 {strides = array<i32>} : memref<1x224x128xbf16, #tpu.memory_space<vmem>>, vector<1x224x128xbf16>,
    return
  }
  func.func @transform_0(%arg0: i32) -> (i32, i32, i32) {
    %c0_i32 = arith.constant 0 : i32
    %c0_i32_0 = arith.constant 0 : i32
    %c0_i32_1 = arith.constant 0 : i32
    return %arg0, %c0_i32, %c0_i32_0 : i32, i32, i32
  }
  func.func @transform_1(%arg0: i32) -> (i32, i32, i32) {
    %c0_i32 = arith.constant 0 : i32
    %c0_i32_0 = arith.constant 0 : i32
    %c0_i32_1 = arith.constant 0 : i32
    return %arg0, %c0_i32, %c0_i32_0 : i32, i32, i32
  }
  func.func @transform_2(%arg0: i32) -> (i32, i32) {
    %c0_i32 = arith.constant 0 : i32
    %c0_i32_0 = arith.constant 0 : i32
    %c0_i32_1 = arith.constant 0 : i32
    return %c0_i32, %c0_i32_0 : i32, i32
  }
  func.func @transform_3(%arg0: i32) -> (i32, i32) {
    %c0_i32 = arith.constant 0 : i32
    %c0_i32_0 = arith.constant 0 : i32
    %c0_i32_1 = arith.constant 0 : i32
    return %c0_i32, %c0_i32_0 : i32, i32
  }
  func.func @transform_4(%arg0: i32) -> (i32, i32, i32) {
    %c0_i32 = arith.constant 0 : i32
    %c0_i32_0 = arith.constant 0 : i32
    %c0_i32_1 = arith.constant 0 : i32
    return %arg0, %c0_i32, %c0_i32_0 : i32, i32, i32
  }
}

module attributes {stable_mosaic.version = 11 : i64} {
  func.func @_conv_pool_kernel(%arg0: i32, %arg1: memref<1x80x256xbf16, #tpu.memory_space<vmem>>, %arg2: memref<1x80x256xbf16, #tpu.memory_space<vmem>>, %arg3: memref<256x128xbf16, #tpu.memory_space<vmem>>, %arg4: memref<1x128xf32, #tpu.memory_space<vmem>>, %arg5: memref<1x40x128xbf16, #tpu.memory_space<vmem>>) attributes {dimension_semantics = [#tpu.dimension_semantics<parallel>], iteration_bounds = array<i64: 2>, scalar_prefetch = 0 : i64, scratch_operands = 0 : i64, tpu.core_type = #tpu.core_type<tc>, window_params = [{transform_indices = @transform_0, window_bounds = array<i64: 1, 80, 256>}, {transform_indices = @transform_1, window_bounds = array<i64: 1, 80, 256>}, {pipeline_mode = #tpu.pipeline_mode<synchronous>, transform_indices = @transform_2, window_bounds = array<i64: 256, 128>}, {pipeline_mode = #tpu.pipeline_mode<synchronous>, transform_indices = @transform_3, window_bounds = array<i64: 1, 128>}, {transform_indices = @transform_4, window_bounds = array<i64: 1, 40, 128>}]} {
    %c0 = arith.constant 0 : index
    %c0_0 = arith.constant 0 : index
    %0 = vector.load %arg3[%c0, %c0_0] : memref<256x128xbf16, #tpu.memory_space<vmem>>, vector<256x128xbf16>
    %c0_1 = arith.constant 0 : index
    %c0_2 = arith.constant 0 : index
    %1 = vector.load %arg4[%c0_1, %c0_2] : memref<1x128xf32, #tpu.memory_space<vmem>>, vector<1x128xf32>
    %c0_3 = arith.constant 0 : index
    %c0_4 = arith.constant 0 : index
    %c0_5 = arith.constant 0 : index
    %2 = vector.load %arg1[%c0_3, %c0_4, %c0_5] : memref<1x80x256xbf16, #tpu.memory_space<vmem>>, vector<1x80x256xbf16>
    %3 = vector.shape_cast %2 : vector<1x80x256xbf16> to vector<80x256xbf16>
    %c0_6 = arith.constant 0 : index
    %c0_7 = arith.constant 0 : index
    %c0_8 = arith.constant 0 : index
    %4 = vector.load %arg2[%c0_6, %c0_7, %c0_8] : memref<1x80x256xbf16, #tpu.memory_space<vmem>>, vector<1x80x256xbf16>
    %5 = vector.shape_cast %4 : vector<1x80x256xbf16> to vector<80x256xbf16>
    %cst = arith.constant dense<0.000000e+00> : vector<80x128xf32>
    %6 = tpu.matmul %3, %0, %cst {dimension_numbers = #tpu.dot_dimension_numbers<[1], [0], [0], [1], [0, 0, 1, 1], [], []>} : vector<80x256xbf16>, vector<256x128xbf16>, vector<80x128xf32> -> vector<80x128xf32>
    %7 = vector.broadcast %1 : vector<1x128xf32> to vector<80x128xf32>
    %8 = arith.addf %6, %7 : vector<80x128xf32>
    %cst_9 = arith.constant 0.000000e+00 : f32
    %9 = vector.broadcast %cst_9 : f32 to vector<80x128xf32>
    %10 = arith.maximumf %8, %9 : vector<80x128xf32>
    %cst_10 = arith.constant dense<0.000000e+00> : vector<80x128xf32>
    %11 = tpu.matmul %5, %0, %cst_10 {dimension_numbers = #tpu.dot_dimension_numbers<[1], [0], [0], [1], [0, 0, 1, 1], [], []>} : vector<80x256xbf16>, vector<256x128xbf16>, vector<80x128xf32> -> vector<80x128xf32>
    %12 = vector.broadcast %1 : vector<1x128xf32> to vector<80x128xf32>
    %13 = arith.addf %11, %12 : vector<80x128xf32>
    %cst_11 = arith.constant 0.000000e+00 : f32
    %14 = vector.broadcast %cst_11 : f32 to vector<80x128xf32>
    %15 = arith.maximumf %13, %14 : vector<80x128xf32>
    %16 = arith.maximumf %10, %15 : vector<80x128xf32>
    %17 = vector.shape_cast %16 : vector<80x128xf32> to vector<5x16x128xf32>
    %18 = vector.extract_strided_slice %17 {offsets = [0, 0, 0], sizes = [5, 8, 128], strides = [1, 1, 1]} : vector<5x16x128xf32> to vector<5x8x128xf32>
    %19 = vector.extract_strided_slice %17 {offsets = [0, 8, 0], sizes = [5, 8, 128], strides = [1, 1, 1]} : vector<5x16x128xf32> to vector<5x8x128xf32>
    %20 = arith.maximumf %18, %19 : vector<5x8x128xf32>
    %21 = vector.shape_cast %20 : vector<5x8x128xf32> to vector<1x40x128xf32>
    %22 = arith.truncf %21 : vector<1x40x128xf32> to vector<1x40x128xbf16>
    %c0_12 = arith.constant 0 : index
    %c0_13 = arith.constant 0 : index
    %c0_14 = arith.constant 0 : index
    %23 = vector.load %arg5[%c0_12, %c0_13, %c0_14] : memref<1x40x128xbf16, #tpu.memory_space<vmem>>, vector<1x40x128xbf16>
    tpu.vector_store %arg5[%c0_12, %c0_13, %c0_14], %22 {strides = array<i32>} : memref<1x40x128xbf16, #tpu.memory_space<vmem>>, vector<1x40x128xbf16>,
    return
  }
  func.func @transform_0(%arg0: i32) -> (i32, i32, i32) {
    %c0_i32 = arith.constant 0 : i32
    %c0_i32_0 = arith.constant 0 : i32
    %c0_i32_1 = arith.constant 0 : i32
    return %arg0, %c0_i32, %c0_i32_0 : i32, i32, i32
  }
  func.func @transform_1(%arg0: i32) -> (i32, i32, i32) {
    %c0_i32 = arith.constant 0 : i32
    %c0_i32_0 = arith.constant 0 : i32
    %c0_i32_1 = arith.constant 0 : i32
    return %arg0, %c0_i32, %c0_i32_0 : i32, i32, i32
  }
  func.func @transform_2(%arg0: i32) -> (i32, i32) {
    %c0_i32 = arith.constant 0 : i32
    %c0_i32_0 = arith.constant 0 : i32
    %c0_i32_1 = arith.constant 0 : i32
    return %c0_i32, %c0_i32_0 : i32, i32
  }
  func.func @transform_3(%arg0: i32) -> (i32, i32) {
    %c0_i32 = arith.constant 0 : i32
    %c0_i32_0 = arith.constant 0 : i32
    %c0_i32_1 = arith.constant 0 : i32
    return %c0_i32, %c0_i32_0 : i32, i32
  }
  func.func @transform_4(%arg0: i32) -> (i32, i32, i32) {
    %c0_i32 = arith.constant 0 : i32
    %c0_i32_0 = arith.constant 0 : i32
    %c0_i32_1 = arith.constant 0 : i32
    return %arg0, %c0_i32, %c0_i32_0 : i32, i32, i32
  }
}

module attributes {stable_mosaic.version = 11 : i64} {
  func.func @_fc_head_kernel(%arg0: i32, %arg1: memref<8x5120xbf16, #tpu.memory_space<vmem>>, %arg2: memref<5120x128xbf16, #tpu.memory_space<vmem>>, %arg3: memref<1x128xf32, #tpu.memory_space<vmem>>, %arg4: memref<128x128xbf16, #tpu.memory_space<vmem>>, %arg5: memref<1x128xf32, #tpu.memory_space<vmem>>, %arg6: memref<8x128xf32, #tpu.memory_space<vmem>>) attributes {dimension_semantics = [#tpu.dimension_semantics<parallel>], iteration_bounds = array<i64: 1>, scalar_prefetch = 0 : i64, scratch_operands = 0 : i64, tpu.core_type = #tpu.core_type<tc>, window_params = [{transform_indices = @transform_0, window_bounds = array<i64: 8, 5120>}, {pipeline_mode = #tpu.pipeline_mode<synchronous>, transform_indices = @transform_1, window_bounds = array<i64: 5120, 128>}, {pipeline_mode = #tpu.pipeline_mode<synchronous>, transform_indices = @transform_2, window_bounds = array<i64: 1, 128>}, {pipeline_mode = #tpu.pipeline_mode<synchronous>, transform_indices = @transform_3, window_bounds = array<i64: 128, 128>}, {pipeline_mode = #tpu.pipeline_mode<synchronous>, transform_indices = @transform_4, window_bounds = array<i64: 1, 128>}, {transform_indices = @transform_5, window_bounds = array<i64: 8, 128>}]} {
    %c0 = arith.constant 0 : index
    %c0_0 = arith.constant 0 : index
    %0 = vector.load %arg1[%c0, %c0_0] : memref<8x5120xbf16, #tpu.memory_space<vmem>>, vector<8x5120xbf16>
    %c0_1 = arith.constant 0 : index
    %c0_2 = arith.constant 0 : index
    %1 = vector.load %arg2[%c0_1, %c0_2] : memref<5120x128xbf16, #tpu.memory_space<vmem>>, vector<5120x128xbf16>
    %cst = arith.constant dense<0.000000e+00> : vector<8x128xf32>
    %2 = tpu.matmul %0, %1, %cst {dimension_numbers = #tpu.dot_dimension_numbers<[1], [0], [0], [1], [0, 0, 1, 1], [], []>} : vector<8x5120xbf16>, vector<5120x128xbf16>, vector<8x128xf32> -> vector<8x128xf32>
    %c0_3 = arith.constant 0 : index
    %c0_4 = arith.constant 0 : index
    %3 = vector.load %arg3[%c0_3, %c0_4] : memref<1x128xf32, #tpu.memory_space<vmem>>, vector<1x128xf32>
    %4 = vector.broadcast %3 : vector<1x128xf32> to vector<8x128xf32>
    %5 = arith.addf %2, %4 : vector<8x128xf32>
    %cst_5 = arith.constant 0.000000e+00 : f32
    %6 = vector.broadcast %cst_5 : f32 to vector<8x128xf32>
    %7 = arith.maximumf %5, %6 : vector<8x128xf32>
    %8 = arith.truncf %7 : vector<8x128xf32> to vector<8x128xbf16>
    %c0_6 = arith.constant 0 : index
    %c0_7 = arith.constant 0 : index
    %9 = vector.load %arg4[%c0_6, %c0_7] : memref<128x128xbf16, #tpu.memory_space<vmem>>, vector<128x128xbf16>
    %cst_8 = arith.constant dense<0.000000e+00> : vector<8x128xf32>
    %10 = tpu.matmul %8, %9, %cst_8 {dimension_numbers = #tpu.dot_dimension_numbers<[1], [0], [0], [1], [0, 0, 1, 1], [], []>} : vector<8x128xbf16>, vector<128x128xbf16>, vector<8x128xf32> -> vector<8x128xf32>
    %c0_9 = arith.constant 0 : index
    %c0_10 = arith.constant 0 : index
    %11 = vector.load %arg5[%c0_9, %c0_10] : memref<1x128xf32, #tpu.memory_space<vmem>>, vector<1x128xf32>
    %12 = vector.broadcast %11 : vector<1x128xf32> to vector<8x128xf32>
    %13 = arith.addf %10, %12 : vector<8x128xf32>
    %cst_11 = arith.constant 0.000000e+00 : f32
    %14 = vector.broadcast %cst_11 : f32 to vector<8x128xf32>
    %15 = arith.maximumf %13, %14 : vector<8x128xf32>
    %c0_12 = arith.constant 0 : index
    %c0_13 = arith.constant 0 : index
    %16 = vector.load %arg6[%c0_12, %c0_13] : memref<8x128xf32, #tpu.memory_space<vmem>>, vector<8x128xf32>
    tpu.vector_store %arg6[%c0_12, %c0_13], %15 {strides = array<i32>} : memref<8x128xf32, #tpu.memory_space<vmem>>, vector<8x128xf32>,
    return
  }
  func.func @transform_0(%arg0: i32) -> (i32, i32) {
    %c0_i32 = arith.constant 0 : i32
    %c0_i32_0 = arith.constant 0 : i32
    return %arg0, %c0_i32 : i32, i32
  }
  func.func @transform_1(%arg0: i32) -> (i32, i32) {
    %c0_i32 = arith.constant 0 : i32
    %c0_i32_0 = arith.constant 0 : i32
    %c0_i32_1 = arith.constant 0 : i32
    return %c0_i32, %c0_i32_0 : i32, i32
  }
  func.func @transform_2(%arg0: i32) -> (i32, i32) {
    %c0_i32 = arith.constant 0 : i32
    %c0_i32_0 = arith.constant 0 : i32
    %c0_i32_1 = arith.constant 0 : i32
    return %c0_i32, %c0_i32_0 : i32, i32
  }
  func.func @transform_3(%arg0: i32) -> (i32, i32) {
    %c0_i32 = arith.constant 0 : i32
    %c0_i32_0 = arith.constant 0 : i32
    %c0_i32_1 = arith.constant 0 : i32
    return %c0_i32, %c0_i32_0 : i32, i32
  }
  func.func @transform_4(%arg0: i32) -> (i32, i32) {
    %c0_i32 = arith.constant 0 : i32
    %c0_i32_0 = arith.constant 0 : i32
    %c0_i32_1 = arith.constant 0 : i32
    return %c0_i32, %c0_i32_0 : i32, i32
  }
  func.func @transform_5(%arg0: i32) -> (i32, i32) {
    %c0_i32 = arith.constant 0 : i32
    %c0_i32_0 = arith.constant 0 : i32
    return %arg0, %c0_i32 : i32, i32
  }
}

</mosaic_0001>

<bundles_post_ra>
// kernel: convnet_forward.3
= control target key start
LH: loop header
LB: loop body
LE: loop exit
PB: predicated region body
PF: predicated region fallthrough
CT: control target
= control target key end

     0   :  { %s2192_s15 = smov 0   ;;  %s2433_s0 = inlined_call_operand.vmem [shape: bf16[2,448,128], index: 0, kind: input, shape index: {}]   ;;  %s2434_s1 = inlined_call_operand.vmem [shape: bf16[2,448,128], index: 1, kind: input, shape index: {}]   ;;  %s2435_s2 = inlined_call_operand.vmem [shape: bf16[128,128], index: 2, kind: input, shape index: {}]   ;;  %s2436_s3 = inlined_call_operand.vmem [shape: f32[1,128], index: 3, kind: input, shape index: {}]   ;;  %s2437_s4 = inlined_call_operand.vmem [shape: bf16[2,224,128], index: 4, kind: output, shape index: {}]  }
   0x1 LB: > { %s1655_s16 = sadd.s32 4294967295, %s2165_s15   ;;  %p1659_p0 = scmp.ge.s32.totalorder %s2165_s15, 1  ;;  %s2165_s15 = sphi %s2192_s15, %s14_s15  }
   0x2   : > { %p172_p1 = scmp.lt.s32.totalorder %s2165_s15, 3 }
   0x4   : > { %p173_p2 = pnand %p1659_p0, %p172_p1 }
   0x5   : > { %v2095_v0 = vld [vmem:[%s2435_s2] sm:$0xff] (!%p173_p2)   ;;  %p203_p3 = scmp.lt.s32.totalorder (!%p173_p2), %s1655_s16, 1  ;;  %v2096_v1 = vld [vmem:[%s2435_s2 + $0x8] sm:$0xff] (!%p173_p2)   ;;  %v2097_v2 = vld [vmem:[%s2435_s2 + $0x10] sm:$0xff] (!%p173_p2)  }
   0x6   : > { %176 = sbr.rel (%p173_p2) target bundleno = 369 (0x171), region = 36  ;;  %1941 = vmatprep.subr.bf16.mxu0 (!%p173_p2), %v2095_v0  ;;  %2013 = vmatprep.subr.bf16.mxu1 (!%p173_p2), %v2095_v0  ;;  %v2098_v3 = vld [vmem:[%s2435_s2 + $0x18] sm:$0xff] (!%p173_p2)   ;;  %v2099_v6 = vld [vmem:[%s2435_s2 + $0x20] sm:$0xff] (!%p173_p2)   ;;  %v2100_v7 = vld [vmem:[%s2435_s2 + $0x28] sm:$0xff] (!%p173_p2)  }
   0x7   : > { %1942 = vmatpush3.bf16.msra.mxu0 (!%p173_p2), %v2095_v0  ;;  %2014 = vmatpush3.bf16.msra.mxu1 (!%p173_p2), %v2095_v0  ;;  %v2101_v8 = vld [vmem:[%s2435_s2 + $0x30] sm:$0xff] (!%p173_p2)   ;;  %v2102_v9 = vld [vmem:[%s2435_s2 + $0x38] sm:$0xff] (!%p173_p2)   ;;  %v2296_v0 = vld [vmem:[%s2436_s3] ss:$0 sm:$0xff] (!%p173_p2) }
   0x8   : > { %1943 = vmatprep.subr.bf16.mxu0 (!%p173_p2), %v2096_v1  ;;  %2015 = vmatprep.subr.bf16.mxu1 (!%p173_p2), %v2096_v1 }
   0xb   : > { %1944 = vmatpush3.bf16.msra.mxu0 (!%p173_p2), %v2096_v1  ;;  %2016 = vmatpush3.bf16.msra.mxu1 (!%p173_p2), %v2096_v1 }
   0xc   : > { %1945 = vmatprep.subr.bf16.mxu0 (!%p173_p2), %v2097_v2  ;;  %2017 = vmatprep.subr.bf16.mxu1 (!%p173_p2), %v2097_v2 }
   0xd   : > { %s2439_s16 = smov (!%p203_p3, %s1655_s16), 1 }
   0xe   : > { %s2085_s23 = smul.u32 224, %s2439_s16 }
   0xf   : > { %1946 = vmatpush3.bf16.msra.mxu0 %v2097_v2  ;;  %2018 = vmatpush3.bf16.msra.mxu1 %v2097_v2  ;;  %s2086_s18 = smul.u32 112, %s2439_s16 }
  0x10   : > { %s2215_s26 = scalar_lea.vmem %s2433_s0, %s2085_s23  ;;  %s2220_s29 = scalar_lea.vmem %s2434_s1, %s2085_s23  ;;  %1947 = vmatprep.subr.bf16.mxu0 %v2098_v3  ;;  %2019 = vmatprep.subr.bf16.mxu1 %v2098_v3 }
  0x11   : > { %v2103_v4 = vld [vmem:[%s2215_s26] sm:$0xff]   ;;  %v2105_v10 = vld [vmem:[%s2215_s26 + $0x8] sm:$0xff]   ;;  %v2107_v12 = vld [vmem:[%s2215_s26 + $0x10] sm:$0xff]   ;;  %s2314_s16 = scalar_lea.vmem %s2437_s4, %s2086_s18 }
  0x12   : > { %v2104_v5 = vld [vmem:[%s2220_s29] sm:$0xff]   ;;  %1957 = vmatprep.mubr.bf16.mxu0 %v2103_v4  ;;  %v2106_v11 = vld [vmem:[%s2220_s29 + $0x8] sm:$0xff]   ;;  %v2108_v13 = vld [vmem:[%s2220_s29 + $0x10] sm:$0xff]  }
  0x13   : > { %2029 = vmatprep.mubr.bf16.mxu1 %v2104_v5  ;;  %1948 = vmatpush3.bf16.msra.mxu0 %v2098_v3  ;;  %v2109_v14 = vld [vmem:[%s2215_s26 + $0x18] sm:$0xff]   ;;  %v2111_v16 = vld [vmem:[%s2215_s26 + $0x20] sm:$0xff]   ;;  %v2113_v18 = vld [vmem:[%s2215_s26 + $0x28] sm:$0xff]  }
  0x14   : > { %2020 = vmatpush3.bf16.msra.mxu1 %v2098_v3  ;;  %1949 = vmatprep.subr.bf16.mxu0 %v2099_v6  ;;  %v2110_v15 = vld [vmem:[%s2220_s29 + $0x18] sm:$0xff]   ;;  %v2112_v17 = vld [vmem:[%s2220_s29 + $0x20] sm:$0xff]   ;;  %v2114_v19 = vld [vmem:[%s2220_s29 + $0x28] sm:$0xff]  }
  0x15   : > { %2021 = vmatprep.subr.bf16.mxu1 %v2099_v6  ;;  %v2115_v20 = vld [vmem:[%s2215_s26 + $0x30] sm:$0xff]   ;;  %v2117_v22 = vld [vmem:[%s2215_s26 + $0x38] sm:$0xff]   ;;  %v2119_v24 = vld [vmem:[%s2215_s26 + $0x40] sm:$0xff]  }
  0x16   : > { %v2116_v21 = vld [vmem:[%s2220_s29 + $0x30] sm:$0xff]   ;;  %v2118_v23 = vld [vmem:[%s2220_s29 + $0x38] sm:$0xff]   ;;  %v2120_v25 = vld [vmem:[%s2220_s29 + $0x40] sm:$0xff]  }
  0x17   : > { %1950 = vmatpush3.bf16.msra.mxu0 %v2099_v6  ;;  %v2121_v26 = vld [vmem:[%s2215_s26 + $0x48] sm:$0xff]   ;;  %v2123_v28 = vld [vmem:[%s2215_s26 + $0x50] sm:$0xff]   ;;  %v2125_v30 = vld [vmem:[%s2215_s26 + $0x58] sm:$0xff]  }
  0x18   : > { %2022 = vmatpush3.bf16.msra.mxu1 %v2099_v6  ;;  %1951 = vmatprep.subr.bf16.mxu0 %v2100_v7  ;;  %v2122_v27 = vld [vmem:[%s2220_s29 + $0x48] sm:$0xff]   ;;  %v2124_v29 = vld [vmem:[%s2220_s29 + $0x50] sm:$0xff]   ;;  %v2126_v31 = vld [vmem:[%s2220_s29 + $0x58] sm:$0xff]  }
  0x19   : > { %2023 = vmatprep.subr.bf16.mxu1 %v2100_v7  ;;  %v2127_v32 = vld [vmem:[%s2215_s26 + $0x60] sm:$0xff]   ;;  %v2129_v34 = vld [vmem:[%s2215_s26 + $0x68] sm:$0xff]   ;;  %v2131_v36 = vld [vmem:[%s2215_s26 + $0x70] sm:$0xff]  }
  0x1a   : > { %v2128_v33 = vld [vmem:[%s2220_s29 + $0x60] sm:$0xff]   ;;  %v2130_v35 = vld [vmem:[%s2220_s29 + $0x68] sm:$0xff]   ;;  %v2132_v37 = vld [vmem:[%s2220_s29 + $0x70] sm:$0xff]  }
  0x1b   : > { %1952 = vmatpush3.bf16.msra.mxu0 %v2100_v7  ;;  %v2133_v38 = vld [vmem:[%s2215_s26 + $0x78] sm:$0xff]   ;;  %v2135_v40 = vld [vmem:[%s2215_s26 + $0x80] sm:$0xff]   ;;  %v2137_v42 = vld [vmem:[%s2215_s26 + $0x88] sm:$0xff]  }
  0x1c   : > { %2024 = vmatpush3.bf16.msra.mxu1 %v2100_v7  ;;  %1953 = vmatprep.subr.bf16.mxu0 %v2101_v8  ;;  %v2134_v39 = vld [vmem:[%s2220_s29 + $0x78] sm:$0xff]   ;;  %v2136_v41 = vld [vmem:[%s2220_s29 + $0x80] sm:$0xff]   ;;  %v2138_v43 = vld [vmem:[%s2220_s29 + $0x88] sm:$0xff]  }
  0x1d   : > { %2025 = vmatprep.subr.bf16.mxu1 %v2101_v8  ;;  %v2139_v44 = vld [vmem:[%s2215_s26 + $0x90] sm:$0xff]   ;;  %v2141_v46 = vld [vmem:[%s2215_s26 + $0x98] sm:$0xff]   ;;  %v2143_v48 = vld [vmem:[%s2215_s26 + $0xa0] sm:$0xff]  }
  0x1e   : > { %v2140_v45 = vld [vmem:[%s2220_s29 + $0x90] sm:$0xff]   ;;  %v2142_v47 = vld [vmem:[%s2220_s29 + $0x98] sm:$0xff]   ;;  %v2144_v49 = vld [vmem:[%s2220_s29 + $0xa0] sm:$0xff]  }
  0x1f   : > { %1954 = vmatpush3.bf16.msra.mxu0 %v2101_v8  ;;  %v2145_v50 = vld [vmem:[%s2215_s26 + $0xa8] sm:$0xff]   ;;  %v2147_v52 = vld [vmem:[%s2215_s26 + $0xb0] sm:$0xff]   ;;  %v2149_v54 = vld [vmem:[%s2215_s26 + $0xb8] sm:$0xff]  }
  0x20   : > { %2026 = vmatpush3.bf16.msra.mxu1 %v2101_v8  ;;  %1955 = vmatprep.subr.bf16.mxu0 %v2102_v9  ;;  %v2146_v51 = vld [vmem:[%s2220_s29 + $0xa8] sm:$0xff]   ;;  %v2148_v53 = vld [vmem:[%s2220_s29 + $0xb0] sm:$0xff]   ;;  %v2150_v55 = vld [vmem:[%s2220_s29 + $0xb8] sm:$0xff]  }
  0x21   : > { %2027 = vmatprep.subr.bf16.mxu1 %v2102_v9  ;;  %v2151_v56 = vld [vmem:[%s2215_s26 + $0xc0] sm:$0xff]   ;;  %v2153_v58 = vld [vmem:[%s2215_s26 + $0xc8] sm:$0xff]   ;;  %v2155_v60 = vld [vmem:[%s2215_s26 + $0xd0] sm:$0xff]  }
  0x22   : > { %v2152_v57 = vld [vmem:[%s2220_s29 + $0xc0] sm:$0xff]   ;;  %v2154_v59 = vld [vmem:[%s2220_s29 + $0xc8] sm:$0xff]   ;;  %v2156_v61 = vld [vmem:[%s2220_s29 + $0xd0] sm:$0xff]  }
  0x23   : > { %1956 = vmatpush3.bf16.msra.mxu0 %v2102_v9  ;;  %v2157_v62 = vld [vmem:[%s2215_s26 + $0xd8] sm:$0xff]  }
  0x24   : > { %2028 = vmatpush3.bf16.msra.mxu1 %v2102_v9  ;;  %v2158_v63 = vld [vmem:[%s2220_s29 + $0xd8] sm:$0xff]  }
  0x26   : > { %1958 = vmatmul.mubr.bf16.vlgmr.msra.gmra.mrb[0].mxu0 %v2105_v10 }
  0x27   : > { %2030 = vmatmul.mubr.bf16.vlgmr.msra.gmra.mrb[0].mxu1 %v2106_v11  ;;  %1961 = vmatprep.mubr.bf16.mxu0 %v2107_v12 }
  0x28   : > { %2033 = vmatprep.mubr.bf16.mxu1 %v2108_v13 }
  0x2e   : > { %1962 = vmatmul.mubr.bf16.gmra.mrb[4].mxu0 %v2109_v14 }
  0x2f   : > { %2034 = vmatmul.mubr.bf16.gmra.mrb[4].mxu1 %v2110_v15  ;;  %1965 = vmatprep.mubr.bf16.mxu0 %v2111_v16 }
  0x30   : > { %2037 = vmatprep.mubr.bf16.mxu1 %v2112_v17 }
  0x36   : > { %1966 = vmatmul.mubr.bf16.gmra.mrb[8].mxu0 %v2113_v18 }
  0x37   : > { %2038 = vmatmul.mubr.bf16.gmra.mrb[8].mxu1 %v2114_v19  ;;  %1969 = vmatprep.mubr.bf16.mxu0 %v2115_v20 }
  0x38   : > { %2041 = vmatprep.mubr.bf16.mxu1 %v2116_v21 }
  0x3e   : > { %1970 = vmatmul.mubr.bf16.gmra.mrb[12].mxu0 %v2117_v22 }
  0x3f   : > { %2042 = vmatmul.mubr.bf16.gmra.mrb[12].mxu1 %v2118_v23  ;;  %1973 = vmatprep.mubr.bf16.mxu0 %v2119_v24 }
  0x40   : > { %2045 = vmatprep.mubr.bf16.mxu1 %v2120_v25 }
  0x46   : > { %1974 = vmatmul.mubr.bf16.gmra.mrb[16].mxu0 %v2121_v26 }
  0x47   : > { %2046 = vmatmul.mubr.bf16.gmra.mrb[16].mxu1 %v2122_v27  ;;  %1977 = vmatprep.mubr.bf16.mxu0 %v2123_v28 }
  0x48   : > { %2049 = vmatprep.mubr.bf16.mxu1 %v2124_v29 }
  0x4e   : > { %1978 = vmatmul.mubr.bf16.gmra.mrb[20].mxu0 %v2125_v30 }
  0x4f   : > { %2050 = vmatmul.mubr.bf16.gmra.mrb[20].mxu1 %v2126_v31  ;;  %1981 = vmatprep.mubr.bf16.mxu0 %v2127_v32 }
  0x50   : > { %2053 = vmatprep.mubr.bf16.mxu1 %v2128_v33 }
  0x56   : > { %1982 = vmatmul.mubr.bf16.gmra.mrb[24].mxu0 %v2129_v34 }
  0x57   : > { %2054 = vmatmul.mubr.bf16.gmra.mrb[24].mxu1 %v2130_v35  ;;  %1985 = vmatprep.mubr.bf16.mxu0 %v2131_v36 }
  0x58   : > { %2057 = vmatprep.mubr.bf16.mxu1 %v2132_v37 }
  0x5e   : > { %1986 = vmatmul.mubr.bf16.gmra.mrb[28].mxu0 %v2133_v38 }
  0x5f   : > { %2058 = vmatmul.mubr.bf16.gmra.mrb[28].mxu1 %v2134_v39  ;;  %1989 = vmatprep.mubr.bf16.mxu0 %v2135_v40 }
  0x60   : > { %2061 = vmatprep.mubr.bf16.mxu1 %v2136_v41 }
  0x66   : > { %1990 = vmatmul.mubr.bf16.gmra.mrb[32].mxu0 %v2137_v42 }
  0x67   : > { %2062 = vmatmul.mubr.bf16.gmra.mrb[32].mxu1 %v2138_v43  ;;  %1993 = vmatprep.mubr.bf16.mxu0 %v2139_v44 }
  0x68   : > { %2065 = vmatprep.mubr.bf16.mxu1 %v2140_v45 }
  0x6e   : > { %1994 = vmatmul.mubr.bf16.gmra.mrb[36].mxu0 %v2141_v46 }
  0x6f   : > { %2066 = vmatmul.mubr.bf16.gmra.mrb[36].mxu1 %v2142_v47  ;;  %1997 = vmatprep.mubr.bf16.mxu0 %v2143_v48 }
  0x70   : > { %2069 = vmatprep.mubr.bf16.mxu1 %v2144_v49 }
  0x76   : > { %1998 = vmatmul.mubr.bf16.gmra.mrb[40].mxu0 %v2145_v50 }
  0x77   : > { %2070 = vmatmul.mubr.bf16.gmra.mrb[40].mxu1 %v2146_v51  ;;  %2001 = vmatprep.mubr.bf16.mxu0 %v2147_v52 }
  0x78   : > { %2073 = vmatprep.mubr.bf16.mxu1 %v2148_v53 }
  0x7e   : > { %2002 = vmatmul.mubr.bf16.gmra.mrb[44].mxu0 %v2149_v54 }
  0x7f   : > { %2074 = vmatmul.mubr.bf16.gmra.mrb[44].mxu1 %v2150_v55  ;;  %2005 = vmatprep.mubr.bf16.mxu0 %v2151_v56 }
  0x80   : > { %2077 = vmatprep.mubr.bf16.mxu1 %v2152_v57 }
  0x86   : > { %2006 = vmatmul.mubr.bf16.gmra.mrb[48].mxu0 %v2153_v58 }
  0x87   : > { %2078 = vmatmul.mubr.bf16.gmra.mrb[48].mxu1 %v2154_v59  ;;  %2009 = vmatprep.mubr.bf16.mxu0 %v2155_v60 }
  0x88   : > { %2081 = vmatprep.mubr.bf16.mxu1 %v2156_v61 }
  0x8e   : > { %2010 = vmatmul.mubr.bf16.gmra.mrb[52].mxu0 %v2157_v62 }
  0x8f   : > { %2082 = vmatmul.mubr.bf16.gmra.mrb[52].mxu1 %v2158_v63 }
  0xf9   : > { %v1959_v1 = vpop.f32.mrb[0].mxu0 }
  0xfa   : > { %v2031_v2 = vpop.f32.mrb[0].mxu1  ;;  %v613_v3 = vadd.f32 %v1959_v1, %v2296_v0  ;;  %v604_v5 = vpop.f32.mrb[1].mxu0 }
  0xfb   : > { %v1094_v4 = vadd.f32 %v2031_v2, %v2296_v0  ;;  %v1085_v6 = vpop.f32.mrb[1].mxu1  ;;  %v605_v7 = vadd.f32 %v2296_v0, %v604_v5  ;;  %v1960_v9 = vpop.f32.mrb[2].mxu0 }
  0xfc   : > { %v1086_v8 = vadd.f32 %v2296_v0, %v1085_v6  ;;  %v2032_v10 = vpop.f32.mrb[2].mxu1  ;;  %v829_v11 = vmax.f32 %v613_v3, 0.0  ;;  %v616_v13 = vadd.f32 %v1960_v9, %v2296_v0  ;;  %v607_v15 = vpop.f32.mrb[3].mxu0 }
  0xfd   : > { %v1310_v12 = vmax.f32 %v1094_v4, 0.0  ;;  %v1097_v14 = vadd.f32 %v2032_v10, %v2296_v0  ;;  %v1088_v16 = vpop.f32.mrb[3].mxu1  ;;  %v827_v17 = vmax.f32 %v605_v7, 0.0  ;;  %v608_v19 = vadd.f32 %v2296_v0, %v607_v15 }
  0xfe   : > { %v1308_v18 = vmax.f32 %v1086_v8, 0.0  ;;  %v1089_v20 = vadd.f32 %v2296_v0, %v1088_v16  ;;  %v830_v22 = vmax.f32 %v616_v13, 0.0 }
  0xff   : > { %v1366_v21 = vmax.f32 %v829_v11, %v1310_v12  ;;  %v1311_v23 = vmax.f32 %v1097_v14, 0.0  ;;  %v828_v25 = vmax.f32 %v608_v19, 0.0 }
 0x100   : > { %v1364_v24 = vmax.f32 %v827_v17, %v1308_v18  ;;  %v1309_v26 = vmax.f32 %v1089_v20, 0.0 }
 0x101   : > { %v1367_v27 = vmax.f32 %v830_v22, %v1311_v23  ;;  %v1963_v30 = vpop.f32.mrb[4].mxu0 }
 0x102   : > { %v1420_v28 = vmax.f32 %v1364_v24, %v1366_v21  ;;  %v1365_v29 = vmax.f32 %v828_v25, %v1309_v26  ;;  %v2035_v31 = vpop.f32.mrb[4].mxu1  ;;  %v629_v32 = vadd.f32 %v1963_v30, %v2296_v0  ;;  %v620_v34 = vpop.f32.mrb[5].mxu0 }
 0x103   : > { %v1110_v33 = vadd.f32 %v2035_v31, %v2296_v0  ;;  %v1101_v35 = vpop.f32.mrb[5].mxu1  ;;  %v621_v37 = vadd.f32 %v2296_v0, %v620_v34  ;;  %v1964_v39 = vpop.f32.mrb[6].mxu0 }
 0x104   : > { %v1421_v36 = vmax.f32 %v1365_v29, %v1367_v27  ;;  %v1102_v38 = vadd.f32 %v2296_v0, %v1101_v35  ;;  %v2036_v40 = vpop.f32.mrb[6].mxu1  ;;  %v833_v41 = vmax.f32 %v629_v32, 0.0  ;;  %v632_v43 = vadd.f32 %v1964_v39, %v2296_v0  ;;  %v623_v45 = vpop.f32.mrb[7].mxu0 }
 0x105   : > { %v1314_v42 = vmax.f32 %v1110_v33, 0.0  ;;  %v1113_v44 = vadd.f32 %v2036_v40, %v2296_v0  ;;  %v1104_v46 = vpop.f32.mrb[7].mxu1  ;;  %v831_v48 = vmax.f32 %v621_v37, 0.0  ;;  %v624_v50 = vadd.f32 %v2296_v0, %v623_v45 }
 0x106   : > { %v1789_v47 = vpack.c.bf16 %v1421_v36, %v1420_v28  ;;  %v1312_v49 = vmax.f32 %v1102_v38, 0.0  ;;  %v834_v52 = vmax.f32 %v632_v43, 0.0  ;;  %v1105_v54 = vadd.f32 %v2296_v0, %v1104_v46 }
 0x107   : > { %v1370_v51 = vmax.f32 %v833_v41, %v1314_v42  ;;  %v1315_v53 = vmax.f32 %v1113_v44, 0.0  ;;  %v832_v56 = vmax.f32 %v624_v50, 0.0 }
 0x108   : > { %1790 = vst [vmem:[%s2314_s16] sm:$0xff] %v1789_v47   ;;  %v1368_v55 = vmax.f32 %v831_v48, %v1312_v49  ;;  %v1313_v58 = vmax.f32 %v1105_v54, 0.0 }
 0x109   : > { %v1371_v57 = vmax.f32 %v834_v52, %v1315_v53  ;;  %v1967_v60 = vpop.f32.mrb[8].mxu0 }
 0x10a   : > { %v1422_v59 = vmax.f32 %v1368_v55, %v1370_v51  ;;  %v2039_v61 = vpop.f32.mrb[8].mxu1  ;;  %v1369_v62 = vmax.f32 %v832_v56, %v1313_v58  ;;  %v645_v63 = vadd.f32 %v1967_v60, %v2296_v0  ;;  %v636_v2 = vpop.f32.mrb[9].mxu0 }
 0x10b   : > { %v1126_v1 = vadd.f32 %v2039_v61, %v2296_v0  ;;  %v1117_v3 = vpop.f32.mrb[9].mxu1  ;;  %v637_v4 = vadd.f32 %v2296_v0, %v636_v2  ;;  %v1968_v6 = vpop.f32.mrb[10].mxu0 }
 0x10c   : > { %v1118_v5 = vadd.f32 %v2296_v0, %v1117_v3  ;;  %v2040_v7 = vpop.f32.mrb[10].mxu1  ;;  %v1423_v8 = vmax.f32 %v1369_v62, %v1371_v57  ;;  %v837_v9 = vmax.f32 %v645_v63, 0.0  ;;  %v648_v11 = vadd.f32 %v1968_v6, %v2296_v0  ;;  %v639_v12 = vpop.f32.mrb[11].mxu0 }
 0x10d   : > { %v1318_v10 = vmax.f32 %v1126_v1, 0.0  ;;  %v1120_v13 = vpop.f32.mrb[11].mxu1  ;;  %v835_v14 = vmax.f32 %v637_v4, 0.0  ;;  %v1129_v16 = vadd.f32 %v2040_v7, %v2296_v0  ;;  %v640_v17 = vadd.f32 %v2296_v0, %v639_v12 }
 0x10e   : > { %v1316_v15 = vmax.f32 %v1118_v5, 0.0  ;;  %v1794_v18 = vpack.c.bf16 %v1423_v8, %v1422_v59  ;;  %v838_v20 = vmax.f32 %v648_v11, 0.0  ;;  %v1121_v21 = vadd.f32 %v2296_v0, %v1120_v13 }
 0x10f   : > { %v1374_v19 = vmax.f32 %v837_v9, %v1318_v10  ;;  %v1319_v23 = vmax.f32 %v1129_v16, 0.0  ;;  %v836_v24 = vmax.f32 %v640_v17, 0.0 }
 0x110   : > { %v1372_v22 = vmax.f32 %v835_v14, %v1316_v15  ;;  %1856 = vst [vmem:[%s2314_s16 + $0x8] sm:$0xff] %v1794_v18   ;;  %v1317_v25 = vmax.f32 %v1121_v21, 0.0 }
 0x111   : > { %v1375_v27 = vmax.f32 %v838_v20, %v1319_v23  ;;  %v1971_v28 = vpop.f32.mrb[12].mxu0 }
 0x112   : > { %v1424_v26 = vmax.f32 %v1372_v22, %v1374_v19  ;;  %v2043_v29 = vpop.f32.mrb[12].mxu1  ;;  %v1373_v30 = vmax.f32 %v836_v24, %v1317_v25  ;;  %v661_v31 = vadd.f32 %v1971_v28, %v2296_v0  ;;  %v652_v33 = vpop.f32.mrb[13].mxu0 }
 0x113   : > { %v1142_v32 = vadd.f32 %v2043_v29, %v2296_v0  ;;  %v1133_v34 = vpop.f32.mrb[13].mxu1  ;;  %v653_v35 = vadd.f32 %v2296_v0, %v652_v33  ;;  %v1972_v37 = vpop.f32.mrb[14].mxu0 }
 0x114   : > { %v1134_v36 = vadd.f32 %v2296_v0, %v1133_v34  ;;  %v2044_v38 = vpop.f32.mrb[14].mxu1  ;;  %v1425_v39 = vmax.f32 %v1373_v30, %v1375_v27  ;;  %v841_v40 = vmax.f32 %v661_v31, 0.0  ;;  %v664_v42 = vadd.f32 %v1972_v37, %v2296_v0  ;;  %v655_v43 = vpop.f32.mrb[15].mxu0 }
 0x115   : > { %v1322_v41 = vmax.f32 %v1142_v32, 0.0  ;;  %v1136_v44 = vpop.f32.mrb[15].mxu1  ;;  %v839_v45 = vmax.f32 %v653_v35, 0.0  ;;  %v1145_v47 = vadd.f32 %v2044_v38, %v2296_v0  ;;  %v656_v48 = vadd.f32 %v2296_v0, %v655_v43 }
 0x116   : > { %v1320_v46 = vmax.f32 %v1134_v36, 0.0  ;;  %v1799_v49 = vpack.c.bf16 %v1425_v39, %v1424_v26  ;;  %v842_v51 = vmax.f32 %v664_v42, 0.0  ;;  %v1137_v52 = vadd.f32 %v2296_v0, %v1136_v44 }
 0x117   : > { %v1378_v50 = vmax.f32 %v841_v40, %v1322_v41  ;;  %v1323_v54 = vmax.f32 %v1145_v47, 0.0  ;;  %v840_v55 = vmax.f32 %v656_v48, 0.0 }
 0x118   : > { %v1376_v53 = vmax.f32 %v839_v45, %v1320_v46  ;;  %1857 = vst [vmem:[%s2314_s16 + $0x10] sm:$0xff] %v1799_v49   ;;  %v1321_v56 = vmax.f32 %v1137_v52, 0.0 }
 0x119   : > { %v1379_v58 = vmax.f32 %v842_v51, %v1323_v54  ;;  %v1975_v59 = vpop.f32.mrb[16].mxu0 }
 0x11a   : > { %v1426_v57 = vmax.f32 %v1376_v53, %v1378_v50  ;;  %v2047_v60 = vpop.f32.mrb[16].mxu1  ;;  %v1377_v61 = vmax.f32 %v840_v55, %v1321_v56  ;;  %v677_v62 = vadd.f32 %v1975_v59, %v2296_v0  ;;  %v668_v1 = vpop.f32.mrb[17].mxu0 }
 0x11b   : > { %v1158_v63 = vadd.f32 %v2047_v60, %v2296_v0  ;;  %v1149_v2 = vpop.f32.mrb[17].mxu1  ;;  %v669_v3 = vadd.f32 %v2296_v0, %v668_v1  ;;  %v1976_v5 = vpop.f32.mrb[18].mxu0 }
 0x11c   : > { %v1150_v4 = vadd.f32 %v2296_v0, %v1149_v2  ;;  %v2048_v6 = vpop.f32.mrb[18].mxu1  ;;  %v1427_v7 = vmax.f32 %v1377_v61, %v1379_v58  ;;  %v845_v8 = vmax.f32 %v677_v62, 0.0  ;;  %v680_v10 = vadd.f32 %v1976_v5, %v2296_v0  ;;  %v671_v11 = vpop.f32.mrb[19].mxu0 }
 0x11d   : > { %v1326_v9 = vmax.f32 %v1158_v63, 0.0  ;;  %v1152_v12 = vpop.f32.mrb[19].mxu1  ;;  %v843_v13 = vmax.f32 %v669_v3, 0.0  ;;  %v1161_v15 = vadd.f32 %v2048_v6, %v2296_v0  ;;  %v672_v16 = vadd.f32 %v2296_v0, %v671_v11 }
 0x11e   : > { %v1324_v14 = vmax.f32 %v1150_v4, 0.0  ;;  %v1804_v17 = vpack.c.bf16 %v1427_v7, %v1426_v57  ;;  %v846_v19 = vmax.f32 %v680_v10, 0.0  ;;  %v1153_v20 = vadd.f32 %v2296_v0, %v1152_v12 }
 0x11f   : > { %v1382_v18 = vmax.f32 %v845_v8, %v1326_v9  ;;  %v1327_v22 = vmax.f32 %v1161_v15, 0.0  ;;  %v844_v23 = vmax.f32 %v672_v16, 0.0 }
 0x120   : > { %v1380_v21 = vmax.f32 %v843_v13, %v1324_v14  ;;  %1858 = vst [vmem:[%s2314_s16 + $0x18] sm:$0xff] %v1804_v17   ;;  %v1325_v24 = vmax.f32 %v1153_v20, 0.0 }
 0x121   : > { %v1383_v26 = vmax.f32 %v846_v19, %v1327_v22  ;;  %v1979_v27 = vpop.f32.mrb[20].mxu0 }
 0x122   : > { %v1428_v25 = vmax.f32 %v1380_v21, %v1382_v18  ;;  %v2051_v28 = vpop.f32.mrb[20].mxu1  ;;  %v1381_v29 = vmax.f32 %v844_v23, %v1325_v24  ;;  %v693_v30 = vadd.f32 %v1979_v27, %v2296_v0  ;;  %v684_v32 = vpop.f32.mrb[21].mxu0 }
 0x123   : > { %v1174_v31 = vadd.f32 %v2051_v28, %v2296_v0  ;;  %v1165_v33 = vpop.f32.mrb[21].mxu1  ;;  %v685_v34 = vadd.f32 %v2296_v0, %v684_v32  ;;  %v1980_v36 = vpop.f32.mrb[22].mxu0 }
 0x124   : > { %v1166_v35 = vadd.f32 %v2296_v0, %v1165_v33  ;;  %v2052_v37 = vpop.f32.mrb[22].mxu1  ;;  %v1429_v38 = vmax.f32 %v1381_v29, %v1383_v26  ;;  %v849_v39 = vmax.f32 %v693_v30, 0.0  ;;  %v696_v41 = vadd.f32 %v1980_v36, %v2296_v0  ;;  %v687_v42 = vpop.f32.mrb[23].mxu0 }
 0x125   : > { %v1330_v40 = vmax.f32 %v1174_v31, 0.0  ;;  %v1168_v43 = vpop.f32.mrb[23].mxu1  ;;  %v847_v44 = vmax.f32 %v685_v34, 0.0  ;;  %v1177_v46 = vadd.f32 %v2052_v37, %v2296_v0  ;;  %v688_v47 = vadd.f32 %v2296_v0, %v687_v42 }
 0x126   : > { %v1328_v45 = vmax.f32 %v1166_v35, 0.0  ;;  %v1809_v48 = vpack.c.bf16 %v1429_v38, %v1428_v25  ;;  %v850_v50 = vmax.f32 %v696_v41, 0.0  ;;  %v1169_v51 = vadd.f32 %v2296_v0, %v1168_v43 }
 0x127   : > { %v1386_v49 = vmax.f32 %v849_v39, %v1330_v40  ;;  %v1331_v53 = vmax.f32 %v1177_v46, 0.0  ;;  %v848_v54 = vmax.f32 %v688_v47, 0.0 }
 0x128   : > { %v1384_v52 = vmax.f32 %v847_v44, %v1328_v45  ;;  %1859 = vst [vmem:[%s2314_s16 + $0x20] sm:$0xff] %v1809_v48   ;;  %v1329_v55 = vmax.f32 %v1169_v51, 0.0 }
 0x129   : > { %v1387_v57 = vmax.f32 %v850_v50, %v1331_v53  ;;  %v1983_v58 = vpop.f32.mrb[24].mxu0 }
 0x12a   : > { %v1430_v56 = vmax.f32 %v1384_v52, %v1386_v49  ;;  %v2055_v59 = vpop.f32.mrb[24].mxu1  ;;  %v1385_v60 = vmax.f32 %v848_v54, %v1329_v55  ;;  %v709_v61 = vadd.f32 %v1983_v58, %v2296_v0  ;;  %v700_v63 = vpop.f32.mrb[25].mxu0 }
 0x12b   : > { %v1190_v62 = vadd.f32 %v2055_v59, %v2296_v0  ;;  %v1181_v1 = vpop.f32.mrb[25].mxu1  ;;  %v701_v2 = vadd.f32 %v2296_v0, %v700_v63  ;;  %v1984_v4 = vpop.f32.mrb[26].mxu0 }
 0x12c   : > { %v1182_v3 = vadd.f32 %v2296_v0, %v1181_v1  ;;  %v2056_v5 = vpop.f32.mrb[26].mxu1  ;;  %v1431_v6 = vmax.f32 %v1385_v60, %v1387_v57  ;;  %v853_v7 = vmax.f32 %v709_v61, 0.0  ;;  %v712_v9 = vadd.f32 %v1984_v4, %v2296_v0  ;;  %v703_v10 = vpop.f32.mrb[27].mxu0 }
 0x12d   : > { %v1334_v8 = vmax.f32 %v1190_v62, 0.0  ;;  %v1184_v11 = vpop.f32.mrb[27].mxu1  ;;  %v851_v12 = vmax.f32 %v701_v2, 0.0  ;;  %v1193_v14 = vadd.f32 %v2056_v5, %v2296_v0  ;;  %v704_v15 = vadd.f32 %v2296_v0, %v703_v10 }
 0x12e   : > { %v1332_v13 = vmax.f32 %v1182_v3, 0.0  ;;  %v1814_v16 = vpack.c.bf16 %v1431_v6, %v1430_v56  ;;  %v854_v18 = vmax.f32 %v712_v9, 0.0  ;;  %v1185_v19 = vadd.f32 %v2296_v0, %v1184_v11 }
 0x12f   : > { %v1390_v17 = vmax.f32 %v853_v7, %v1334_v8  ;;  %v1335_v21 = vmax.f32 %v1193_v14, 0.0  ;;  %v852_v22 = vmax.f32 %v704_v15, 0.0 }
 0x130   : > { %v1388_v20 = vmax.f32 %v851_v12, %v1332_v13  ;;  %1860 = vst [vmem:[%s2314_s16 + $0x28] sm:$0xff] %v1814_v16   ;;  %v1333_v23 = vmax.f32 %v1185_v19, 0.0 }
 0x131   : > { %v1391_v25 = vmax.f32 %v854_v18, %v1335_v21  ;;  %v1987_v26 = vpop.f32.mrb[28].mxu0 }
 0x132   : > { %v1432_v24 = vmax.f32 %v1388_v20, %v1390_v17  ;;  %v2059_v27 = vpop.f32.mrb[28].mxu1  ;;  %v1389_v28 = vmax.f32 %v852_v22, %v1333_v23  ;;  %v725_v29 = vadd.f32 %v1987_v26, %v2296_v0  ;;  %v716_v31 = vpop.f32.mrb[29].mxu0 }
 0x133   : > { %v1206_v30 = vadd.f32 %v2059_v27, %v2296_v0  ;;  %v1197_v32 = vpop.f32.mrb[29].mxu1  ;;  %v717_v33 = vadd.f32 %v2296_v0, %v716_v31  ;;  %v1988_v35 = vpop.f32.mrb[30].mxu0 }
 0x134   : > { %v1198_v34 = vadd.f32 %v2296_v0, %v1197_v32  ;;  %v2060_v36 = vpop.f32.mrb[30].mxu1  ;;  %v1433_v37 = vmax.f32 %v1389_v28, %v1391_v25  ;;  %v857_v38 = vmax.f32 %v725_v29, 0.0  ;;  %v728_v40 = vadd.f32 %v1988_v35, %v2296_v0  ;;  %v719_v41 = vpop.f32.mrb[31].mxu0 }
 0x135   : > { %v1338_v39 = vmax.f32 %v1206_v30, 0.0  ;;  %v1200_v42 = vpop.f32.mrb[31].mxu1  ;;  %v855_v43 = vmax.f32 %v717_v33, 0.0  ;;  %v1209_v45 = vadd.f32 %v2060_v36, %v2296_v0  ;;  %v720_v46 = vadd.f32 %v2296_v0, %v719_v41 }
 0x136   : > { %v1336_v44 = vmax.f32 %v1198_v34, 0.0  ;;  %v1819_v47 = vpack.c.bf16 %v1433_v37, %v1432_v24  ;;  %v858_v49 = vmax.f32 %v728_v40, 0.0  ;;  %v1201_v50 = vadd.f32 %v2296_v0, %v1200_v42 }
 0x137   : > { %v1394_v48 = vmax.f32 %v857_v38, %v1338_v39  ;;  %v1339_v52 = vmax.f32 %v1209_v45, 0.0  ;;  %v856_v53 = vmax.f32 %v720_v46, 0.0 }
 0x138   : > { %v1392_v51 = vmax.f32 %v855_v43, %v1336_v44  ;;  %1861 = vst [vmem:[%s2314_s16 + $0x30] sm:$0xff] %v1819_v47   ;;  %v1337_v54 = vmax.f32 %v1201_v50, 0.0 }
 0x139   : > { %v1395_v56 = vmax.f32 %v858_v49, %v1339_v52  ;;  %v1991_v57 = vpop.f32.mrb[32].mxu0 }
 0x13a   : > { %v1434_v55 = vmax.f32 %v1392_v51, %v1394_v48  ;;  %v2063_v58 = vpop.f32.mrb[32].mxu1  ;;  %v1393_v59 = vmax.f32 %v856_v53, %v1337_v54  ;;  %v741_v60 = vadd.f32 %v1991_v57, %v2296_v0  ;;  %v732_v62 = vpop.f32.mrb[33].mxu0 }
 0x13b   : > { %v1222_v61 = vadd.f32 %v2063_v58, %v2296_v0  ;;  %v1213_v63 = vpop.f32.mrb[33].mxu1  ;;  %v733_v1 = vadd.f32 %v2296_v0, %v732_v62  ;;  %v1992_v3 = vpop.f32.mrb[34].mxu0 }
 0x13c   : > { %v1214_v2 = vadd.f32 %v2296_v0, %v1213_v63  ;;  %v2064_v4 = vpop.f32.mrb[34].mxu1  ;;  %v1435_v5 = vmax.f32 %v1393_v59, %v1395_v56  ;;  %v861_v6 = vmax.f32 %v741_v60, 0.0  ;;  %v744_v8 = vadd.f32 %v1992_v3, %v2296_v0  ;;  %v735_v9 = vpop.f32.mrb[35].mxu0 }
 0x13d   : > { %v1342_v7 = vmax.f32 %v1222_v61, 0.0  ;;  %v1216_v10 = vpop.f32.mrb[35].mxu1  ;;  %v859_v11 = vmax.f32 %v733_v1, 0.0  ;;  %v1225_v13 = vadd.f32 %v2064_v4, %v2296_v0  ;;  %v736_v14 = vadd.f32 %v2296_v0, %v735_v9 }
 0x13e   : > { %v1340_v12 = vmax.f32 %v1214_v2, 0.0  ;;  %v1824_v15 = vpack.c.bf16 %v1435_v5, %v1434_v55  ;;  %v862_v17 = vmax.f32 %v744_v8, 0.0  ;;  %v1217_v18 = vadd.f32 %v2296_v0, %v1216_v10 }
 0x13f   : > { %v1398_v16 = vmax.f32 %v861_v6, %v1342_v7  ;;  %v1343_v20 = vmax.f32 %v1225_v13, 0.0  ;;  %v860_v21 = vmax.f32 %v736_v14, 0.0 }
 0x140   : > { %v1396_v19 = vmax.f32 %v859_v11, %v1340_v12  ;;  %1862 = vst [vmem:[%s2314_s16 + $0x38] sm:$0xff] %v1824_v15   ;;  %v1341_v22 = vmax.f32 %v1217_v18, 0.0 }
 0x141   : > { %v1399_v24 = vmax.f32 %v862_v17, %v1343_v20  ;;  %v1995_v25 = vpop.f32.mrb[36].mxu0 }
 0x142   : > { %v1436_v23 = vmax.f32 %v1396_v19, %v1398_v16  ;;  %v2067_v26 = vpop.f32.mrb[36].mxu1  ;;  %v1397_v27 = vmax.f32 %v860_v21, %v1341_v22  ;;  %v757_v28 = vadd.f32 %v1995_v25, %v2296_v0  ;;  %v748_v30 = vpop.f32.mrb[37].mxu0 }
 0x143   : > { %v1238_v29 = vadd.f32 %v2067_v26, %v2296_v0  ;;  %v1229_v31 = vpop.f32.mrb[37].mxu1  ;;  %v749_v32 = vadd.f32 %v2296_v0, %v748_v30  ;;  %v1996_v34 = vpop.f32.mrb[38].mxu0 }
 0x144   : > { %v1230_v33 = vadd.f32 %v2296_v0, %v1229_v31  ;;  %v2068_v35 = vpop.f32.mrb[38].mxu1  ;;  %v1437_v36 = vmax.f32 %v1397_v27, %v1399_v24  ;;  %v865_v37 = vmax.f32 %v757_v28, 0.0  ;;  %v760_v39 = vadd.f32 %v1996_v34, %v2296_v0  ;;  %v751_v40 = vpop.f32.mrb[39].mxu0 }
 0x145   : > { %v1346_v38 = vmax.f32 %v1238_v29, 0.0  ;;  %v1232_v41 = vpop.f32.mrb[39].mxu1  ;;  %v863_v42 = vmax.f32 %v749_v32, 0.0  ;;  %v1241_v44 = vadd.f32 %v2068_v35, %v2296_v0  ;;  %v752_v45 = vadd.f32 %v2296_v0, %v751_v40 }
 0x146   : > { %v1344_v43 = vmax.f32 %v1230_v33, 0.0  ;;  %v1829_v46 = vpack.c.bf16 %v1437_v36, %v1436_v23  ;;  %v866_v48 = vmax.f32 %v760_v39, 0.0  ;;  %v1233_v49 = vadd.f32 %v2296_v0, %v1232_v41 }
 0x147   : > { %v1402_v47 = vmax.f32 %v865_v37, %v1346_v38  ;;  %v1347_v51 = vmax.f32 %v1241_v44, 0.0  ;;  %v864_v52 = vmax.f32 %v752_v45, 0.0 }
 0x148   : > { %v1400_v50 = vmax.f32 %v863_v42, %v1344_v43  ;;  %1863 = vst [vmem:[%s2314_s16 + $0x40] sm:$0xff] %v1829_v46   ;;  %v1345_v53 = vmax.f32 %v1233_v49, 0.0 }
 0x149   : > { %v1403_v55 = vmax.f32 %v866_v48, %v1347_v51  ;;  %v1999_v56 = vpop.f32.mrb[40].mxu0 }
 0x14a   : > { %v1438_v54 = vmax.f32 %v1400_v50, %v1402_v47  ;;  %v2071_v57 = vpop.f32.mrb[40].mxu1  ;;  %v1401_v58 = vmax.f32 %v864_v52, %v1345_v53  ;;  %v773_v59 = vadd.f32 %v1999_v56, %v2296_v0  ;;  %v764_v61 = vpop.f32.mrb[41].mxu0 }
 0x14b   : > { %v1254_v60 = vadd.f32 %v2071_v57, %v2296_v0  ;;  %v1245_v62 = vpop.f32.mrb[41].mxu1  ;;  %v765_v63 = vadd.f32 %v2296_v0, %v764_v61  ;;  %v2000_v2 = vpop.f32.mrb[42].mxu0 }
 0x14c   : > { %v1246_v1 = vadd.f32 %v2296_v0, %v1245_v62  ;;  %v2072_v3 = vpop.f32.mrb[42].mxu1  ;;  %v1439_v4 = vmax.f32 %v1401_v58, %v1403_v55  ;;  %v869_v5 = vmax.f32 %v773_v59, 0.0  ;;  %v776_v7 = vadd.f32 %v2000_v2, %v2296_v0  ;;  %v767_v8 = vpop.f32.mrb[43].mxu0 }
 0x14d   : > { %v1350_v6 = vmax.f32 %v1254_v60, 0.0  ;;  %v1248_v9 = vpop.f32.mrb[43].mxu1  ;;  %v867_v10 = vmax.f32 %v765_v63, 0.0  ;;  %v1257_v12 = vadd.f32 %v2072_v3, %v2296_v0  ;;  %v768_v13 = vadd.f32 %v2296_v0, %v767_v8 }
 0x14e   : > { %v1348_v11 = vmax.f32 %v1246_v1, 0.0  ;;  %v1834_v14 = vpack.c.bf16 %v1439_v4, %v1438_v54  ;;  %v870_v16 = vmax.f32 %v776_v7, 0.0  ;;  %v1249_v17 = vadd.f32 %v2296_v0, %v1248_v9 }
 0x14f   : > { %v1406_v15 = vmax.f32 %v869_v5, %v1350_v6  ;;  %v1351_v19 = vmax.f32 %v1257_v12, 0.0  ;;  %v868_v20 = vmax.f32 %v768_v13, 0.0 }
 0x150   : > { %v1404_v18 = vmax.f32 %v867_v10, %v1348_v11  ;;  %1864 = vst [vmem:[%s2314_s16 + $0x48] sm:$0xff] %v1834_v14   ;;  %v1349_v21 = vmax.f32 %v1249_v17, 0.0 }
 0x151   : > { %v1407_v23 = vmax.f32 %v870_v16, %v1351_v19  ;;  %v2003_v24 = vpop.f32.mrb[44].mxu0 }
 0x152   : > { %v1440_v22 = vmax.f32 %v1404_v18, %v1406_v15  ;;  %v2075_v25 = vpop.f32.mrb[44].mxu1  ;;  %v1405_v26 = vmax.f32 %v868_v20, %v1349_v21  ;;  %v789_v27 = vadd.f32 %v2003_v24, %v2296_v0  ;;  %v780_v29 = vpop.f32.mrb[45].mxu0 }
 0x153   : > { %v1270_v28 = vadd.f32 %v2075_v25, %v2296_v0  ;;  %v1261_v30 = vpop.f32.mrb[45].mxu1  ;;  %v781_v31 = vadd.f32 %v2296_v0, %v780_v29  ;;  %v2004_v33 = vpop.f32.mrb[46].mxu0 }
 0x154   : > { %v1262_v32 = vadd.f32 %v2296_v0, %v1261_v30  ;;  %v2076_v34 = vpop.f32.mrb[46].mxu1  ;;  %v1441_v35 = vmax.f32 %v1405_v26, %v1407_v23  ;;  %v873_v36 = vmax.f32 %v789_v27, 0.0  ;;  %v792_v38 = vadd.f32 %v2004_v33, %v2296_v0  ;;  %v783_v39 = vpop.f32.mrb[47].mxu0 }
 0x155   : > { %v1354_v37 = vmax.f32 %v1270_v28, 0.0  ;;  %v1264_v40 = vpop.f32.mrb[47].mxu1  ;;  %v871_v41 = vmax.f32 %v781_v31, 0.0  ;;  %v1273_v43 = vadd.f32 %v2076_v34, %v2296_v0  ;;  %v784_v44 = vadd.f32 %v2296_v0, %v783_v39 }
 0x156   : > { %v1352_v42 = vmax.f32 %v1262_v32, 0.0  ;;  %v1839_v45 = vpack.c.bf16 %v1441_v35, %v1440_v22  ;;  %v874_v47 = vmax.f32 %v792_v38, 0.0  ;;  %v1265_v48 = vadd.f32 %v2296_v0, %v1264_v40 }
 0x157   : > { %v1410_v46 = vmax.f32 %v873_v36, %v1354_v37  ;;  %v1355_v50 = vmax.f32 %v1273_v43, 0.0  ;;  %v872_v51 = vmax.f32 %v784_v44, 0.0 }
 0x158   : > { %v1408_v49 = vmax.f32 %v871_v41, %v1352_v42  ;;  %1865 = vst [vmem:[%s2314_s16 + $0x50] sm:$0xff] %v1839_v45   ;;  %v1353_v52 = vmax.f32 %v1265_v48, 0.0 }
 0x159   : > { %v1411_v54 = vmax.f32 %v874_v47, %v1355_v50  ;;  %v2007_v55 = vpop.f32.mrb[48].mxu0 }
 0x15a   : > { %v1442_v53 = vmax.f32 %v1408_v49, %v1410_v46  ;;  %v2079_v56 = vpop.f32.mrb[48].mxu1  ;;  %v1409_v57 = vmax.f32 %v872_v51, %v1353_v52  ;;  %v805_v58 = vadd.f32 %v2007_v55, %v2296_v0  ;;  %v796_v60 = vpop.f32.mrb[49].mxu0 }
 0x15b   : > { %v1286_v59 = vadd.f32 %v2079_v56, %v2296_v0  ;;  %v1277_v61 = vpop.f32.mrb[49].mxu1  ;;  %v797_v62 = vadd.f32 %v2296_v0, %v796_v60  ;;  %v2008_v1 = vpop.f32.mrb[50].mxu0 }
 0x15c   : > { %v1278_v63 = vadd.f32 %v2296_v0, %v1277_v61  ;;  %v2080_v2 = vpop.f32.mrb[50].mxu1  ;;  %v1443_v3 = vmax.f32 %v1409_v57, %v1411_v54  ;;  %v877_v4 = vmax.f32 %v805_v58, 0.0  ;;  %v808_v6 = vadd.f32 %v2008_v1, %v2296_v0  ;;  %v799_v7 = vpop.f32.mrb[51].mxu0 }
 0x15d   : > { %v1358_v5 = vmax.f32 %v1286_v59, 0.0  ;;  %v1280_v8 = vpop.f32.mrb[51].mxu1  ;;  %v875_v9 = vmax.f32 %v797_v62, 0.0  ;;  %v1289_v11 = vadd.f32 %v2080_v2, %v2296_v0  ;;  %v800_v12 = vadd.f32 %v2296_v0, %v799_v7 }
 0x15e   : > { %v1356_v10 = vmax.f32 %v1278_v63, 0.0  ;;  %v1844_v13 = vpack.c.bf16 %v1443_v3, %v1442_v53  ;;  %v878_v15 = vmax.f32 %v808_v6, 0.0  ;;  %v1281_v16 = vadd.f32 %v2296_v0, %v1280_v8 }
 0x15f   : > { %v1414_v14 = vmax.f32 %v877_v4, %v1358_v5  ;;  %v1359_v18 = vmax.f32 %v1289_v11, 0.0  ;;  %v876_v19 = vmax.f32 %v800_v12, 0.0 }
 0x160   : > { %v1412_v17 = vmax.f32 %v875_v9, %v1356_v10  ;;  %1866 = vst [vmem:[%s2314_s16 + $0x58] sm:$0xff] %v1844_v13   ;;  %v1357_v20 = vmax.f32 %v1281_v16, 0.0 }
 0x161   : > { %v1415_v22 = vmax.f32 %v878_v15, %v1359_v18  ;;  %v2011_v23 = vpop.f32.mrb[52].mxu0 }
 0x162   : > { %v1444_v21 = vmax.f32 %v1412_v17, %v1414_v14  ;;  %v2083_v24 = vpop.f32.mrb[52].mxu1  ;;  %v1413_v25 = vmax.f32 %v876_v19, %v1357_v20  ;;  %v821_v26 = vadd.f32 %v2011_v23, %v2296_v0  ;;  %v812_v28 = vpop.f32.mrb[53].mxu0 }
 0x163   : > { %v1302_v27 = vadd.f32 %v2083_v24, %v2296_v0  ;;  %v1293_v29 = vpop.f32.mrb[53].mxu1  ;;  %v813_v30 = vadd.f32 %v2296_v0, %v812_v28  ;;  %v2012_v32 = vpop.f32.mrb[54].mxu0 }
 0x164   : > { %v1294_v31 = vadd.f32 %v2296_v0, %v1293_v29  ;;  %v2084_v33 = vpop.f32.mrb[54].mxu1  ;;  %v1445_v34 = vmax.f32 %v1413_v25, %v1415_v22  ;;  %v881_v35 = vmax.f32 %v821_v26, 0.0  ;;  %v824_v37 = vadd.f32 %v2012_v32, %v2296_v0  ;;  %v815_v38 = vpop.f32.mrb[55].mxu0 }
 0x165   : > { %v1362_v36 = vmax.f32 %v1302_v27, 0.0  ;;  %v1296_v39 = vpop.f32.mrb[55].mxu1  ;;  %v879_v40 = vmax.f32 %v813_v30, 0.0  ;;  %v1305_v42 = vadd.f32 %v2084_v33, %v2296_v0  ;;  %v816_v43 = vadd.f32 %v2296_v0, %v815_v38 }
 0x166   : > { %v1360_v41 = vmax.f32 %v1294_v31, 0.0  ;;  %v1849_v44 = vpack.c.bf16 %v1445_v34, %v1444_v21  ;;  %v882_v46 = vmax.f32 %v824_v37, 0.0  ;;  %v1297_v47 = vadd.f32 %v2296_v0, %v1296_v39 }
 0x167   : > { %v1418_v45 = vmax.f32 %v881_v35, %v1362_v36  ;;  %v1363_v49 = vmax.f32 %v1305_v42, 0.0  ;;  %v880_v50 = vmax.f32 %v816_v43, 0.0 }
 0x168   : > { %v1416_v48 = vmax.f32 %v879_v40, %v1360_v41  ;;  %1867 = vst [vmem:[%s2314_s16 + $0x60] sm:$0xff] %v1849_v44   ;;  %v1361_v51 = vmax.f32 %v1297_v47, 0.0 }
 0x169   : > { %v1419_v53 = vmax.f32 %v882_v46, %v1363_v49 }
 0x16a   : > { %v1446_v52 = vmax.f32 %v1416_v48, %v1418_v45  ;;  %v1417_v54 = vmax.f32 %v880_v50, %v1361_v51 }
 0x16c   : > { %v1447_v55 = vmax.f32 %v1417_v54, %v1419_v53 }
 0x16e   : > { %v1854_v56 = vpack.c.bf16 %v1447_v55, %v1446_v52 }
 0x170   : > { %1868 = vst [vmem:[%s2314_s16 + $0x68] sm:$0xff] %v1854_v56  }
 0x171 PF: > { %s14_s15 = sadd.s32 1, %s2165_s15  }
 0x172   : > { %p11_p4 = scmp.ge.s32.totalorder %s14_s15, 4  }
 0x174   :  { %13 = sbr.rel (!%p11_p4) target bundleno = 1 (0x1), region = 69 }

// kernel: convnet_forward.4
= control target key start
LH: loop header
LB: loop body
LE: loop exit
PB: predicated region body
PF: predicated region fallthrough
CT: control target
= control target key end

     0   :  { %s997_s15 = smov 0   ;;  %s1123_s0 = inlined_call_operand.vmem [shape: bf16[2,80,256], index: 0, kind: input, shape index: {}]   ;;  %s1124_s1 = inlined_call_operand.vmem [shape: bf16[2,80,256], index: 1, kind: input, shape index: {}]   ;;  %s1125_s2 = inlined_call_operand.vmem [shape: bf16[256,128], index: 2, kind: input, shape index: {}]   ;;  %s1126_s3 = inlined_call_operand.vmem [shape: f32[1,128], index: 3, kind: input, shape index: {}]   ;;  %s1127_s4 = inlined_call_operand.vmem [shape: bf16[2,40,128], index: 4, kind: output, shape index: {}]  }
   0x1 LB: > { %s748_s16 = sadd.s32 4294967295, %s970_s15   ;;  %p752_p0 = scmp.ge.s32.totalorder %s970_s15, 1  ;;  %s970_s15 = sphi %s997_s15, %s14_s15  }
   0x2   : > { %p172_p1 = scmp.lt.s32.totalorder %s970_s15, 3 }
   0x4   : > { %p173_p2 = pnand %p752_p0, %p172_p1 }
   0x5   : > { %v918_v0 = vld [vmem:[%s1125_s2 + $0x40] sm:$0xff] (!%p173_p2)   ;;  %v920_v2 = vld [vmem:[%s1125_s2 + $0x48] sm:$0xff] (!%p173_p2)   ;;  %p203_p3 = scmp.lt.s32.totalorder (!%p173_p2), %s748_s16, 1  ;;  %v922_v4 = vld [vmem:[%s1125_s2 + $0x50] sm:$0xff] (!%p173_p2)  }
   0x6   : > { %176 = sbr.rel (%p173_p2) target bundleno = 298 (0x12a), region = 36  ;;  %v919_v1 = vld [vmem:[%s1125_s2] sm:$0xff] (!%p173_p2)   ;;  %816 = vmatprep.subr.bf16.mxu0 (!%p173_p2), %v918_v0  ;;  %862 = vmatprep.subr.bf16.mxu1 (!%p173_p2), %v918_v0  ;;  %v921_v3 = vld [vmem:[%s1125_s2 + $0x8] sm:$0xff] (!%p173_p2)   ;;  %v923_v5 = vld [vmem:[%s1125_s2 + $0x10] sm:$0xff] (!%p173_p2)  }
   0x7   : > { %817 = vmatpush3.bf16.msra.mxu0 (!%p173_p2), %v919_v1  ;;  %863 = vmatpush3.bf16.msra.mxu1 (!%p173_p2), %v919_v1  ;;  %v924_v6 = vld [vmem:[%s1125_s2 + $0x58] sm:$0xff] (!%p173_p2)   ;;  %v926_v8 = vld [vmem:[%s1125_s2 + $0x60] sm:$0xff] (!%p173_p2)   ;;  %v928_v10 = vld [vmem:[%s1125_s2 + $0x68] sm:$0xff] (!%p173_p2)  }
   0x8   : > { %818 = vmatprep.subr.bf16.mxu0 (!%p173_p2), %v920_v2  ;;  %864 = vmatprep.subr.bf16.mxu1 (!%p173_p2), %v920_v2  ;;  %v925_v7 = vld [vmem:[%s1125_s2 + $0x18] sm:$0xff] (!%p173_p2)   ;;  %v927_v9 = vld [vmem:[%s1125_s2 + $0x20] sm:$0xff] (!%p173_p2)   ;;  %v929_v13 = vld [vmem:[%s1125_s2 + $0x28] sm:$0xff] (!%p173_p2)  }
   0x9   : > { %v930_v14 = vld [vmem:[%s1125_s2 + $0x70] sm:$0xff] (!%p173_p2)   ;;  %v932_v16 = vld [vmem:[%s1125_s2 + $0x78] sm:$0xff] (!%p173_p2)   ;;  %v1089_v38 = vld [vmem:[%s1126_s3] ss:$0 sm:$0xff] (!%p173_p2) }
   0xa   : > { %v931_v15 = vld [vmem:[%s1125_s2 + $0x30] sm:$0xff] (!%p173_p2)   ;;  %v933_v17 = vld [vmem:[%s1125_s2 + $0x38] sm:$0xff] (!%p173_p2)  }
   0xb   : > { %819 = vmatpush3.bf16.msra.mxu0 (!%p173_p2), %v921_v3  ;;  %865 = vmatpush3.bf16.msra.mxu1 (!%p173_p2), %v921_v3 }
   0xc   : > { %820 = vmatprep.subr.bf16.mxu0 (!%p173_p2), %v922_v4  ;;  %866 = vmatprep.subr.bf16.mxu1 (!%p173_p2), %v922_v4 }
   0xd   : > { %s1129_s16 = smov (!%p203_p3, %s748_s16), 1 }
   0xe   : > { %s908_s5 = smul.u32 80, %s1129_s16 }
   0xf   : > { %821 = vmatpush3.bf16.msra.mxu0 %v923_v5  ;;  %867 = vmatpush3.bf16.msra.mxu1 %v923_v5  ;;  %s909_s8 = smul.u32 20, %s1129_s16 }
  0x10   : > { %822 = vmatprep.subr.bf16.mxu0 %v924_v6  ;;  %868 = vmatprep.subr.bf16.mxu1 %v924_v6  ;;  %s1038_s12 = scalar_lea.vmem %s1123_s0, %s908_s5  ;;  %s1046_s19 = scalar_lea.vmem %s1124_s1, %s908_s5 }
  0x11   : > { %v936_v11 = vld [vmem:[%s1038_s12 + $0x4] ss:$8 sps:$4 sm:$0xff]   ;;  %v934_v18 = vld [vmem:[%s1038_s12] ss:$8 sps:$4 sm:$0xff]   ;;  %v940_v20 = vld [vmem:[%s1038_s12 + $0x14] ss:$8 sps:$4 sm:$0xff]   ;;  %s1105_s11 = scalar_lea.vmem %s1127_s4, %s909_s8 }
  0x12   : > { %v939_v12 = vld [vmem:[%s1046_s19 + $0x4] ss:$8 sps:$4 sm:$0xff]   ;;  %456 = vmatprep.mubr.bf16.mxu0 %v936_v11  ;;  %v937_v19 = vld [vmem:[%s1046_s19] ss:$8 sps:$4 sm:$0xff]   ;;  %v942_v21 = vld [vmem:[%s1046_s19 + $0x14] ss:$8 sps:$4 sm:$0xff]  }
  0x13   : > { %823 = vmatpush3.bf16.msra.mxu0 %v925_v7  ;;  %869 = vmatpush3.bf16.msra.mxu1 %v925_v7  ;;  %v944_v22 = vld [vmem:[%s1038_s12 + $0x10] ss:$8 sps:$4 sm:$0xff]   ;;  %v946_v24 = vld [vmem:[%s1038_s12 + $0x24] ss:$8 sps:$4 sm:$0xff]   ;;  %v950_v26 = vld [vmem:[%s1038_s12 + $0x20] ss:$8 sps:$4 sm:$0xff]  }
  0x14   : > { %824 = vmatprep.subr.bf16.mxu0 %v926_v8  ;;  %870 = vmatprep.subr.bf16.mxu1 %v926_v8  ;;  %v945_v23 = vld [vmem:[%s1046_s19 + $0x10] ss:$8 sps:$4 sm:$0xff]   ;;  %v948_v25 = vld [vmem:[%s1046_s19 + $0x24] ss:$8 sps:$4 sm:$0xff]   ;;  %v951_v27 = vld [vmem:[%s1046_s19 + $0x20] ss:$8 sps:$4 sm:$0xff]  }
  0x15   : > { %589 = vmatprep.mubr.bf16.mxu1 %v939_v12  ;;  %v952_v28 = vld [vmem:[%s1038_s12 + $0x34] ss:$8 sps:$4 sm:$0xff]   ;;  %v956_v30 = vld [vmem:[%s1038_s12 + $0x30] ss:$8 sps:$4 sm:$0xff]   ;;  %v958_v32 = vld [vmem:[%s1038_s12 + $0x44] ss:$8 sps:$4 sm:$0xff]  }
  0x16   : > { %v954_v29 = vld [vmem:[%s1046_s19 + $0x34] ss:$8 sps:$4 sm:$0xff]   ;;  %v957_v31 = vld [vmem:[%s1046_s19 + $0x30] ss:$8 sps:$4 sm:$0xff]   ;;  %v960_v33 = vld [vmem:[%s1046_s19 + $0x44] ss:$8 sps:$4 sm:$0xff]  }
  0x17   : > { %825 = vmatpush3.bf16.msra.mxu0 %v927_v9  ;;  %871 = vmatpush3.bf16.msra.mxu1 %v927_v9  ;;  %v962_v34 = vld [vmem:[%s1038_s12 + $0x40] ss:$8 sps:$4 sm:$0xff]  }
  0x18   : > { %826 = vmatprep.subr.bf16.mxu0 %v928_v10  ;;  %872 = vmatprep.subr.bf16.mxu1 %v928_v10  ;;  %v963_v35 = vld [vmem:[%s1046_s19 + $0x40] ss:$8 sps:$4 sm:$0xff]  }
  0x1b   : > { %827 = vmatpush3.bf16.msra.mxu0 %v929_v13  ;;  %873 = vmatpush3.bf16.msra.mxu1 %v929_v13 }
  0x1c   : > { %828 = vmatprep.subr.bf16.mxu0 %v930_v14  ;;  %874 = vmatprep.subr.bf16.mxu1 %v930_v14 }
  0x1f   : > { %829 = vmatpush3.bf16.msra.mxu0 %v931_v15  ;;  %875 = vmatpush3.bf16.msra.mxu1 %v931_v15 }
  0x20   : > { %830 = vmatprep.subr.bf16.mxu0 %v932_v16  ;;  %876 = vmatprep.subr.bf16.mxu1 %v932_v16 }
  0x23   : > { %831 = vmatpush3.bf16.msra.mxu0 %v933_v17  ;;  %877 = vmatpush3.bf16.msra.mxu1 %v933_v17 }
  0x26   : > { %457 = vmatmul.mubr.bf16.vlgmr.msra.gmra.mrb[0].mxu0 %v934_v18  ;;  %590 = vmatmul.mubr.bf16.vlgmr.msra.gmra.mrb[0].mxu1 %v937_v19 }
  0x27   : > { %464 = vmatprep.mubr.bf16.mxu0 %v940_v20  ;;  %597 = vmatprep.mubr.bf16.mxu1 %v942_v21 }
  0x2e   : > { %465 = vmatmul.mubr.bf16.gmra.mrb[4].mxu0 %v944_v22  ;;  %598 = vmatmul.mubr.bf16.gmra.mrb[4].mxu1 %v945_v23 }
  0x2f   : > { %472 = vmatprep.mubr.bf16.mxu0 %v946_v24  ;;  %605 = vmatprep.mubr.bf16.mxu1 %v948_v25 }
  0x36   : > { %473 = vmatmul.mubr.bf16.gmra.mrb[8].mxu0 %v950_v26  ;;  %606 = vmatmul.mubr.bf16.gmra.mrb[8].mxu1 %v951_v27 }
  0x37   : > { %480 = vmatprep.mubr.bf16.mxu0 %v952_v28  ;;  %613 = vmatprep.mubr.bf16.mxu1 %v954_v29 }
  0x3e   : > { %481 = vmatmul.mubr.bf16.gmra.mrb[12].mxu0 %v956_v30  ;;  %614 = vmatmul.mubr.bf16.gmra.mrb[12].mxu1 %v957_v31 }
  0x3f   : > { %488 = vmatprep.mubr.bf16.mxu0 %v958_v32  ;;  %621 = vmatprep.mubr.bf16.mxu1 %v960_v33 }
  0x46   : > { %489 = vmatmul.mubr.bf16.gmra.mrb[16].mxu0 %v962_v34  ;;  %622 = vmatmul.mubr.bf16.gmra.mrb[16].mxu1 %v963_v35 }
  0xf9   : > { %v832_v36 = vpop.f32.mrb[0].mxu0  ;;  %v878_v37 = vpop.f32.mrb[0].mxu1 }
  0xfa   : > { %v833_v39 = vpop.f32.mrb[1].mxu0  ;;  %v879_v40 = vpop.f32.mrb[1].mxu1 }
  0xfb   : > { %v834_v41 = vadd.f32 %v833_v39, %v832_v36  ;;  %v880_v42 = vadd.f32 %v879_v40, %v878_v37  ;;  %v835_v43 = vpop.f32.mrb[2].mxu0  ;;  %v881_v44 = vpop.f32.mrb[2].mxu1 }
  0xfc   : > { %v836_v45 = vpop.f32.mrb[3].mxu0  ;;  %v882_v46 = vpop.f32.mrb[3].mxu1 }
  0xfd   : > { %v459_v47 = vadd.f32 %v834_v41, %v1089_v38  ;;  %v592_v48 = vadd.f32 %v880_v42, %v1089_v38  ;;  %v837_v49 = vadd.f32 %v836_v45, %v835_v43  ;;  %v883_v50 = vadd.f32 %v882_v46, %v881_v44 }
  0xff   : > { %v497_v51 = vmax.f32 %v459_v47, 0.0  ;;  %v630_v52 = vmax.f32 %v592_v48, 0.0  ;;  %v462_v53 = vadd.f32 %v837_v49, %v1089_v38  ;;  %v595_v54 = vadd.f32 %v883_v50, %v1089_v38 }
 0x101   : > { %v640_v55 = vmax.f32 %v497_v51, %v630_v52  ;;  %v498_v56 = vmax.f32 %v462_v53, 0.0  ;;  %v631_v57 = vmax.f32 %v595_v54, 0.0  ;;  %v838_v58 = vpop.f32.mrb[4].mxu0  ;;  %v884_v59 = vpop.f32.mrb[4].mxu1 }
 0x102   : > { %v839_v60 = vpop.f32.mrb[5].mxu0  ;;  %v885_v61 = vpop.f32.mrb[5].mxu1 }
 0x103   : > { %v641_v62 = vmax.f32 %v498_v56, %v631_v57  ;;  %v840_v63 = vadd.f32 %v839_v60, %v838_v58  ;;  %v886_v0 = vadd.f32 %v885_v61, %v884_v59  ;;  %v841_v1 = vpop.f32.mrb[6].mxu0  ;;  %v887_v2 = vpop.f32.mrb[6].mxu1 }
 0x104   : > { %v842_v3 = vpop.f32.mrb[7].mxu0  ;;  %v888_v4 = vpop.f32.mrb[7].mxu1 }
 0x105   : > { %v650_v5 = vmax.f32 %v640_v55, %v641_v62  ;;  %v467_v6 = vadd.f32 %v840_v63, %v1089_v38  ;;  %v600_v7 = vadd.f32 %v886_v0, %v1089_v38  ;;  %v843_v8 = vadd.f32 %v842_v3, %v841_v1 }
 0x106   : > { %v889_v9 = vadd.f32 %v888_v4, %v887_v2 }
 0x107   : > { %v499_v10 = vmax.f32 %v467_v6, 0.0  ;;  %v632_v11 = vmax.f32 %v600_v7, 0.0  ;;  %v470_v12 = vadd.f32 %v843_v8, %v1089_v38 }
 0x108   : > { %v603_v13 = vadd.f32 %v889_v9, %v1089_v38 }
 0x109   : > { %v642_v14 = vmax.f32 %v499_v10, %v632_v11  ;;  %v500_v15 = vmax.f32 %v470_v12, 0.0  ;;  %v844_v16 = vpop.f32.mrb[8].mxu0  ;;  %v890_v17 = vpop.f32.mrb[8].mxu1 }
 0x10a   : > { %v633_v18 = vmax.f32 %v603_v13, 0.0  ;;  %v845_v19 = vpop.f32.mrb[9].mxu0  ;;  %v891_v20 = vpop.f32.mrb[9].mxu1 }
 0x10b   : > { %v846_v21 = vadd.f32 %v845_v19, %v844_v16  ;;  %v892_v22 = vadd.f32 %v891_v20, %v890_v17  ;;  %v847_v23 = vpop.f32.mrb[10].mxu0  ;;  %v893_v24 = vpop.f32.mrb[10].mxu1 }
 0x10c   : > { %v643_v25 = vmax.f32 %v500_v15, %v633_v18  ;;  %v848_v26 = vpop.f32.mrb[11].mxu0  ;;  %v894_v27 = vpop.f32.mrb[11].mxu1 }
 0x10d   : > { %v475_v28 = vadd.f32 %v846_v21, %v1089_v38  ;;  %v608_v29 = vadd.f32 %v892_v22, %v1089_v38  ;;  %v849_v30 = vadd.f32 %v848_v26, %v847_v23  ;;  %v895_v31 = vadd.f32 %v894_v27, %v893_v24 }
 0x10e   : > { %v651_v32 = vmax.f32 %v642_v14, %v643_v25 }
 0x10f   : > { %v501_v33 = vmax.f32 %v475_v28, 0.0  ;;  %v634_v34 = vmax.f32 %v608_v29, 0.0  ;;  %v478_v35 = vadd.f32 %v849_v30, %v1089_v38  ;;  %v611_v36 = vadd.f32 %v895_v31, %v1089_v38 }
 0x110   : > { %v808_v37 = vpack.c.bf16 %v651_v32, %v650_v5 }
 0x111   : > { %v644_v39 = vmax.f32 %v501_v33, %v634_v34  ;;  %v502_v40 = vmax.f32 %v478_v35, 0.0  ;;  %v635_v41 = vmax.f32 %v611_v36, 0.0  ;;  %v850_v42 = vpop.f32.mrb[12].mxu0  ;;  %v896_v43 = vpop.f32.mrb[12].mxu1 }
 0x112   : > { %809 = vst [vmem:[%s1105_s11] sm:$0xff] %v808_v37   ;;  %v851_v44 = vpop.f32.mrb[13].mxu0  ;;  %v897_v45 = vpop.f32.mrb[13].mxu1 }
 0x113   : > { %v645_v46 = vmax.f32 %v502_v40, %v635_v41  ;;  %v852_v47 = vadd.f32 %v851_v44, %v850_v42  ;;  %v898_v48 = vadd.f32 %v897_v45, %v896_v43  ;;  %v853_v49 = vpop.f32.mrb[14].mxu0  ;;  %v899_v50 = vpop.f32.mrb[14].mxu1 }
 0x114   : > { %v854_v51 = vpop.f32.mrb[15].mxu0  ;;  %v900_v52 = vpop.f32.mrb[15].mxu1 }
 0x115   : > { %v652_v53 = vmax.f32 %v644_v39, %v645_v46  ;;  %v483_v54 = vadd.f32 %v852_v47, %v1089_v38  ;;  %v616_v55 = vadd.f32 %v898_v48, %v1089_v38  ;;  %v855_v56 = vadd.f32 %v854_v51, %v853_v49 }
 0x116   : > { %v901_v57 = vadd.f32 %v900_v52, %v899_v50 }
 0x117   : > { %v503_v58 = vmax.f32 %v483_v54, 0.0  ;;  %v636_v59 = vmax.f32 %v616_v55, 0.0  ;;  %v486_v60 = vadd.f32 %v855_v56, %v1089_v38 }
 0x118   : > { %v619_v61 = vadd.f32 %v901_v57, %v1089_v38 }
 0x119   : > { %v646_v62 = vmax.f32 %v503_v58, %v636_v59  ;;  %v504_v63 = vmax.f32 %v486_v60, 0.0  ;;  %v856_v0 = vpop.f32.mrb[16].mxu0  ;;  %v902_v1 = vpop.f32.mrb[16].mxu1 }
 0x11a   : > { %v637_v2 = vmax.f32 %v619_v61, 0.0  ;;  %v857_v3 = vpop.f32.mrb[17].mxu0  ;;  %v903_v4 = vpop.f32.mrb[17].mxu1 }
 0x11b   : > { %v858_v5 = vadd.f32 %v857_v3, %v856_v0  ;;  %v904_v6 = vadd.f32 %v903_v4, %v902_v1  ;;  %v859_v7 = vpop.f32.mrb[18].mxu0  ;;  %v905_v8 = vpop.f32.mrb[18].mxu1 }
 0x11c   : > { %v647_v9 = vmax.f32 %v504_v63, %v637_v2  ;;  %v860_v10 = vpop.f32.mrb[19].mxu0  ;;  %v906_v11 = vpop.f32.mrb[19].mxu1 }
 0x11d   : > { %v491_v12 = vadd.f32 %v858_v5, %v1089_v38  ;;  %v624_v13 = vadd.f32 %v904_v6, %v1089_v38  ;;  %v861_v14 = vadd.f32 %v860_v10, %v859_v7  ;;  %v907_v15 = vadd.f32 %v906_v11, %v905_v8 }
 0x11e   : > { %v653_v16 = vmax.f32 %v646_v62, %v647_v9 }
 0x11f   : > { %v505_v17 = vmax.f32 %v491_v12, 0.0  ;;  %v638_v18 = vmax.f32 %v624_v13, 0.0  ;;  %v494_v19 = vadd.f32 %v861_v14, %v1089_v38  ;;  %v627_v20 = vadd.f32 %v907_v15, %v1089_v38 }
 0x120   : > { %v813_v21 = vpack.c.bf16 %v653_v16, %v652_v53 }
 0x121   : > { %v648_v22 = vmax.f32 %v505_v17, %v638_v18  ;;  %v506_v23 = vmax.f32 %v494_v19, 0.0  ;;  %v639_v24 = vmax.f32 %v627_v20, 0.0 }
 0x122   : > { %815 = vst [vmem:[%s1105_s11 + $0x8] sm:$0xff] %v813_v21  }
 0x123   : > { %v649_v25 = vmax.f32 %v506_v23, %v639_v24 }
 0x125   : > { %v654_v26 = vmax.f32 %v648_v22, %v649_v25 }
 0x127   : > { %v804_v27 = vpack.c.bf16 %v654_v26, %v654_v26 }
 0x129   : > { %680 = vst [vmem:[%s1105_s11 + $0x10] sm:$0xf] %v804_v27 }
 0x12a PF: > { %s14_s15 = sadd.s32 1, %s970_s15  }
 0x12b   : > { %p11_p4 = scmp.ge.s32.totalorder %s14_s15, 4  }
 0x12d   :  { %13 = sbr.rel (!%p11_p4) target bundleno = 1 (0x1), region = 69 }

// kernel: convnet_forward.5
= control target key start
LH: loop header
LB: loop body
LE: loop exit
PB: predicated region body
PF: predicated region fallthrough
CT: control target
= control target key end

     0   :  { %vm4877_vm0 = vmmov 0   ;;  %s5967_s1 = inlined_call_operand.vmem [shape: bf16[5120,128], index: 1, kind: input, shape index: {}]   ;;  %s5968_s0 = inlined_call_operand.vmem [shape: bf16[8,5120], index: 0, kind: input, shape index: {}]   ;;  %s5969_s2 = inlined_call_operand.vmem [shape: f32[1,128], index: 2, kind: input, shape index: {}]   ;;  %s5970_s3 = inlined_call_operand.vmem [shape: bf16[128,128], index: 3, kind: input, shape index: {}]   ;;  %s5971_s4 = inlined_call_operand.vmem [shape: f32[1,128], index: 4, kind: input, shape index: {}]   ;;  %s5972_s5 = inlined_call_operand.vmem [shape: f32[8,128], index: 5, kind: output, shape index: {}]  }
   0x1   :  { %v4508_v0 = vld [vmem:[%s5967_s1 + $0x40] sm:$0xff]   ;;  %v4512_v4 = vld [vmem:[%s5967_s1 + $0x48] sm:$0xff]   ;;  %v4516_v8 = vld [vmem:[%s5967_s1 + $0x50] sm:$0xff]  }
   0x2   :  { %v4509_v1 = vld [vmem:[%s5967_s1 + $0xc0] sm:$0xff]   ;;  %4037 = vmatprep.subr.bf16.mxu0 %v4508_v0  ;;  %v4513_v5 = vld [vmem:[%s5967_s1 + $0xc8] sm:$0xff]   ;;  %v4517_v9 = vld [vmem:[%s5967_s1 + $0xd0] sm:$0xff]  }
   0x3   :  { %v4510_v2 = vld [vmem:[%s5967_s1] sm:$0xff]   ;;  %4059 = vmatprep.subr.bf16.mxu1 %v4509_v1  ;;  %v4514_v6 = vld [vmem:[%s5967_s1 + $0x8] sm:$0xff]   ;;  %v4518_v10 = vld [vmem:[%s5967_s1 + $0x10] sm:$0xff]  }
   0x4   :  { %v4511_v3 = vld [vmem:[%s5967_s1 + $0x80] sm:$0xff]   ;;  %4038 = vmatpush3.bf16.msra.mxu0 %v4510_v2  ;;  %v4515_v7 = vld [vmem:[%s5967_s1 + $0x88] sm:$0xff]   ;;  %v4519_v11 = vld [vmem:[%s5967_s1 + $0x90] sm:$0xff]  }
   0x5   :  { %4060 = vmatpush3.bf16.msra.mxu1 %v4511_v3  ;;  %4039 = vmatprep.subr.bf16.mxu0 %v4512_v4  ;;  %v4520_v12 = vld [vmem:[%s5967_s1 + $0x58] sm:$0xff]   ;;  %v4524_v16 = vld [vmem:[%s5967_s1 + $0x60] sm:$0xff]   ;;  %v4528_v20 = vld [vmem:[%s5967_s1 + $0x68] sm:$0xff]  }
   0x6   :  { %4061 = vmatprep.subr.bf16.mxu1 %v4513_v5  ;;  %v4521_v13 = vld [vmem:[%s5967_s1 + $0xd8] sm:$0xff]   ;;  %v4525_v17 = vld [vmem:[%s5967_s1 + $0xe0] sm:$0xff]   ;;  %v4529_v21 = vld [vmem:[%s5967_s1 + $0xe8] sm:$0xff]  }
   0x7   :  { %v4522_v14 = vld [vmem:[%s5967_s1 + $0x18] sm:$0xff]   ;;  %v4526_v18 = vld [vmem:[%s5967_s1 + $0x20] sm:$0xff]   ;;  %v4530_v22 = vld [vmem:[%s5967_s1 + $0x28] sm:$0xff]  }
   0x8   :  { %4040 = vmatpush3.bf16.msra.mxu0 %v4514_v6  ;;  %v4523_v15 = vld [vmem:[%s5967_s1 + $0x98] sm:$0xff]   ;;  %v4527_v19 = vld [vmem:[%s5967_s1 + $0xa0] sm:$0xff]   ;;  %v4531_v23 = vld [vmem:[%s5967_s1 + $0xa8] sm:$0xff]  }
   0x9   :  { %4062 = vmatpush3.bf16.msra.mxu1 %v4515_v7  ;;  %4041 = vmatprep.subr.bf16.mxu0 %v4516_v8  ;;  %v4532_v24 = vld [vmem:[%s5967_s1 + $0x70] sm:$0xff]   ;;  %v4536_v28 = vld [vmem:[%s5967_s1 + $0x78] sm:$0xff]   ;;  %v21_v32 = vld [vmem:[%s5968_s0] sm:$0xff] }
   0xa   :  { %4063 = vmatprep.subr.bf16.mxu1 %v4517_v9  ;;  %v4533_v25 = vld [vmem:[%s5967_s1 + $0xf0] sm:$0xff]   ;;  %v4537_v29 = vld [vmem:[%s5967_s1 + $0xf8] sm:$0xff]   ;;  %v22_v33 = vld [vmem:[%s5968_s0 + $0x8] sm:$0xff]  ;;  %v3668_v34 = vcombine.low %v21_v32, %v21_v32  ;;  %v3669_v35 = vcombine.high %v21_v32, %v21_v32 }
   0xb   :  { %v4534_v26 = vld [vmem:[%s5967_s1 + $0x30] sm:$0xff]   ;;  %v4538_v30 = vld [vmem:[%s5967_s1 + $0x38] sm:$0xff]   ;;  %v3670_v36 = vcombine.low %v22_v33, %v22_v33  ;;  %v3671_v37 = vcombine.high %v22_v33, %v22_v33  ;;  %v4544_v38 = vld [vmem:[%s5967_s1 + $0x140] sm:$0xff]  }
   0xc   :  { %4042 = vmatpush3.bf16.msra.mxu0 %v4518_v10  ;;  %v4535_v27 = vld [vmem:[%s5967_s1 + $0xb0] sm:$0xff]   ;;  %v4539_v31 = vld [vmem:[%s5967_s1 + $0xb8] sm:$0xff]   ;;  %v4545_v39 = vld [vmem:[%s5967_s1 + $0x1c0] sm:$0xff]   ;;  %2780 = vmatprep.mubr.bf16.mxu0 %v3669_v35 }
   0xd   :  { %4064 = vmatpush3.bf16.msra.mxu1 %v4519_v11  ;;  %4043 = vmatprep.subr.bf16.mxu0 %v4520_v12  ;;  %v4546_v40 = vld [vmem:[%s5967_s1 + $0x100] sm:$0xff]   ;;  %v4548_v42 = vld [vmem:[%s5967_s1 + $0x148] sm:$0xff]   ;;  %v4552_v46 = vld [vmem:[%s5967_s1 + $0x150] sm:$0xff]  }
   0xe   :  { %4065 = vmatprep.subr.bf16.mxu1 %v4521_v13  ;;  %2820 = vmatprep.mubr.bf16.mxu1 %v3671_v37  ;;  %v4547_v41 = vld [vmem:[%s5967_s1 + $0x180] sm:$0xff]   ;;  %v4549_v43 = vld [vmem:[%s5967_s1 + $0x1c8] sm:$0xff]   ;;  %v4553_v47 = vld [vmem:[%s5967_s1 + $0x1d0] sm:$0xff]  }
   0xf   :  { %v4550_v44 = vld [vmem:[%s5967_s1 + $0x108] sm:$0xff]   ;;  %v4554_v48 = vld [vmem:[%s5967_s1 + $0x110] sm:$0xff]   ;;  %v4556_v50 = vld [vmem:[%s5967_s1 + $0x158] sm:$0xff]  }
  0x10   :  { %4044 = vmatpush3.bf16.msra.mxu0 %v4522_v14  ;;  %v4551_v45 = vld [vmem:[%s5967_s1 + $0x188] sm:$0xff]   ;;  %v4555_v49 = vld [vmem:[%s5967_s1 + $0x190] sm:$0xff]   ;;  %v4557_v51 = vld [vmem:[%s5967_s1 + $0x1d8] sm:$0xff]  }
  0x11   :  { %4066 = vmatpush3.bf16.msra.mxu1 %v4523_v15  ;;  %4045 = vmatprep.subr.bf16.mxu0 %v4524_v16  ;;  %v4558_v52 = vld [vmem:[%s5967_s1 + $0x118] sm:$0xff]   ;;  %v4560_v54 = vld [vmem:[%s5967_s1 + $0x160] sm:$0xff]   ;;  %v4564_v58 = vld [vmem:[%s5967_s1 + $0x168] sm:$0xff]  }
  0x12   :  { %4067 = vmatprep.subr.bf16.mxu1 %v4525_v17  ;;  %v4559_v53 = vld [vmem:[%s5967_s1 + $0x198] sm:$0xff]   ;;  %v4561_v55 = vld [vmem:[%s5967_s1 + $0x1e0] sm:$0xff]   ;;  %v4565_v59 = vld [vmem:[%s5967_s1 + $0x1e8] sm:$0xff]  }
  0x13   :  { %v4562_v56 = vld [vmem:[%s5967_s1 + $0x120] sm:$0xff]   ;;  %v4566_v60 = vld [vmem:[%s5967_s1 + $0x128] sm:$0xff]   ;;  %v4568_v62 = vld [vmem:[%s5967_s1 + $0x170] sm:$0xff]  }
  0x14   :  { %4046 = vmatpush3.bf16.msra.mxu0 %v4526_v18  ;;  %v4563_v57 = vld [vmem:[%s5967_s1 + $0x1a0] sm:$0xff]   ;;  %v4567_v61 = vld [vmem:[%s5967_s1 + $0x1a8] sm:$0xff]   ;;  %v4569_v63 = vld [vmem:[%s5967_s1 + $0x1f0] sm:$0xff]  }
  0x15   :  { %4068 = vmatpush3.bf16.msra.mxu1 %v4527_v19  ;;  %4047 = vmatprep.subr.bf16.mxu0 %v4528_v20  ;;  %v4570_v0 = vld [vmem:[%s5967_s1 + $0x130] sm:$0xff]   ;;  %v4572_v2 = vld [vmem:[%s5967_s1 + $0x178] sm:$0xff]   ;;  %v4580_v12 = vld [vmem:[%s5967_s1 + $0x240] sm:$0xff]  }
  0x16   :  { %4069 = vmatprep.subr.bf16.mxu1 %v4529_v21  ;;  %v4571_v1 = vld [vmem:[%s5967_s1 + $0x1b0] sm:$0xff]   ;;  %v4573_v3 = vld [vmem:[%s5967_s1 + $0x1f8] sm:$0xff]   ;;  %v4581_v13 = vld [vmem:[%s5967_s1 + $0x2c0] sm:$0xff]  }
  0x17   :  { %v4574_v4 = vld [vmem:[%s5967_s1 + $0x138] sm:$0xff]   ;;  %v23_v6 = vld [vmem:[%s5968_s0 + $0x10] sm:$0xff]  ;;  %v4582_v14 = vld [vmem:[%s5967_s1 + $0x200] sm:$0xff]  }
  0x18   :  { %4048 = vmatpush3.bf16.msra.mxu0 %v4530_v22  ;;  %v4575_v5 = vld [vmem:[%s5967_s1 + $0x1b8] sm:$0xff]   ;;  %v3672_v7 = vcombine.low %v23_v6, %v23_v6  ;;  %v3673_v8 = vcombine.high %v23_v6, %v23_v6  ;;  %v4583_v15 = vld [vmem:[%s5967_s1 + $0x280] sm:$0xff]   ;;  %v4584_v16 = vld [vmem:[%s5967_s1 + $0x248] sm:$0xff]  }
  0x19   :  { %4070 = vmatpush3.bf16.msra.mxu1 %v4531_v23  ;;  %4049 = vmatprep.subr.bf16.mxu0 %v4532_v24  ;;  %v24_v9 = vld [vmem:[%s5968_s0 + $0x18] sm:$0xff]  ;;  %v4585_v17 = vld [vmem:[%s5967_s1 + $0x2c8] sm:$0xff]   ;;  %v4588_v20 = vld [vmem:[%s5967_s1 + $0x250] sm:$0xff]  }
  0x1a   :  { %4071 = vmatprep.subr.bf16.mxu1 %v4533_v25  ;;  %v3674_v10 = vcombine.low %v24_v9, %v24_v9  ;;  %v3675_v11 = vcombine.high %v24_v9, %v24_v9  ;;  %v4586_v18 = vld [vmem:[%s5967_s1 + $0x208] sm:$0xff]   ;;  %v4589_v21 = vld [vmem:[%s5967_s1 + $0x2d0] sm:$0xff]   ;;  %v4592_v24 = vld [vmem:[%s5967_s1 + $0x258] sm:$0xff]  }
  0x1b   :  { %v4587_v19 = vld [vmem:[%s5967_s1 + $0x288] sm:$0xff]   ;;  %v4590_v22 = vld [vmem:[%s5967_s1 + $0x210] sm:$0xff]   ;;  %v4593_v25 = vld [vmem:[%s5967_s1 + $0x2d8] sm:$0xff]  }
  0x1c   :  { %4050 = vmatpush3.bf16.msra.mxu0 %v4534_v26  ;;  %v4591_v23 = vld [vmem:[%s5967_s1 + $0x290] sm:$0xff]   ;;  %v4594_v26 = vld [vmem:[%s5967_s1 + $0x218] sm:$0xff]   ;;  %v4600_v32 = vld [vmem:[%s5967_s1 + $0x268] sm:$0xff]  }
  0x1d   :  { %4072 = vmatpush3.bf16.msra.mxu1 %v4535_v27  ;;  %4051 = vmatprep.subr.bf16.mxu0 %v4536_v28  ;;  %v4595_v27 = vld [vmem:[%s5967_s1 + $0x298] sm:$0xff]   ;;  %v4596_v28 = vld [vmem:[%s5967_s1 + $0x260] sm:$0xff]   ;;  %v4601_v33 = vld [vmem:[%s5967_s1 + $0x2e8] sm:$0xff]  }
  0x1e   :  { %4073 = vmatprep.subr.bf16.mxu1 %v4537_v29  ;;  %v4597_v29 = vld [vmem:[%s5967_s1 + $0x2e0] sm:$0xff]   ;;  %v4603_v35 = vld [vmem:[%s5967_s1 + $0x2a8] sm:$0xff]   ;;  %v4605_v37 = vld [vmem:[%s5967_s1 + $0x2f0] sm:$0xff]  }
  0x1f   :  { %v4636_v6 = vld [vmem:[%s5967_s1 + $0x368] sm:$0xff]  }
  0x20   :  { %4052 = vmatpush3.bf16.msra.mxu0 %v4538_v30  ;;  %v4598_v30 = vld [vmem:[%s5967_s1 + $0x220] sm:$0xff]   ;;  %v4639_v9 = vld [vmem:[%s5967_s1 + $0x3a8] sm:$0xff]  }
  0x21   :  { %4074 = vmatpush3.bf16.msra.mxu1 %v4539_v31  ;;  %4081 = vmatprep.subr.bf16.mxu0 %v4544_v38  ;;  %v4599_v31 = vld [vmem:[%s5967_s1 + $0x2a0] sm:$0xff]   ;;  %v4606_v38 = vld [vmem:[%s5967_s1 + $0x230] sm:$0xff]  }
  0x22   :  { %4103 = vmatprep.subr.bf16.mxu1 %v4545_v39  ;;  %v4607_v39 = vld [vmem:[%s5967_s1 + $0x2b0] sm:$0xff]  }
  0x23   :  { %2781 = vmatmul.mubr.bf16.vlgmr.msra.gmra.mrb[0].mxu0 %v3668_v34  ;;  %v4602_v34 = vld [vmem:[%s5967_s1 + $0x228] sm:$0xff]  }
  0x24   :  { %2821 = vmatmul.mubr.bf16.vlgmr.msra.gmra.mrb[0].mxu1 %v3670_v36  ;;  %4082 = vmatpush3.bf16.msra.mxu0 %v4546_v40  ;;  %v4604_v36 = vld [vmem:[%s5967_s1 + $0x270] sm:$0xff]   ;;  %v4608_v40 = vld [vmem:[%s5967_s1 + $0x278] sm:$0xff]  }
  0x25   :  { %4104 = vmatpush3.bf16.msra.mxu1 %v4547_v41  ;;  %4083 = vmatprep.subr.bf16.mxu0 %v4548_v42  ;;  %v4609_v41 = vld [vmem:[%s5967_s1 + $0x2f8] sm:$0xff]  }
  0x26   :  { %4105 = vmatprep.subr.bf16.mxu1 %v4549_v43  ;;  %2860 = vmatprep.mubr.bf16.mxu0 %v3673_v8  ;;  %v4610_v42 = vld [vmem:[%s5967_s1 + $0x238] sm:$0xff]   ;;  %v4638_v8 = vld [vmem:[%s5967_s1 + $0x328] sm:$0xff]  }
  0x27   :  { %2900 = vmatprep.mubr.bf16.mxu1 %v3675_v11  ;;  %v4611_v43 = vld [vmem:[%s5967_s1 + $0x2b8] sm:$0xff]   ;;  %v4641_v11 = vld [vmem:[%s5967_s1 + $0x3f0] sm:$0xff]  }
  0x28   :  { %4084 = vmatpush3.bf16.msra.mxu0 %v4550_v44  ;;  %v25_v44 = vld [vmem:[%s5968_s0 + $0x20] sm:$0xff] }
  0x29   :  { %4106 = vmatpush3.bf16.msra.mxu1 %v4551_v45  ;;  %4085 = vmatprep.subr.bf16.mxu0 %v4552_v46  ;;  %v26_v45 = vld [vmem:[%s5968_s0 + $0x28] sm:$0xff]  ;;  %v3676_v46 = vcombine.low %v25_v44, %v25_v44 }
  0x2a   :  { %4107 = vmatprep.subr.bf16.mxu1 %v4553_v47  ;;  %v3677_v47 = vcombine.high %v25_v44, %v25_v44  ;;  %v4672_v44 = vld [vmem:[%s5967_s1 + $0x468] sm:$0xff]  }
  0x2c   :  { %4086 = vmatpush3.bf16.msra.mxu0 %v4554_v48  ;;  %v3678_v48 = vcombine.low %v26_v45, %v26_v45 }
  0x2d   :  { %4108 = vmatpush3.bf16.msra.mxu1 %v4555_v49  ;;  %4087 = vmatprep.subr.bf16.mxu0 %v4556_v50  ;;  %v3679_v49 = vcombine.high %v26_v45, %v26_v45  ;;  %v4616_v50 = vld [vmem:[%s5967_s1 + $0x340] sm:$0xff]   ;;  %v4673_v45 = vld [vmem:[%s5967_s1 + $0x4e8] sm:$0xff]  }
  0x2e   :  { %4109 = vmatprep.subr.bf16.mxu1 %v4557_v51  ;;  %v4617_v51 = vld [vmem:[%s5967_s1 + $0x3c0] sm:$0xff]  }
  0x30   :  { %4088 = vmatpush3.bf16.msra.mxu0 %v4558_v52  ;;  %v4618_v52 = vld [vmem:[%s5967_s1 + $0x300] sm:$0xff]  }
  0x31   :  { %4110 = vmatpush3.bf16.msra.mxu1 %v4559_v53  ;;  %4089 = vmatprep.subr.bf16.mxu0 %v4560_v54  ;;  %v4619_v53 = vld [vmem:[%s5967_s1 + $0x380] sm:$0xff]   ;;  %v4620_v54 = vld [vmem:[%s5967_s1 + $0x348] sm:$0xff]  }
  0x32   :  { %4111 = vmatprep.subr.bf16.mxu1 %v4561_v55  ;;  %v4621_v55 = vld [vmem:[%s5967_s1 + $0x3c8] sm:$0xff]  }
  0x34   :  { %4090 = vmatpush3.bf16.msra.mxu0 %v4562_v56  ;;  %v4622_v56 = vld [vmem:[%s5967_s1 + $0x308] sm:$0xff]  }
  0x35   :  { %4112 = vmatpush3.bf16.msra.mxu1 %v4563_v57  ;;  %4091 = vmatprep.subr.bf16.mxu0 %v4564_v58  ;;  %v4623_v57 = vld [vmem:[%s5967_s1 + $0x388] sm:$0xff]   ;;  %v4624_v58 = vld [vmem:[%s5967_s1 + $0x350] sm:$0xff]  }
  0x36   :  { %4113 = vmatprep.subr.bf16.mxu1 %v4565_v59  ;;  %v4625_v59 = vld [vmem:[%s5967_s1 + $0x3d0] sm:$0xff]  }
  0x38   :  { %4092 = vmatpush3.bf16.msra.mxu0 %v4566_v60  ;;  %v4626_v60 = vld [vmem:[%s5967_s1 + $0x310] sm:$0xff]  }
  0x39   :  { %4114 = vmatpush3.bf16.msra.mxu1 %v4567_v61  ;;  %4093 = vmatprep.subr.bf16.mxu0 %v4568_v62  ;;  %v4627_v61 = vld [vmem:[%s5967_s1 + $0x390] sm:$0xff]   ;;  %v4628_v62 = vld [vmem:[%s5967_s1 + $0x358] sm:$0xff]  }
  0x3a   :  { %4115 = vmatprep.subr.bf16.mxu1 %v4569_v63  ;;  %v4629_v63 = vld [vmem:[%s5967_s1 + $0x3d8] sm:$0xff]  }
  0x3c   :  { %4094 = vmatpush3.bf16.msra.mxu0 %v4570_v0  ;;  %v4630_v0 = vld [vmem:[%s5967_s1 + $0x318] sm:$0xff]  }
  0x3d   :  { %4116 = vmatpush3.bf16.msra.mxu1 %v4571_v1  ;;  %4095 = vmatprep.subr.bf16.mxu0 %v4572_v2  ;;  %v4631_v1 = vld [vmem:[%s5967_s1 + $0x398] sm:$0xff]   ;;  %v4632_v2 = vld [vmem:[%s5967_s1 + $0x360] sm:$0xff]  }
  0x3e   :  { %4117 = vmatprep.subr.bf16.mxu1 %v4573_v3  ;;  %v4633_v3 = vld [vmem:[%s5967_s1 + $0x3e0] sm:$0xff]  }
  0x40   :  { %4096 = vmatpush3.bf16.msra.mxu0 %v4574_v4  ;;  %v4634_v4 = vld [vmem:[%s5967_s1 + $0x320] sm:$0xff]  }
  0x41   :  { %4118 = vmatpush3.bf16.msra.mxu1 %v4575_v5  ;;  %4125 = vmatprep.subr.bf16.mxu0 %v4580_v12  ;;  %v4635_v5 = vld [vmem:[%s5967_s1 + $0x3a0] sm:$0xff]   ;;  %v4642_v12 = vld [vmem:[%s5967_s1 + $0x330] sm:$0xff]  }
  0x42   :  { %4147 = vmatprep.subr.bf16.mxu1 %v4581_v13  ;;  %v4643_v13 = vld [vmem:[%s5967_s1 + $0x3b0] sm:$0xff]  }
  0x43   :  { %2861 = vmatmul.mubr.bf16.vlgmr.msra.gmra.mrb[4].mxu0 %v3672_v7  ;;  %v4637_v7 = vld [vmem:[%s5967_s1 + $0x3e8] sm:$0xff]  }
  0x44   :  { %2901 = vmatmul.mubr.bf16.vlgmr.msra.gmra.mrb[4].mxu1 %v3674_v10  ;;  %4126 = vmatpush3.bf16.msra.mxu0 %v4582_v14  ;;  %v4640_v10 = vld [vmem:[%s5967_s1 + $0x370] sm:$0xff]   ;;  %v4644_v14 = vld [vmem:[%s5967_s1 + $0x378] sm:$0xff]  }
  0x45   :  { %4148 = vmatpush3.bf16.msra.mxu1 %v4583_v15  ;;  %4127 = vmatprep.subr.bf16.mxu0 %v4584_v16  ;;  %v4645_v15 = vld [vmem:[%s5967_s1 + $0x3f8] sm:$0xff]  }
  0x46   :  { %4149 = vmatprep.subr.bf16.mxu1 %v4585_v17  ;;  %2940 = vmatprep.mubr.bf16.mxu0 %v3677_v47  ;;  %v4646_v16 = vld [vmem:[%s5967_s1 + $0x338] sm:$0xff]   ;;  %v4675_v47 = vld [vmem:[%s5967_s1 + $0x4a8] sm:$0xff]  }
  0x47   :  { %2980 = vmatprep.mubr.bf16.mxu1 %v3679_v49  ;;  %v4647_v17 = vld [vmem:[%s5967_s1 + $0x3b8] sm:$0xff]   ;;  %v4677_v49 = vld [vmem:[%s5967_s1 + $0x4f0] sm:$0xff]  }
  0x48   :  { %4128 = vmatpush3.bf16.msra.mxu0 %v4586_v18  ;;  %v27_v18 = vld [vmem:[%s5968_s0 + $0x30] sm:$0xff] }
  0x49   :  { %4150 = vmatpush3.bf16.msra.mxu1 %v4587_v19  ;;  %4129 = vmatprep.subr.bf16.mxu0 %v4588_v20  ;;  %v28_v19 = vld [vmem:[%s5968_s0 + $0x38] sm:$0xff]  ;;  %v3680_v20 = vcombine.low %v27_v18, %v27_v18 }
  0x4a   :  { %4151 = vmatprep.subr.bf16.mxu1 %v4589_v21  ;;  %v3681_v21 = vcombine.high %v27_v18, %v27_v18  ;;  %v4708_v18 = vld [vmem:[%s5967_s1 + $0x568] sm:$0xff]  }
  0x4c   :  { %4130 = vmatpush3.bf16.msra.mxu0 %v4590_v22  ;;  %v3682_v22 = vcombine.low %v28_v19, %v28_v19 }
  0x4d   :  { %4152 = vmatpush3.bf16.msra.mxu1 %v4591_v23  ;;  %4131 = vmatprep.subr.bf16.mxu0 %v4592_v24  ;;  %v4652_v23 = vld [vmem:[%s5967_s1 + $0x440] sm:$0xff]   ;;  %v3683_v24 = vcombine.high %v28_v19, %v28_v19  ;;  %v4709_v19 = vld [vmem:[%s5967_s1 + $0x5e8] sm:$0xff]  }
  0x4e   :  { %4153 = vmatprep.subr.bf16.mxu1 %v4593_v25  ;;  %v4653_v25 = vld [vmem:[%s5967_s1 + $0x4c0] sm:$0xff]  }
  0x50   :  { %4132 = vmatpush3.bf16.msra.mxu0 %v4594_v26  ;;  %v4654_v26 = vld [vmem:[%s5967_s1 + $0x400] sm:$0xff]  }
  0x51   :  { %4154 = vmatpush3.bf16.msra.mxu1 %v4595_v27  ;;  %4133 = vmatprep.subr.bf16.mxu0 %v4596_v28  ;;  %v4655_v27 = vld [vmem:[%s5967_s1 + $0x480] sm:$0xff]   ;;  %v4656_v28 = vld [vmem:[%s5967_s1 + $0x448] sm:$0xff]  }
  0x52   :  { %4155 = vmatprep.subr.bf16.mxu1 %v4597_v29  ;;  %v4657_v29 = vld [vmem:[%s5967_s1 + $0x4c8] sm:$0xff]  }
  0x54   :  { %4134 = vmatpush3.bf16.msra.mxu0 %v4598_v30  ;;  %v4658_v30 = vld [vmem:[%s5967_s1 + $0x408] sm:$0xff]  }
  0x55   :  { %4156 = vmatpush3.bf16.msra.mxu1 %v4599_v31  ;;  %4135 = vmatprep.subr.bf16.mxu0 %v4600_v32  ;;  %v4659_v31 = vld [vmem:[%s5967_s1 + $0x488] sm:$0xff]   ;;  %v4660_v32 = vld [vmem:[%s5967_s1 + $0x450] sm:$0xff]  }
  0x56   :  { %4157 = vmatprep.subr.bf16.mxu1 %v4601_v33  ;;  %v4661_v33 = vld [vmem:[%s5967_s1 + $0x4d0] sm:$0xff]  }
  0x58   :  { %4136 = vmatpush3.bf16.msra.mxu0 %v4602_v34  ;;  %v4662_v34 = vld [vmem:[%s5967_s1 + $0x410] sm:$0xff]  }
  0x59   :  { %4158 = vmatpush3.bf16.msra.mxu1 %v4603_v35  ;;  %4137 = vmatprep.subr.bf16.mxu0 %v4604_v36  ;;  %v4663_v35 = vld [vmem:[%s5967_s1 + $0x490] sm:$0xff]   ;;  %v4664_v36 = vld [vmem:[%s5967_s1 + $0x458] sm:$0xff]  }
  0x5a   :  { %4159 = vmatprep.subr.bf16.mxu1 %v4605_v37  ;;  %v4665_v37 = vld [vmem:[%s5967_s1 + $0x4d8] sm:$0xff]  }
  0x5c   :  { %4138 = vmatpush3.bf16.msra.mxu0 %v4606_v38  ;;  %v4666_v38 = vld [vmem:[%s5967_s1 + $0x418] sm:$0xff]  }
  0x5d   :  { %4160 = vmatpush3.bf16.msra.mxu1 %v4607_v39  ;;  %4139 = vmatprep.subr.bf16.mxu0 %v4608_v40  ;;  %v4667_v39 = vld [vmem:[%s5967_s1 + $0x498] sm:$0xff]   ;;  %v4668_v40 = vld [vmem:[%s5967_s1 + $0x460] sm:$0xff]  }
  0x5e   :  { %4161 = vmatprep.subr.bf16.mxu1 %v4609_v41  ;;  %v4669_v41 = vld [vmem:[%s5967_s1 + $0x4e0] sm:$0xff]  }
  0x60   :  { %4140 = vmatpush3.bf16.msra.mxu0 %v4610_v42  ;;  %v4670_v42 = vld [vmem:[%s5967_s1 + $0x420] sm:$0xff]  }
  0x61   :  { %4162 = vmatpush3.bf16.msra.mxu1 %v4611_v43  ;;  %4169 = vmatprep.subr.bf16.mxu0 %v4616_v50  ;;  %v4671_v43 = vld [vmem:[%s5967_s1 + $0x4a0] sm:$0xff]   ;;  %v4678_v50 = vld [vmem:[%s5967_s1 + $0x430] sm:$0xff]  }
  0x62   :  { %4191 = vmatprep.subr.bf16.mxu1 %v4617_v51  ;;  %v4679_v51 = vld [vmem:[%s5967_s1 + $0x4b0] sm:$0xff]  }
  0x63   :  { %2941 = vmatmul.mubr.bf16.vlgmr.msra.gmra.mrb[8].mxu0 %v3676_v46  ;;  %v4674_v46 = vld [vmem:[%s5967_s1 + $0x428] sm:$0xff]  }
  0x64   :  { %2981 = vmatmul.mubr.bf16.vlgmr.msra.gmra.mrb[8].mxu1 %v3678_v48  ;;  %4170 = vmatpush3.bf16.msra.mxu0 %v4618_v52  ;;  %v4676_v48 = vld [vmem:[%s5967_s1 + $0x470] sm:$0xff]   ;;  %v4680_v52 = vld [vmem:[%s5967_s1 + $0x478] sm:$0xff]  }
  0x65   :  { %4192 = vmatpush3.bf16.msra.mxu1 %v4619_v53  ;;  %4171 = vmatprep.subr.bf16.mxu0 %v4620_v54  ;;  %v4681_v53 = vld [vmem:[%s5967_s1 + $0x4f8] sm:$0xff]  }
  0x66   :  { %4193 = vmatprep.subr.bf16.mxu1 %v4621_v55  ;;  %3020 = vmatprep.mubr.bf16.mxu0 %v3681_v21  ;;  %v4682_v54 = vld [vmem:[%s5967_s1 + $0x438] sm:$0xff]   ;;  %v4711_v21 = vld [vmem:[%s5967_s1 + $0x5a8] sm:$0xff]  }
  0x67   :  { %3060 = vmatprep.mubr.bf16.mxu1 %v3683_v24  ;;  %v4683_v55 = vld [vmem:[%s5967_s1 + $0x4b8] sm:$0xff]   ;;  %v4714_v24 = vld [vmem:[%s5967_s1 + $0x530] sm:$0xff]  }
  0x68   :  { %4172 = vmatpush3.bf16.msra.mxu0 %v4622_v56  ;;  %v29_v56 = vld [vmem:[%s5968_s0 + $0x40] sm:$0xff] }
  0x69   :  { %4194 = vmatpush3.bf16.msra.mxu1 %v4623_v57  ;;  %4173 = vmatprep.subr.bf16.mxu0 %v4624_v58  ;;  %v3684_v57 = vcombine.low %v29_v56, %v29_v56  ;;  %v3685_v58 = vcombine.high %v29_v56, %v29_v56  ;;  %v4744_v56 = vld [vmem:[%s5967_s1 + $0x668] sm:$0xff]  }
  0x6a   :  { %4195 = vmatprep.subr.bf16.mxu1 %v4625_v59  ;;  %v30_v59 = vld [vmem:[%s5968_s0 + $0x48] sm:$0xff] }
  0x6c   :  { %4174 = vmatpush3.bf16.msra.mxu0 %v4626_v60  ;;  %v3686_v60 = vcombine.low %v30_v59, %v30_v59 }
  0x6d   :  { %4196 = vmatpush3.bf16.msra.mxu1 %v4627_v61  ;;  %4175 = vmatprep.subr.bf16.mxu0 %v4628_v62  ;;  %v3687_v61 = vcombine.high %v30_v59, %v30_v59  ;;  %v4688_v62 = vld [vmem:[%s5967_s1 + $0x540] sm:$0xff]   ;;  %v4747_v59 = vld [vmem:[%s5967_s1 + $0x6a8] sm:$0xff]  }
  0x6e   :  { %4197 = vmatprep.subr.bf16.mxu1 %v4629_v63  ;;  %v4689_v63 = vld [vmem:[%s5967_s1 + $0x5c0] sm:$0xff]  }
  0x70   :  { %4176 = vmatpush3.bf16.msra.mxu0 %v4630_v0  ;;  %v4690_v0 = vld [vmem:[%s5967_s1 + $0x500] sm:$0xff]  }
  0x71   :  { %4198 = vmatpush3.bf16.msra.mxu1 %v4631_v1  ;;  %4177 = vmatprep.subr.bf16.mxu0 %v4632_v2  ;;  %v4691_v1 = vld [vmem:[%s5967_s1 + $0x580] sm:$0xff]   ;;  %v4692_v2 = vld [vmem:[%s5967_s1 + $0x548] sm:$0xff]  }
  0x72   :  { %4199 = vmatprep.subr.bf16.mxu1 %v4633_v3  ;;  %v4693_v3 = vld [vmem:[%s5967_s1 + $0x5c8] sm:$0xff]  }
  0x74   :  { %4178 = vmatpush3.bf16.msra.mxu0 %v4634_v4  ;;  %v4694_v4 = vld [vmem:[%s5967_s1 + $0x508] sm:$0xff]  }
  0x75   :  { %4200 = vmatpush3.bf16.msra.mxu1 %v4635_v5  ;;  %4179 = vmatprep.subr.bf16.mxu0 %v4636_v6  ;;  %v4695_v5 = vld [vmem:[%s5967_s1 + $0x588] sm:$0xff]   ;;  %v4696_v6 = vld [vmem:[%s5967_s1 + $0x550] sm:$0xff]  }
  0x76   :  { %4201 = vmatprep.subr.bf16.mxu1 %v4637_v7  ;;  %v4697_v7 = vld [vmem:[%s5967_s1 + $0x5d0] sm:$0xff]  }
  0x78   :  { %4180 = vmatpush3.bf16.msra.mxu0 %v4638_v8  ;;  %v4698_v8 = vld [vmem:[%s5967_s1 + $0x510] sm:$0xff]  }
  0x79   :  { %4202 = vmatpush3.bf16.msra.mxu1 %v4639_v9  ;;  %4181 = vmatprep.subr.bf16.mxu0 %v4640_v10  ;;  %v4699_v9 = vld [vmem:[%s5967_s1 + $0x590] sm:$0xff]   ;;  %v4700_v10 = vld [vmem:[%s5967_s1 + $0x558] sm:$0xff]  }
  0x7a   :  { %4203 = vmatprep.subr.bf16.mxu1 %v4641_v11  ;;  %v4701_v11 = vld [vmem:[%s5967_s1 + $0x5d8] sm:$0xff]  }
  0x7c   :  { %4182 = vmatpush3.bf16.msra.mxu0 %v4642_v12  ;;  %v4702_v12 = vld [vmem:[%s5967_s1 + $0x518] sm:$0xff]  }
  0x7d   :  { %4204 = vmatpush3.bf16.msra.mxu1 %v4643_v13  ;;  %4183 = vmatprep.subr.bf16.mxu0 %v4644_v14  ;;  %v4703_v13 = vld [vmem:[%s5967_s1 + $0x598] sm:$0xff]   ;;  %v4704_v14 = vld [vmem:[%s5967_s1 + $0x560] sm:$0xff]  }
  0x7e   :  { %4205 = vmatprep.subr.bf16.mxu1 %v4645_v15  ;;  %v4705_v15 = vld [vmem:[%s5967_s1 + $0x5e0] sm:$0xff]  }
  0x80   :  { %4184 = vmatpush3.bf16.msra.mxu0 %v4646_v16  ;;  %v4706_v16 = vld [vmem:[%s5967_s1 + $0x520] sm:$0xff]  }
  0x81   :  { %4206 = vmatpush3.bf16.msra.mxu1 %v4647_v17  ;;  %4213 = vmatprep.subr.bf16.mxu0 %v4652_v23  ;;  %v4707_v17 = vld [vmem:[%s5967_s1 + $0x5a0] sm:$0xff]   ;;  %v4713_v23 = vld [vmem:[%s5967_s1 + $0x5f0] sm:$0xff]  }
  0x82   :  { %4235 = vmatprep.subr.bf16.mxu1 %v4653_v25  ;;  %v4715_v25 = vld [vmem:[%s5967_s1 + $0x5b0] sm:$0xff]  }
  0x83   :  { %3021 = vmatmul.mubr.bf16.vlgmr.msra.gmra.mrb[12].mxu0 %v3680_v20  ;;  %v4710_v20 = vld [vmem:[%s5967_s1 + $0x528] sm:$0xff]  }
  0x84   :  { %3061 = vmatmul.mubr.bf16.vlgmr.msra.gmra.mrb[12].mxu1 %v3682_v22  ;;  %4214 = vmatpush3.bf16.msra.mxu0 %v4654_v26  ;;  %v4712_v22 = vld [vmem:[%s5967_s1 + $0x570] sm:$0xff]   ;;  %v4716_v26 = vld [vmem:[%s5967_s1 + $0x578] sm:$0xff]  }
  0x85   :  { %4236 = vmatpush3.bf16.msra.mxu1 %v4655_v27  ;;  %4215 = vmatprep.subr.bf16.mxu0 %v4656_v28  ;;  %v4717_v27 = vld [vmem:[%s5967_s1 + $0x5f8] sm:$0xff]  }
  0x86   :  { %4237 = vmatprep.subr.bf16.mxu1 %v4657_v29  ;;  %3100 = vmatprep.mubr.bf16.mxu0 %v3685_v58  ;;  %v4718_v28 = vld [vmem:[%s5967_s1 + $0x538] sm:$0xff]   ;;  %v4746_v58 = vld [vmem:[%s5967_s1 + $0x628] sm:$0xff]  }
  0x87   :  { %3140 = vmatprep.mubr.bf16.mxu1 %v3687_v61  ;;  %v4719_v29 = vld [vmem:[%s5967_s1 + $0x5b8] sm:$0xff]   ;;  %v4749_v61 = vld [vmem:[%s5967_s1 + $0x6f0] sm:$0xff]  }
  0x88   :  { %4216 = vmatpush3.bf16.msra.mxu0 %v4658_v30  ;;  %v31_v30 = vld [vmem:[%s5968_s0 + $0x50] sm:$0xff] }
  0x89   :  { %4238 = vmatpush3.bf16.msra.mxu1 %v4659_v31  ;;  %4217 = vmatprep.subr.bf16.mxu0 %v4660_v32  ;;  %v32_v31 = vld [vmem:[%s5968_s0 + $0x58] sm:$0xff]  ;;  %v3688_v32 = vcombine.low %v31_v30, %v31_v30 }
  0x8a   :  { %4239 = vmatprep.subr.bf16.mxu1 %v4661_v33  ;;  %v3689_v33 = vcombine.high %v31_v30, %v31_v30  ;;  %v4779_v30 = vld [vmem:[%s5967_s1 + $0x7a0] sm:$0xff]  }
  0x8c   :  { %4218 = vmatpush3.bf16.msra.mxu0 %v4662_v34  ;;  %v3690_v34 = vcombine.low %v32_v31, %v32_v31 }
  0x8d   :  { %4240 = vmatpush3.bf16.msra.mxu1 %v4663_v35  ;;  %4219 = vmatprep.subr.bf16.mxu0 %v4664_v36  ;;  %v3691_v35 = vcombine.high %v32_v31, %v32_v31  ;;  %v4724_v36 = vld [vmem:[%s5967_s1 + $0x640] sm:$0xff]  }
  0x8e   :  { %4241 = vmatprep.subr.bf16.mxu1 %v4665_v37  ;;  %v4725_v37 = vld [vmem:[%s5967_s1 + $0x6c0] sm:$0xff]  }
  0x90   :  { %4220 = vmatpush3.bf16.msra.mxu0 %v4666_v38  ;;  %v4726_v38 = vld [vmem:[%s5967_s1 + $0x600] sm:$0xff]  }
  0x91   :  { %4242 = vmatpush3.bf16.msra.mxu1 %v4667_v39  ;;  %4221 = vmatprep.subr.bf16.mxu0 %v4668_v40  ;;  %v4727_v39 = vld [vmem:[%s5967_s1 + $0x680] sm:$0xff]   ;;  %v4728_v40 = vld [vmem:[%s5967_s1 + $0x648] sm:$0xff]  }
  0x92   :  { %4243 = vmatprep.subr.bf16.mxu1 %v4669_v41  ;;  %v4729_v41 = vld [vmem:[%s5967_s1 + $0x6c8] sm:$0xff]  }
  0x94   :  { %4222 = vmatpush3.bf16.msra.mxu0 %v4670_v42  ;;  %v4730_v42 = vld [vmem:[%s5967_s1 + $0x608] sm:$0xff]  }
  0x95   :  { %4244 = vmatpush3.bf16.msra.mxu1 %v4671_v43  ;;  %4223 = vmatprep.subr.bf16.mxu0 %v4672_v44  ;;  %v4731_v43 = vld [vmem:[%s5967_s1 + $0x688] sm:$0xff]   ;;  %v4732_v44 = vld [vmem:[%s5967_s1 + $0x650] sm:$0xff]  }
  0x96   :  { %4245 = vmatprep.subr.bf16.mxu1 %v4673_v45  ;;  %v4733_v45 = vld [vmem:[%s5967_s1 + $0x6d0] sm:$0xff]  }
  0x98   :  { %4224 = vmatpush3.bf16.msra.mxu0 %v4674_v46  ;;  %v4734_v46 = vld [vmem:[%s5967_s1 + $0x610] sm:$0xff]  }
  0x99   :  { %4246 = vmatpush3.bf16.msra.mxu1 %v4675_v47  ;;  %4225 = vmatprep.subr.bf16.mxu0 %v4676_v48  ;;  %v4735_v47 = vld [vmem:[%s5967_s1 + $0x690] sm:$0xff]   ;;  %v4736_v48 = vld [vmem:[%s5967_s1 + $0x658] sm:$0xff]  }
  0x9a   :  { %4247 = vmatprep.subr.bf16.mxu1 %v4677_v49  ;;  %v4737_v49 = vld [vmem:[%s5967_s1 + $0x6d8] sm:$0xff]  }
  0x9c   :  { %4226 = vmatpush3.bf16.msra.mxu0 %v4678_v50  ;;  %v4738_v50 = vld [vmem:[%s5967_s1 + $0x618] sm:$0xff]  }
  0x9d   :  { %4248 = vmatpush3.bf16.msra.mxu1 %v4679_v51  ;;  %4227 = vmatprep.subr.bf16.mxu0 %v4680_v52  ;;  %v4739_v51 = vld [vmem:[%s5967_s1 + $0x698] sm:$0xff]   ;;  %v4740_v52 = vld [vmem:[%s5967_s1 + $0x660] sm:$0xff]  }
  0x9e   :  { %4249 = vmatprep.subr.bf16.mxu1 %v4681_v53  ;;  %v4741_v53 = vld [vmem:[%s5967_s1 + $0x6e0] sm:$0xff]  }
  0xa0   :  { %4228 = vmatpush3.bf16.msra.mxu0 %v4682_v54  ;;  %v4742_v54 = vld [vmem:[%s5967_s1 + $0x620] sm:$0xff]  }
  0xa1   :  { %4250 = vmatpush3.bf16.msra.mxu1 %v4683_v55  ;;  %4257 = vmatprep.subr.bf16.mxu0 %v4688_v62  ;;  %v4743_v55 = vld [vmem:[%s5967_s1 + $0x6a0] sm:$0xff]   ;;  %v4750_v62 = vld [vmem:[%s5967_s1 + $0x630] sm:$0xff]  }
  0xa2   :  { %4279 = vmatprep.subr.bf16.mxu1 %v4689_v63  ;;  %v4751_v63 = vld [vmem:[%s5967_s1 + $0x6b0] sm:$0xff]  }
  0xa3   :  { %3101 = vmatmul.mubr.bf16.vlgmr.msra.gmra.mrb[16].mxu0 %v3684_v57  ;;  %v4745_v57 = vld [vmem:[%s5967_s1 + $0x6e8] sm:$0xff]  }
  0xa4   :  { %3141 = vmatmul.mubr.bf16.vlgmr.msra.gmra.mrb[16].mxu1 %v3686_v60  ;;  %4258 = vmatpush3.bf16.msra.mxu0 %v4690_v0  ;;  %v4748_v60 = vld [vmem:[%s5967_s1 + $0x670] sm:$0xff]   ;;  %v4752_v0 = vld [vmem:[%s5967_s1 + $0x678] sm:$0xff]  }
  0xa5   :  { %4280 = vmatpush3.bf16.msra.mxu1 %v4691_v1  ;;  %4259 = vmatprep.subr.bf16.mxu0 %v4692_v2  ;;  %v4753_v1 = vld [vmem:[%s5967_s1 + $0x6f8] sm:$0xff]  }
  0xa6   :  { %4281 = vmatprep.subr.bf16.mxu1 %v4693_v3  ;;  %3180 = vmatprep.mubr.bf16.mxu0 %v3689_v33  ;;  %v4754_v2 = vld [vmem:[%s5967_s1 + $0x638] sm:$0xff]  }
  0xa7   :  { %3220 = vmatprep.mubr.bf16.mxu1 %v3691_v35  ;;  %v4755_v3 = vld [vmem:[%s5967_s1 + $0x6b8] sm:$0xff]  }
  0xa8   :  { %4260 = vmatpush3.bf16.msra.mxu0 %v4694_v4  ;;  %v33_v4 = vld [vmem:[%s5968_s0 + $0x60] sm:$0xff] }
  0xa9   :  { %4282 = vmatpush3.bf16.msra.mxu1 %v4695_v5  ;;  %4261 = vmatprep.subr.bf16.mxu0 %v4696_v6  ;;  %v34_v5 = vld [vmem:[%s5968_s0 + $0x68] sm:$0xff]  ;;  %v3692_v6 = vcombine.low %v33_v4, %v33_v4 }
  0xaa   :  { %4283 = vmatprep.subr.bf16.mxu1 %v4697_v7  ;;  %v3693_v7 = vcombine.high %v33_v4, %v33_v4  ;;  %v4803_v4 = vld [vmem:[%s5967_s1 + $0x888] sm:$0xff]  }
  0xac   :  { %4262 = vmatpush3.bf16.msra.mxu0 %v4698_v8  ;;  %v3694_v8 = vcombine.low %v34_v5, %v34_v5 }
  0xad   :  { %4284 = vmatpush3.bf16.msra.mxu1 %v4699_v9  ;;  %4263 = vmatprep.subr.bf16.mxu0 %v4700_v10  ;;  %v4760_v9 = vld [vmem:[%s5967_s1 + $0x740] sm:$0xff]   ;;  %v3695_v10 = vcombine.high %v34_v5, %v34_v5  ;;  %v4804_v5 = vld [vmem:[%s5967_s1 + $0x850] sm:$0xff]  }
  0xae   :  { %4285 = vmatprep.subr.bf16.mxu1 %v4701_v11  ;;  %v4761_v11 = vld [vmem:[%s5967_s1 + $0x7c0] sm:$0xff]  }
  0xb0   :  { %4264 = vmatpush3.bf16.msra.mxu0 %v4702_v12  ;;  %v4762_v12 = vld [vmem:[%s5967_s1 + $0x700] sm:$0xff]  }
  0xb1   :  { %4286 = vmatpush3.bf16.msra.mxu1 %v4703_v13  ;;  %4265 = vmatprep.subr.bf16.mxu0 %v4704_v14  ;;  %v4763_v13 = vld [vmem:[%s5967_s1 + $0x780] sm:$0xff]   ;;  %v4764_v14 = vld [vmem:[%s5967_s1 + $0x748] sm:$0xff]  }
  0xb2   :  { %4287 = vmatprep.subr.bf16.mxu1 %v4705_v15  ;;  %v4765_v15 = vld [vmem:[%s5967_s1 + $0x7c8] sm:$0xff]  }
  0xb4   :  { %4266 = vmatpush3.bf16.msra.mxu0 %v4706_v16  ;;  %v4766_v16 = vld [vmem:[%s5967_s1 + $0x708] sm:$0xff]  }
  0xb5   :  { %4288 = vmatpush3.bf16.msra.mxu1 %v4707_v17  ;;  %4267 = vmatprep.subr.bf16.mxu0 %v4708_v18  ;;  %v4767_v17 = vld [vmem:[%s5967_s1 + $0x788] sm:$0xff]   ;;  %v4768_v18 = vld [vmem:[%s5967_s1 + $0x750] sm:$0xff]  }
  0xb6   :  { %4289 = vmatprep.subr.bf16.mxu1 %v4709_v19  ;;  %v4769_v19 = vld [vmem:[%s5967_s1 + $0x7d0] sm:$0xff]  }
  0xb8   :  { %4268 = vmatpush3.bf16.msra.mxu0 %v4710_v20  ;;  %v4770_v20 = vld [vmem:[%s5967_s1 + $0x710] sm:$0xff]  }
  0xb9   :  { %4290 = vmatpush3.bf16.msra.mxu1 %v4711_v21  ;;  %4269 = vmatprep.subr.bf16.mxu0 %v4712_v22  ;;  %v4771_v21 = vld [vmem:[%s5967_s1 + $0x790] sm:$0xff]   ;;  %v4772_v22 = vld [vmem:[%s5967_s1 + $0x758] sm:$0xff]  }
  0xba   :  { %4291 = vmatprep.subr.bf16.mxu1 %v4713_v23  ;;  %v4773_v23 = vld [vmem:[%s5967_s1 + $0x7d8] sm:$0xff]  }
  0xbc   :  { %4270 = vmatpush3.bf16.msra.mxu0 %v4714_v24  ;;  %v4774_v24 = vld [vmem:[%s5967_s1 + $0x718] sm:$0xff]  }
  0xbd   :  { %4292 = vmatpush3.bf16.msra.mxu1 %v4715_v25  ;;  %4271 = vmatprep.subr.bf16.mxu0 %v4716_v26  ;;  %v4775_v25 = vld [vmem:[%s5967_s1 + $0x798] sm:$0xff]   ;;  %v4776_v26 = vld [vmem:[%s5967_s1 + $0x760] sm:$0xff]  }
  0xbe   :  { %4293 = vmatprep.subr.bf16.mxu1 %v4717_v27  ;;  %v4777_v27 = vld [vmem:[%s5967_s1 + $0x7e0] sm:$0xff]  }
  0xc0   :  { %4272 = vmatpush3.bf16.msra.mxu0 %v4718_v28  ;;  %v4778_v28 = vld [vmem:[%s5967_s1 + $0x720] sm:$0xff]  }
  0xc1   :  { %4294 = vmatpush3.bf16.msra.mxu1 %v4719_v29  ;;  %4301 = vmatprep.subr.bf16.mxu0 %v4724_v36 }
  0xc2   :  { %4323 = vmatprep.subr.bf16.mxu1 %v4725_v37  ;;  %v4780_v37 = vld [vmem:[%s5967_s1 + $0x768] sm:$0xff]  }
  0xc3   :  { %3181 = vmatmul.mubr.bf16.vlgmr.msra.gmra.mrb[20].mxu0 %v3688_v32  ;;  %v3667_v32 = vld [vmem:[%s5969_s2] ss:$0 sm:$0xff] }
  0xc4   :  { %3221 = vmatmul.mubr.bf16.vlgmr.msra.gmra.mrb[20].mxu1 %v3690_v34  ;;  %4302 = vmatpush3.bf16.msra.mxu0 %v4726_v38 }
  0xc5   :  { %4324 = vmatpush3.bf16.msra.mxu1 %v4727_v39  ;;  %4303 = vmatprep.subr.bf16.mxu0 %v4728_v40  ;;  %v4781_v39 = vld [vmem:[%s5967_s1 + $0x7e8] sm:$0xff]  }
  0xc6   :  { %4325 = vmatprep.subr.bf16.mxu1 %v4729_v41  ;;  %3260 = vmatprep.mubr.bf16.mxu0 %v3693_v7  ;;  %v4806_v7 = vld [vmem:[%s5967_s1 + $0x810] sm:$0xff]  }
  0xc7   :  { %3300 = vmatprep.mubr.bf16.mxu1 %v3695_v10  ;;  %v4809_v10 = vld [vmem:[%s5967_s1 + $0x8d8] sm:$0xff]  }
  0xc8   :  { %4304 = vmatpush3.bf16.msra.mxu0 %v4730_v42  ;;  %v4782_v42 = vld [vmem:[%s5967_s1 + $0x728] sm:$0xff]  }
  0xc9   :  { %4326 = vmatpush3.bf16.msra.mxu1 %v4731_v43  ;;  %4305 = vmatprep.subr.bf16.mxu0 %v4732_v44  ;;  %v4783_v44 = vld [vmem:[%s5967_s1 + $0x7a8] sm:$0xff]  }
  0xca   :  { %4327 = vmatprep.subr.bf16.mxu1 %v4733_v45 }
  0xcc   :  { %4306 = vmatpush3.bf16.msra.mxu0 %v4734_v46 }
  0xcd   :  { %4328 = vmatpush3.bf16.msra.mxu1 %v4735_v47  ;;  %4307 = vmatprep.subr.bf16.mxu0 %v4736_v48  ;;  %v4784_v47 = vld [vmem:[%s5967_s1 + $0x770] sm:$0xff]  }
  0xce   :  { %4329 = vmatprep.subr.bf16.mxu1 %v4737_v49  ;;  %v4785_v48 = vld [vmem:[%s5967_s1 + $0x7f0] sm:$0xff]  }
  0xcf   :  { %v4786_v49 = vld [vmem:[%s5967_s1 + $0x730] sm:$0xff]  }
  0xd0   :  { %4308 = vmatpush3.bf16.msra.mxu0 %v4738_v50  ;;  %v4787_v50 = vld [vmem:[%s5967_s1 + $0x7b0] sm:$0xff]  }
  0xd1   :  { %4330 = vmatpush3.bf16.msra.mxu1 %v4739_v51  ;;  %4309 = vmatprep.subr.bf16.mxu0 %v4740_v52  ;;  %v4788_v51 = vld [vmem:[%s5967_s1 + $0x778] sm:$0xff]  }
  0xd2   :  { %4331 = vmatprep.subr.bf16.mxu1 %v4741_v53  ;;  %v4789_v52 = vld [vmem:[%s5967_s1 + $0x7f8] sm:$0xff]  }
  0xd3   :  { %v4790_v53 = vld [vmem:[%s5967_s1 + $0x738] sm:$0xff]  }
  0xd4   :  { %4310 = vmatpush3.bf16.msra.mxu0 %v4742_v54  ;;  %v4791_v54 = vld [vmem:[%s5967_s1 + $0x7b8] sm:$0xff]  }
  0xd5   :  { %4332 = vmatpush3.bf16.msra.mxu1 %v4743_v55  ;;  %4311 = vmatprep.subr.bf16.mxu0 %v4744_v56  ;;  %v35_v55 = vld [vmem:[%s5968_s0 + $0x70] sm:$0xff]  ;;  %v36_v56 = vld [vmem:[%s5968_s0 + $0x78] sm:$0xff] }
  0xd6   :  { %4333 = vmatprep.subr.bf16.mxu1 %v4745_v57  ;;  %v3696_v57 = vcombine.low %v35_v55, %v35_v55 }
  0xd8   :  { %4312 = vmatpush3.bf16.msra.mxu0 %v4746_v58  ;;  %v3697_v58 = vcombine.high %v35_v55, %v35_v55  ;;  %v4840_v55 = vld [vmem:[%s5967_s1 + $0x950] sm:$0xff]  }
  0xd9   :  { %4334 = vmatpush3.bf16.msra.mxu1 %v4747_v59  ;;  %4313 = vmatprep.subr.bf16.mxu0 %v4748_v60  ;;  %v3698_v59 = vcombine.low %v36_v56, %v36_v56  ;;  %v3699_v60 = vcombine.high %v36_v56, %v36_v56  ;;  %v4841_v56 = vld [vmem:[%s5967_s1 + $0x9d0] sm:$0xff]  }
  0xda   :  { %4335 = vmatprep.subr.bf16.mxu1 %v4749_v61  ;;  %v4796_v61 = vld [vmem:[%s5967_s1 + $0x840] sm:$0xff]  }
  0xdc   :  { %4314 = vmatpush3.bf16.msra.mxu0 %v4750_v62  ;;  %v4797_v62 = vld [vmem:[%s5967_s1 + $0x8c0] sm:$0xff]  }
  0xdd   :  { %4336 = vmatpush3.bf16.msra.mxu1 %v4751_v63  ;;  %4315 = vmatprep.subr.bf16.mxu0 %v4752_v0  ;;  %v4798_v63 = vld [vmem:[%s5967_s1 + $0x800] sm:$0xff]  }
  0xde   :  { %4337 = vmatprep.subr.bf16.mxu1 %v4753_v1  ;;  %v4799_v0 = vld [vmem:[%s5967_s1 + $0x880] sm:$0xff]   ;;  %v4800_v1 = vld [vmem:[%s5967_s1 + $0x848] sm:$0xff]  }
  0xe0   :  { %4316 = vmatpush3.bf16.msra.mxu0 %v4754_v2  ;;  %v4801_v2 = vld [vmem:[%s5967_s1 + $0x8c8] sm:$0xff]  }
  0xe1   :  { %4338 = vmatpush3.bf16.msra.mxu1 %v4755_v3  ;;  %4345 = vmatprep.subr.bf16.mxu0 %v4760_v9  ;;  %v4802_v3 = vld [vmem:[%s5967_s1 + $0x808] sm:$0xff]   ;;  %v4808_v9 = vld [vmem:[%s5967_s1 + $0x858] sm:$0xff]  }
  0xe2   :  { %4367 = vmatprep.subr.bf16.mxu1 %v4761_v11  ;;  %v4810_v11 = vld [vmem:[%s5967_s1 + $0x818] sm:$0xff]  }
  0xe3   :  { %3261 = vmatmul.mubr.bf16.vlgmr.msra.gmra.mrb[24].mxu0 %v3692_v6  ;;  %v4805_v6 = vld [vmem:[%s5967_s1 + $0x8d0] sm:$0xff]  }
  0xe4   :  { %3301 = vmatmul.mubr.bf16.vlgmr.msra.gmra.mrb[24].mxu1 %v3694_v8  ;;  %4346 = vmatpush3.bf16.msra.mxu0 %v4762_v12  ;;  %v4807_v8 = vld [vmem:[%s5967_s1 + $0x890] sm:$0xff]   ;;  %v4811_v12 = vld [vmem:[%s5967_s1 + $0x898] sm:$0xff]  }
  0xe5   :  { %4368 = vmatpush3.bf16.msra.mxu1 %v4763_v13  ;;  %4347 = vmatprep.subr.bf16.mxu0 %v4764_v14  ;;  %v4812_v13 = vld [vmem:[%s5967_s1 + $0x860] sm:$0xff]  }
  0xe6   :  { %4369 = vmatprep.subr.bf16.mxu1 %v4765_v15  ;;  %3340 = vmatprep.mubr.bf16.mxu0 %v3697_v58  ;;  %v4813_v14 = vld [vmem:[%s5967_s1 + $0x8e0] sm:$0xff]   ;;  %v4843_v58 = vld [vmem:[%s5967_s1 + $0x990] sm:$0xff]  }
  0xe7   :  { %3380 = vmatprep.mubr.bf16.mxu1 %v3699_v60  ;;  %v4814_v15 = vld [vmem:[%s5967_s1 + $0x820] sm:$0xff]   ;;  %v4845_v60 = vld [vmem:[%s5967_s1 + $0x9d8] sm:$0xff]  }
  0xe8   :  { %4348 = vmatpush3.bf16.msra.mxu0 %v4766_v16 }
  0xe9   :  { %4370 = vmatpush3.bf16.msra.mxu1 %v4767_v17  ;;  %4349 = vmatprep.subr.bf16.mxu0 %v4768_v18  ;;  %v4815_v17 = vld [vmem:[%s5967_s1 + $0x8a0] sm:$0xff]  }
  0xea   :  { %4371 = vmatprep.subr.bf16.mxu1 %v4769_v19 }
  0xec   :  { %4350 = vmatpush3.bf16.msra.mxu0 %v4770_v20 }
  0xed   :  { %4372 = vmatpush3.bf16.msra.mxu1 %v4771_v21  ;;  %4351 = vmatprep.subr.bf16.mxu0 %v4772_v22 }
  0xee   :  { %4373 = vmatprep.subr.bf16.mxu1 %v4773_v23  ;;  %v4816_v23 = vld [vmem:[%s5967_s1 + $0x868] sm:$0xff]  }
  0xf0   :  { %4352 = vmatpush3.bf16.msra.mxu0 %v4774_v24 }
  0xf1   :  { %4374 = vmatpush3.bf16.msra.mxu1 %v4775_v25  ;;  %4353 = vmatprep.subr.bf16.mxu0 %v4776_v26  ;;  %v4817_v25 = vld [vmem:[%s5967_s1 + $0x8e8] sm:$0xff]  }
  0xf2   :  { %4375 = vmatprep.subr.bf16.mxu1 %v4777_v27 }
  0xf4   :  { %4354 = vmatpush3.bf16.msra.mxu0 %v4778_v28  ;;  %v4818_v28 = vld [vmem:[%s5967_s1 + $0x828] sm:$0xff]  }
  0xf5   :  { %4376 = vmatpush3.bf16.msra.mxu1 %v4779_v30  ;;  %4355 = vmatprep.subr.bf16.mxu0 %v4780_v37  ;;  %v4819_v30 = vld [vmem:[%s5967_s1 + $0x8a8] sm:$0xff]   ;;  %v4824_v37 = vld [vmem:[%s5967_s1 + $0x878] sm:$0xff]  }
  0xf6   :  { %v4053_v29 = vpop.f32.mrb[0].mxu0  ;;  %4377 = vmatprep.subr.bf16.mxu1 %v4781_v39  ;;  %v4826_v39 = vld [vmem:[%s5967_s1 + $0x838] sm:$0xff]  }
  0xf7   :  { %v4075_v31 = vpop.f32.mrb[0].mxu1  ;;  %v4054_v33 = vpop.f32.mrb[1].mxu0 }
  0xf8   :  { %v4076_v34 = vpop.f32.mrb[1].mxu1  ;;  %v4055_v35 = vadd.f32 %v4054_v33, %v4053_v29  ;;  %v4056_v38 = vpop.f32.mrb[2].mxu0  ;;  %4356 = vmatpush3.bf16.msra.mxu0 %v4782_v42  ;;  %v4820_v33 = vld [vmem:[%s5967_s1 + $0x870] sm:$0xff]   ;;  %v38_v42 = vld [vmem:[%s5968_s0 + $0x88] sm:$0xff] }
  0xf9   :  { %v4077_v36 = vadd.f32 %v4076_v34, %v4075_v31  ;;  %v4078_v40 = vpop.f32.mrb[2].mxu1  ;;  %v4057_v43 = vpop.f32.mrb[3].mxu0  ;;  %4378 = vmatpush3.bf16.msra.mxu1 %v4783_v44  ;;  %4357 = vmatprep.subr.bf16.mxu0 %v4784_v47  ;;  %v4821_v34 = vld [vmem:[%s5967_s1 + $0x8f0] sm:$0xff]   ;;  %v4825_v38 = vld [vmem:[%s5967_s1 + $0x8f8] sm:$0xff]   ;;  %v4832_v47 = vld [vmem:[%s5967_s1 + $0x940] sm:$0xff]  }
  0xfa   :  { %v2783_v41 = vadd.f32 %v4055_v35, %v3667_v32  ;;  %v4079_v45 = vpop.f32.mrb[3].mxu1  ;;  %4379 = vmatprep.subr.bf16.mxu1 %v4785_v48  ;;  %v4822_v35 = vld [vmem:[%s5967_s1 + $0x830] sm:$0xff]   ;;  %v4827_v40 = vld [vmem:[%s5967_s1 + $0x8b8] sm:$0xff]   ;;  %v4833_v48 = vld [vmem:[%s5967_s1 + $0x9c0] sm:$0xff]  }
  0xfb   :  { %v3702_v45 = vcombine.low %v38_v42, %v38_v42 }
  0xfc   :  { %v5697_v46 = vadd.f32 %v4077_v36, %v2783_v41  ;;  %4358 = vmatpush3.bf16.msra.mxu0 %v4786_v49  ;;  %v4823_v36 = vld [vmem:[%s5967_s1 + $0x8b0] sm:$0xff]   ;;  %v37_v41 = vld [vmem:[%s5968_s0 + $0x80] sm:$0xff] }
  0xfd   :  { %4380 = vmatpush3.bf16.msra.mxu1 %v4787_v50  ;;  %4359 = vmatprep.subr.bf16.mxu0 %v4788_v51  ;;  %v3700_v43 = vcombine.low %v37_v41, %v37_v41  ;;  %v3701_v44 = vcombine.high %v37_v41, %v37_v41  ;;  %v4834_v49 = vld [vmem:[%s5967_s1 + $0x900] sm:$0xff]   ;;  %v4836_v51 = vld [vmem:[%s5967_s1 + $0x948] sm:$0xff]  }
  0xfe   :  { %4381 = vmatprep.subr.bf16.mxu1 %v4789_v52  ;;  %v4835_v50 = vld [vmem:[%s5967_s1 + $0x980] sm:$0xff]   ;;  %v4837_v52 = vld [vmem:[%s5967_s1 + $0x9c8] sm:$0xff]  }
 0x100   :  { %4360 = vmatpush3.bf16.msra.mxu0 %v4790_v53  ;;  %v4838_v53 = vld [vmem:[%s5967_s1 + $0x908] sm:$0xff]  }
 0x101   :  { %4382 = vmatpush3.bf16.msra.mxu1 %v4791_v54  ;;  %4389 = vmatprep.subr.bf16.mxu0 %v4796_v61  ;;  %v4839_v54 = vld [vmem:[%s5967_s1 + $0x988] sm:$0xff]   ;;  %v4846_v61 = vld [vmem:[%s5967_s1 + $0x918] sm:$0xff]  }
 0x102   :  { %4411 = vmatprep.subr.bf16.mxu1 %v4797_v62  ;;  %v4847_v62 = vld [vmem:[%s5967_s1 + $0x998] sm:$0xff]  }
 0x103   :  { %3341 = vmatmul.mubr.bf16.vlgmr.msra.gmra.mrb[28].mxu0 %v3696_v57  ;;  %v4842_v57 = vld [vmem:[%s5967_s1 + $0x910] sm:$0xff]  }
 0x104   :  { %3381 = vmatmul.mubr.bf16.vlgmr.msra.gmra.mrb[28].mxu1 %v3698_v59  ;;  %4390 = vmatpush3.bf16.msra.mxu0 %v4798_v63  ;;  %v4844_v59 = vld [vmem:[%s5967_s1 + $0x958] sm:$0xff]   ;;  %v4848_v63 = vld [vmem:[%s5967_s1 + $0x960] sm:$0xff]  }
 0x105   :  { %4412 = vmatpush3.bf16.msra.mxu1 %v4799_v0  ;;  %4391 = vmatprep.subr.bf16.mxu0 %v4800_v1  ;;  %v4849_v0 = vld [vmem:[%s5967_s1 + $0x9e0] sm:$0xff]  }
 0x106   :  { %4413 = vmatprep.subr.bf16.mxu1 %v4801_v2  ;;  %3420 = vmatprep.mubr.bf16.mxu0 %v3701_v44  ;;  %v4850_v2 = vld [vmem:[%s5967_s1 + $0x920] sm:$0xff]  }
 0x108   :  { %4392 = vmatpush3.bf16.msra.mxu0 %v4802_v3 }
 0x109   :  { %4414 = vmatpush3.bf16.msra.mxu1 %v4803_v4  ;;  %4393 = vmatprep.subr.bf16.mxu0 %v4804_v5  ;;  %v4851_v4 = vld [vmem:[%s5967_s1 + $0x9a0] sm:$0xff]  }
 0x10a   :  { %4415 = vmatprep.subr.bf16.mxu1 %v4805_v6 }
 0x10c   :  { %4394 = vmatpush3.bf16.msra.mxu0 %v4806_v7 }
 0x10d   :  { %4416 = vmatpush3.bf16.msra.mxu1 %v4807_v8  ;;  %4395 = vmatprep.subr.bf16.mxu0 %v4808_v9  ;;  %v4852_v8 = vld [vmem:[%s5967_s1 + $0x968] sm:$0xff]  }
 0x10e   :  { %4417 = vmatprep.subr.bf16.mxu1 %v4809_v10  ;;  %v4853_v10 = vld [vmem:[%s5967_s1 + $0x9e8] sm:$0xff]  }
 0x110   :  { %4396 = vmatpush3.bf16.msra.mxu0 %v4810_v11 }
 0x111   :  { %4418 = vmatpush3.bf16.msra.mxu1 %v4811_v12  ;;  %4397 = vmatprep.subr.bf16.mxu0 %v4812_v13 }
 0x112   :  { %4419 = vmatprep.subr.bf16.mxu1 %v4813_v14  ;;  %v4854_v14 = vld [vmem:[%s5967_s1 + $0x928] sm:$0xff]  }
 0x114   :  { %4398 = vmatpush3.bf16.msra.mxu0 %v4814_v15  ;;  %v4855_v15 = vld [vmem:[%s5967_s1 + $0x9a8] sm:$0xff]  }
 0x115   :  { %4420 = vmatpush3.bf16.msra.mxu1 %v4815_v17  ;;  %4399 = vmatprep.subr.bf16.mxu0 %v4816_v23  ;;  %v4860_v23 = vld [vmem:[%s5967_s1 + $0x978] sm:$0xff]  }
 0x116   :  { %v4097_v16 = vpop.f32.mrb[4].mxu0  ;;  %4421 = vmatprep.subr.bf16.mxu1 %v4817_v25  ;;  %v4862_v25 = vld [vmem:[%s5967_s1 + $0x938] sm:$0xff]  }
 0x117   :  { %v4119_v18 = vpop.f32.mrb[4].mxu1  ;;  %v4098_v19 = vpop.f32.mrb[5].mxu0 }
 0x118   :  { %v4120_v20 = vpop.f32.mrb[5].mxu1  ;;  %v4099_v21 = vadd.f32 %v4098_v19, %v4097_v16  ;;  %v4100_v24 = vpop.f32.mrb[6].mxu0  ;;  %4400 = vmatpush3.bf16.msra.mxu0 %v4818_v28  ;;  %v4856_v19 = vld [vmem:[%s5967_s1 + $0x970] sm:$0xff]   ;;  %v40_v28 = vld [vmem:[%s5968_s0 + $0x98] sm:$0xff] }
 0x119   :  { %v4121_v22 = vadd.f32 %v4120_v20, %v4119_v18  ;;  %v4122_v26 = vpop.f32.mrb[6].mxu1  ;;  %v4101_v29 = vpop.f32.mrb[7].mxu0  ;;  %4422 = vmatpush3.bf16.msra.mxu1 %v4819_v30  ;;  %4401 = vmatprep.subr.bf16.mxu0 %v4820_v33  ;;  %v4857_v20 = vld [vmem:[%s5967_s1 + $0x9f0] sm:$0xff]   ;;  %v4861_v24 = vld [vmem:[%s5967_s1 + $0x9f8] sm:$0xff]  }
 0x11a   :  { %v2863_v27 = vadd.f32 %v4099_v21, %v5697_v46  ;;  %v4123_v31 = vpop.f32.mrb[7].mxu1  ;;  %4423 = vmatprep.subr.bf16.mxu1 %v4821_v34  ;;  %v3703_v46 = vcombine.high %v38_v42, %v38_v42  ;;  %v4858_v21 = vld [vmem:[%s5967_s1 + $0x930] sm:$0xff]   ;;  %v4863_v26 = vld [vmem:[%s5967_s1 + $0x9b8] sm:$0xff]  }
 0x11b   :  { %v3706_v31 = vcombine.low %v40_v28, %v40_v28 }
 0x11c   :  { %v5802_v32 = vadd.f32 %v4121_v22, %v2863_v27  ;;  %4402 = vmatpush3.bf16.msra.mxu0 %v4822_v35  ;;  %3460 = vmatprep.mubr.bf16.mxu1 %v3703_v46  ;;  %v4859_v22 = vld [vmem:[%s5967_s1 + $0x9b0] sm:$0xff]  }
 0x11d   :  { %4424 = vmatpush3.bf16.msra.mxu1 %v4823_v36  ;;  %4403 = vmatprep.subr.bf16.mxu0 %v4824_v37  ;;  %v39_v27 = vld [vmem:[%s5968_s0 + $0x90] sm:$0xff] }
 0x11e   :  { %4425 = vmatprep.subr.bf16.mxu1 %v4825_v38  ;;  %v3704_v29 = vcombine.low %v39_v27, %v39_v27  ;;  %v3705_v30 = vcombine.high %v39_v27, %v39_v27 }
 0x120   :  { %4404 = vmatpush3.bf16.msra.mxu0 %v4826_v39 }
 0x121   :  { %4426 = vmatpush3.bf16.msra.mxu1 %v4827_v40  ;;  %4433 = vmatprep.subr.bf16.mxu0 %v4832_v47 }
 0x122   :  { %4455 = vmatprep.subr.bf16.mxu1 %v4833_v48 }
 0x123   :  { %3421 = vmatmul.mubr.bf16.vlgmr.msra.gmra.mrb[32].mxu0 %v3700_v43 }
 0x124   :  { %3461 = vmatmul.mubr.bf16.vlgmr.msra.gmra.mrb[32].mxu1 %v3702_v45  ;;  %4434 = vmatpush3.bf16.msra.mxu0 %v4834_v49 }
 0x125   :  { %4456 = vmatpush3.bf16.msra.mxu1 %v4835_v50  ;;  %4435 = vmatprep.subr.bf16.mxu0 %v4836_v51 }
 0x126   :  { %4457 = vmatprep.subr.bf16.mxu1 %v4837_v52  ;;  %3500 = vmatprep.mubr.bf16.mxu0 %v3705_v30 }
 0x128   :  { %4436 = vmatpush3.bf16.msra.mxu0 %v4838_v53 }
 0x129   :  { %4458 = vmatpush3.bf16.msra.mxu1 %v4839_v54  ;;  %4437 = vmatprep.subr.bf16.mxu0 %v4840_v55 }
 0x12a   :  { %4459 = vmatprep.subr.bf16.mxu1 %v4841_v56 }
 0x12c   :  { %4438 = vmatpush3.bf16.msra.mxu0 %v4842_v57  ;;  %v4876_v57 = vmov 0.0  }
 0x12d   :  { %4460 = vmatpush3.bf16.msra.mxu1 %v4843_v58  ;;  %4439 = vmatprep.subr.bf16.mxu0 %v4844_v59  ;;  %v4868_v58 = vld [vmem:[%s5970_s3] sm:$0xff]   ;;  %v4869_v59 = vld [vmem:[%s5970_s3 + $0x8] sm:$0xff]  }
 0x12e   :  { %4461 = vmatprep.subr.bf16.mxu1 %v4845_v60  ;;  %v4870_v60 = vld [vmem:[%s5970_s3 + $0x10] sm:$0xff]  }
 0x130   :  { %4440 = vmatpush3.bf16.msra.mxu0 %v4846_v61  ;;  %v4871_v61 = vld [vmem:[%s5970_s3 + $0x18] sm:$0xff]  }
 0x131   :  { %4462 = vmatpush3.bf16.msra.mxu1 %v4847_v62  ;;  %4441 = vmatprep.subr.bf16.mxu0 %v4848_v63  ;;  %v4872_v62 = vld [vmem:[%s5970_s3 + $0x20] sm:$0xff]  }
 0x132   :  { %4463 = vmatprep.subr.bf16.mxu1 %v4849_v0 }
 0x134   :  { %4442 = vmatpush3.bf16.msra.mxu0 %v4850_v2 }
 0x135   :  { %4464 = vmatpush3.bf16.msra.mxu1 %v4851_v4  ;;  %4443 = vmatprep.subr.bf16.mxu0 %v4852_v8 }
 0x136   :  { %v4141_v1 = vpop.f32.mrb[8].mxu0  ;;  %4465 = vmatprep.subr.bf16.mxu1 %v4853_v10  ;;  %v4873_v10 = vld [vmem:[%s5970_s3 + $0x28] sm:$0xff]  }
 0x137   :  { %v4163_v3 = vpop.f32.mrb[8].mxu1  ;;  %v4142_v5 = vpop.f32.mrb[9].mxu0 }
 0x138   :  { %v4143_v6 = vadd.f32 %v4142_v5, %v4141_v1  ;;  %v4164_v7 = vpop.f32.mrb[9].mxu1  ;;  %v4144_v11 = vpop.f32.mrb[10].mxu0  ;;  %4444 = vmatpush3.bf16.msra.mxu0 %v4854_v14 }
 0x139   :  { %v4165_v9 = vadd.f32 %v4164_v7, %v4163_v3  ;;  %v4166_v13 = vpop.f32.mrb[10].mxu1  ;;  %v4145_v16 = vpop.f32.mrb[11].mxu0  ;;  %4466 = vmatpush3.bf16.msra.mxu1 %v4855_v15  ;;  %4445 = vmatprep.subr.bf16.mxu0 %v4856_v19 }
 0x13a   :  { %v2943_v12 = vadd.f32 %v4143_v6, %v5802_v32  ;;  %v4167_v18 = vpop.f32.mrb[11].mxu1  ;;  %4467 = vmatprep.subr.bf16.mxu1 %v4857_v20  ;;  %v3707_v32 = vcombine.high %v40_v28, %v40_v28  ;;  %v4875_v13 = vld [vmem:[%s5970_s3 + $0x38] sm:$0xff]  }
 0x13c   :  { %v2983_v17 = vadd.f32 %v4165_v9, %v2943_v12  ;;  %4446 = vmatpush3.bf16.msra.mxu0 %v4858_v21  ;;  %3540 = vmatprep.mubr.bf16.mxu1 %v3707_v32  ;;  %v4874_v12 = vld [vmem:[%s5970_s3 + $0x30] sm:$0xff]  }
 0x13d   :  { %4468 = vmatpush3.bf16.msra.mxu1 %v4859_v22  ;;  %4447 = vmatprep.subr.bf16.mxu0 %v4860_v23 }
 0x13e   :  { %4469 = vmatprep.subr.bf16.mxu1 %v4861_v24 }
 0x140   :  { %4448 = vmatpush3.bf16.msra.mxu0 %v4862_v25 }
 0x141   :  { %4470 = vmatpush3.bf16.msra.mxu1 %v4863_v26  ;;  %4486 = vmatprep.subr.bf16.mxu0 %v4876_v57 }
 0x143   :  { %3501 = vmatmul.mubr.bf16.vlgmr.msra.gmra.mrb[36].mxu0 %v3704_v29 }
 0x144   :  { %3541 = vmatmul.mubr.bf16.vlgmr.msra.gmra.mrb[36].mxu1 %v3706_v31  ;;  %4487 = vmatpush3.bf16.msra.mxu0 %v4868_v58 }
 0x145   :  { %4488 = vmatprep.subr.bf16.mxu0 %v4876_v57  ;;  %4502 = vmatprep.mubr.msk.bf16.mxu0 %vm4877_vm0, %v4876_v57 }
 0x148   :  { %4489 = vmatpush3.bf16.msra.mxu0 %v4869_v59 }
 0x149   :  { %4490 = vmatprep.subr.bf16.mxu0 %v4876_v57 }
 0x14c   :  { %4491 = vmatpush3.bf16.msra.mxu0 %v4870_v60 }
 0x14d   :  { %4492 = vmatprep.subr.bf16.mxu0 %v4876_v57 }
 0x150   :  { %4493 = vmatpush3.bf16.msra.mxu0 %v4871_v61 }
 0x151   :  { %4494 = vmatprep.subr.bf16.mxu0 %v4876_v57 }
 0x154   :  { %4495 = vmatpush3.bf16.msra.mxu0 %v4872_v62 }
 0x155   :  { %4496 = vmatprep.subr.bf16.mxu0 %v4876_v57 }
 0x156   :  { %v4185_v33 = vpop.f32.mrb[12].mxu0 }
 0x157   :  { %v4207_v34 = vpop.f32.mrb[12].mxu1  ;;  %v4186_v35 = vpop.f32.mrb[13].mxu0 }
 0x158   :  { %v4187_v36 = vadd.f32 %v4186_v35, %v4185_v33  ;;  %v4208_v37 = vpop.f32.mrb[13].mxu1  ;;  %v4188_v38 = vpop.f32.mrb[14].mxu0  ;;  %4497 = vmatpush3.bf16.msra.mxu0 %v4873_v10 }
 0x159   :  { %v4209_v39 = vadd.f32 %v4208_v37, %v4207_v34  ;;  %v4210_v40 = vpop.f32.mrb[14].mxu1  ;;  %v4189_v41 = vpop.f32.mrb[15].mxu0  ;;  %4498 = vmatprep.subr.bf16.mxu0 %v4876_v57 }
 0x15a   :  { %v3023_v42 = vadd.f32 %v4187_v36, %v2983_v17  ;;  %v4211_v43 = vpop.f32.mrb[15].mxu1 }
 0x15c   :  { %v3063_v44 = vadd.f32 %v4209_v39, %v3023_v42  ;;  %4499 = vmatpush3.bf16.msra.mxu0 %v4874_v12 }
 0x15d   :  { %4500 = vmatprep.subr.bf16.mxu0 %v4876_v57 }
 0x160   :  { %4501 = vmatpush3.bf16.msra.mxu0 %v4875_v13 }
 0x176   :  { %v4229_v45 = vpop.f32.mrb[16].mxu0 }
 0x177   :  { %v4251_v46 = vpop.f32.mrb[16].mxu1  ;;  %v4230_v47 = vpop.f32.mrb[17].mxu0 }
 0x178   :  { %v4252_v48 = vpop.f32.mrb[17].mxu1  ;;  %v4231_v49 = vadd.f32 %v4230_v47, %v4229_v45  ;;  %v4232_v51 = vpop.f32.mrb[18].mxu0 }
 0x179   :  { %v4253_v50 = vadd.f32 %v4252_v48, %v4251_v46  ;;  %v4254_v52 = vpop.f32.mrb[18].mxu1  ;;  %v4233_v53 = vpop.f32.mrb[19].mxu0 }
 0x17a   :  { %v4255_v54 = vpop.f32.mrb[19].mxu1  ;;  %v3103_v55 = vadd.f32 %v4231_v49, %v3063_v44 }
 0x17c   :  { %v3143_v56 = vadd.f32 %v4253_v50, %v3103_v55 }
 0x196   :  { %v4273_v63 = vpop.f32.mrb[20].mxu0 }
 0x197   :  { %v4295_v0 = vpop.f32.mrb[20].mxu1  ;;  %v4274_v1 = vpop.f32.mrb[21].mxu0 }
 0x198   :  { %v4275_v2 = vadd.f32 %v4274_v1, %v4273_v63  ;;  %v4296_v3 = vpop.f32.mrb[21].mxu1  ;;  %v4276_v4 = vpop.f32.mrb[22].mxu0 }
 0x199   :  { %v4297_v5 = vadd.f32 %v4296_v3, %v4295_v0  ;;  %v4298_v6 = vpop.f32.mrb[22].mxu1  ;;  %v4277_v7 = vpop.f32.mrb[23].mxu0  ;;  %v4028_v0 = vld [vmem:[%s5971_s4] ss:$0 sm:$0xff] }
 0x19a   :  { %v3183_v8 = vadd.f32 %v4275_v2, %v3143_v56  ;;  %v4299_v9 = vpop.f32.mrb[23].mxu1 }
 0x19c   :  { %v3223_v11 = vadd.f32 %v4297_v5, %v3183_v8 }
 0x1b6   :  { %v4317_v14 = vpop.f32.mrb[24].mxu0 }
 0x1b7   :  { %v4339_v15 = vpop.f32.mrb[24].mxu1  ;;  %v4318_v16 = vpop.f32.mrb[25].mxu0 }
 0x1b8   :  { %v4319_v17 = vadd.f32 %v4318_v16, %v4317_v14  ;;  %v4340_v18 = vpop.f32.mrb[25].mxu1  ;;  %v4320_v19 = vpop.f32.mrb[26].mxu0 }
 0x1b9   :  { %v4341_v20 = vadd.f32 %v4340_v18, %v4339_v15  ;;  %v4342_v21 = vpop.f32.mrb[26].mxu1  ;;  %v4321_v22 = vpop.f32.mrb[27].mxu0 }
 0x1ba   :  { %v3263_v23 = vadd.f32 %v4319_v17, %v3223_v11  ;;  %v4343_v24 = vpop.f32.mrb[27].mxu1 }
 0x1bc   :  { %v3303_v25 = vadd.f32 %v4341_v20, %v3263_v23 }
 0x1d6   :  { %v4361_v26 = vpop.f32.mrb[28].mxu0 }
 0x1d7   :  { %v4383_v27 = vpop.f32.mrb[28].mxu1  ;;  %v4362_v28 = vpop.f32.mrb[29].mxu0 }
 0x1d8   :  { %v4363_v29 = vadd.f32 %v4362_v28, %v4361_v26  ;;  %v4384_v30 = vpop.f32.mrb[29].mxu1  ;;  %v4364_v31 = vpop.f32.mrb[30].mxu0 }
 0x1d9   :  { %v4385_v32 = vadd.f32 %v4384_v30, %v4383_v27  ;;  %v4386_v33 = vpop.f32.mrb[30].mxu1  ;;  %v4365_v34 = vpop.f32.mrb[31].mxu0 }
 0x1da   :  { %v3343_v35 = vadd.f32 %v4363_v29, %v3303_v25  ;;  %v4387_v36 = vpop.f32.mrb[31].mxu1 }
 0x1dc   :  { %v3383_v37 = vadd.f32 %v4385_v32, %v3343_v35 }
 0x1f6   :  { %v4405_v38 = vpop.f32.mrb[32].mxu0 }
 0x1f7   :  { %v4427_v39 = vpop.f32.mrb[32].mxu1  ;;  %v4406_v40 = vpop.f32.mrb[33].mxu0 }
 0x1f8   :  { %v4407_v41 = vadd.f32 %v4406_v40, %v4405_v38  ;;  %v4428_v42 = vpop.f32.mrb[33].mxu1  ;;  %v4408_v43 = vpop.f32.mrb[34].mxu0 }
 0x1f9   :  { %v4429_v44 = vadd.f32 %v4428_v42, %v4427_v39  ;;  %v4430_v45 = vpop.f32.mrb[34].mxu1  ;;  %v4409_v46 = vpop.f32.mrb[35].mxu0 }
 0x1fa   :  { %v3423_v47 = vadd.f32 %v4407_v41, %v3383_v37  ;;  %v4431_v48 = vpop.f32.mrb[35].mxu1 }
 0x1fc   :  { %v3463_v49 = vadd.f32 %v4429_v44, %v3423_v47 }
 0x216   :  { %v4449_v50 = vpop.f32.mrb[36].mxu0 }
 0x217   :  { %v4471_v51 = vpop.f32.mrb[36].mxu1  ;;  %v4450_v52 = vpop.f32.mrb[37].mxu0 }
 0x218   :  { %v4451_v53 = vadd.f32 %v4450_v52, %v4449_v50  ;;  %v4472_v54 = vpop.f32.mrb[37].mxu1  ;;  %v4452_v55 = vpop.f32.mrb[38].mxu0 }
 0x219   :  { %v4473_v56 = vadd.f32 %v4472_v54, %v4471_v51  ;;  %v4474_v57 = vpop.f32.mrb[38].mxu1  ;;  %v4453_v58 = vpop.f32.mrb[39].mxu0 }
 0x21a   :  { %v3503_v59 = vadd.f32 %v4451_v53, %v3463_v49  ;;  %v4475_v60 = vpop.f32.mrb[39].mxu1 }
 0x21c   :  { %v3543_v61 = vadd.f32 %v4473_v56, %v3503_v59 }
 0x21e   :  { %v3548_v62 = vmax.f32 %v3543_v61, 0.0 }
 0x220   :  { %v3549_v63 = vpack.c.bf16 %v3548_v62, %v3548_v62 }
 0x222   :  { %4503 = vmatmul.mubr.bf16.vlgmr.msra.gmra.mrb[40].mxu0 %v3549_v63 }
 0x2f5   :  { %v3655_v1 = vpop.f32.mrb[40].mxu0 }
 0x2f6   :  { %v3656_v2 = vadd.f32 %v4028_v0, %v3655_v1  ;;  %v4504_v3 = vpop.f32.mrb[41].mxu0 }
 0x2f7   :  { %v3658_v4 = vpop.f32.mrb[42].mxu0 }
 0x2f8   :  { %v3661_v5 = vmax.f32 %v3656_v2, 0.0  ;;  %v4505_v6 = vpop.f32.mrb[43].mxu0 }
 0x2fa   :  { %3662 = vst [vmem:[%s5972_s5] sm:$0xff] %v3661_v5 }

</bundles_post_ra>
